<compile_context>
chip_gen: v5e
topology: v5e:2x2
jax: 0.10.0
libtpu: 0.0.40
codegen_flags: <defaults>
</compile_context>

<pallas_src>
import jax
import jax.numpy as jnp
from jax import lax
from jax.experimental import pallas as pl
from jax.experimental.pallas import tpu as pltpu

VOCAB_SIZE = 64
SENTENCE_LEN = 8
HIDDEN = 256                    # required: HIDDEN // 2 == 128 (hardcoded embedding_dim)
EMBED_DIM = HIDDEN // 2         # 128
N_CLASSES = 4
N_HIDDEN_BLOCKS = 8             # Linear(H,H)+BN+ReLU blocks after the first block
N_BN = N_HIDDEN_BLOCKS + 1      # 9 BatchNorm layers
BN_EPS = 1e-5
SUBLANE = 8
OUT_PAD = 128                   # lane-dense padded width of the final projection
FOLD_K = SENTENCE_LEN * VOCAB_SIZE   # 512


def _make_kernel(batch):
    """batch = true (unpadded) batch size; refs are padded to a multiple of 8 rows."""
    inv_b = 1.0 / float(batch)

    def kernel(ids_ref, ew1_ref, wh_ref, wo_ref, vecs_ref, out_ref):
        m_rows = out_ref.shape[0]

        if batch == m_rows:
            def masked(h):
                return h
        else:
            row = lax.broadcasted_iota(jnp.int32, (m_rows, 1), 0)
            valid = row < batch

            def masked(h):
                return jnp.where(valid, h, 0.0)

        def bn_relu(h, layer):
            # BatchNorm1d train-mode forward: biased batch stats, single pass,
            # gamma folded into scale, mean folded into shift (2 broadcast ops).
            hm = masked(h)
            s1 = jnp.sum(hm, axis=0, keepdims=True)               # (1, HIDDEN)
            s2 = jnp.sum(hm * hm, axis=0, keepdims=True)
            mean = s1 * inv_b
            var = jnp.maximum(s2 * inv_b - mean * mean, 0.0)
            gamma = vecs_ref[2 * layer:2 * layer + 1, :]          # (1, HIDDEN)
            beta = vecs_ref[2 * layer + 1:2 * layer + 2, :]
            scale = gamma * lax.rsqrt(var + BN_EPS)
            shift = beta - mean * scale
            return jnp.maximum(h * scale + shift, 0.0)

        # --- Embedding + Flatten + Linear(S*128 -> 256) as ONE K=512 matmul ---
        # ew1 already holds emb[v] @ W1-slice(s), so a multi-hot at columns
        # s*64 + ids[:, s] reproduces the gather + flattened matmul exactly.
        ids = ids_ref[...]                                        # (m_rows, S) int32
        kiota = lax.broadcasted_iota(jnp.int32, (m_rows, FOLD_K), 1)
        hit = kiota == ids[:, 0:1]
        for s in range(1, SENTENCE_LEN):
            hit = jnp.logical_or(hit, kiota == ids[:, s:s + 1] + s * VOCAB_SIZE)
        multi_hot = jnp.where(hit, 1.0, 0.0).astype(jnp.bfloat16)  # (m_rows, 512)
        h = jnp.dot(multi_hot, ew1_ref[...],
                    preferred_element_type=jnp.float32)           # (m_rows, 256) f32
        # (b1 intentionally omitted: cancelled exactly by the BN mean subtraction)
        h = bn_relu(h, 0)

        # --- 8 x [Linear(256,256) + BN + ReLU] (static unroll) ----------------
        for i in range(N_HIDDEN_BLOCKS):
            h = jnp.dot(h.astype(jnp.bfloat16), wh_ref[i],
                        preferred_element_type=jnp.float32)
            # (bh[i] intentionally omitted: cancelled by the BN mean subtraction)
            h = bn_relu(h, i + 1)

        # --- Final Linear(256 -> n_classes), lane-dense at width 128 ----------
        out = jnp.dot(h.astype(jnp.bfloat16), wo_ref[...],
                      preferred_element_type=jnp.float32)         # (m_rows, 128)
        bo_row = vecs_ref[2 * N_BN:2 * N_BN + 1, :]               # (1, 256)
        out_ref[...] = out + bo_row[:, :OUT_PAD]

    return kernel


@jax.jit
def textmlp_forward(ids, packed):
    """ids: (B, S) int32; packed: tuple from pack_params()."""
    ew1, wh, wo_pad, vecs = packed
    b = ids.shape[0]
    m_rows = ((b + SUBLANE - 1) // SUBLANE) * SUBLANE
    if m_rows != b:   # pad batch to a full sublane multiple (BN stats are masked)
        ids = jnp.concatenate(
            [ids, jnp.zeros((m_rows - b, ids.shape[1]), ids.dtype)], axis=0)

    vmem = pl.BlockSpec(memory_space=pltpu.MemorySpace.VMEM)
    out = pl.pallas_call(
        _make_kernel(b),
        out_shape=jax.ShapeDtypeStruct((m_rows, OUT_PAD), jnp.float32),
        in_specs=[vmem] * 5,
        out_specs=vmem,
    )(ids, ew1, wh, wo_pad, vecs)
    return out[:b, :N_CLASSES]


def _fold_embedding_into_w1(emb, w1):
    """EW1[s*64 + v, :] = emb[v] @ W1[s*128:(s+1)*128, :], f32 compute, bf16 store.

    Mathematically identical to Embedding -> Flatten -> Linear #1 (the multi-hot
    matmul against this table is an exact row-gather-and-sum on the MXU)."""
    w1_3d = w1.reshape(SENTENCE_LEN, EMBED_DIM, HIDDEN)           # (8, 128, 256)
    ew1 = jnp.einsum('ve,seh->svh', emb.astype(jnp.float32),
                     w1_3d.astype(jnp.float32))                   # (8, 64, 256)
    return ew1.reshape(FOLD_K, HIDDEN).astype(jnp.bfloat16)       # (512, 256)


def pack_params(params):
    """Fold emb into W1, cast matmul weights to bf16, coalesce the per-layer
    vectors into ONE (19, 256) f32 array, pad wo to 128 output lanes."""
    emb, w1, b1, wh, bh, gamma, beta, wo, bo = params
    del b1, bh  # inert before train-mode BN (see header note #3)

    ew1 = _fold_embedding_into_w1(emb, w1)                        # (512, 256) bf16
    wh_bf16 = wh.astype(jnp.bfloat16)                             # (8, 256, 256)
    wo_pad = jnp.zeros((HIDDEN, OUT_PAD), jnp.bfloat16
                       ).at[:, :N_CLASSES].set(wo.astype(jnp.bfloat16))

    rows = []
    for i in range(N_BN):
        rows += [gamma[i], beta[i]]
    rows.append(jnp.zeros((HIDDEN,), jnp.float32).at[:N_CLASSES].set(bo))
    vecs = jnp.stack(rows)                                        # (19, 256) f32
    return ew1, wh_bf16, wo_pad, vecs


def ref_forward(ids, params):
    """Pure-JAX reference mirroring the PyTorch forward (train-mode BN) with the
    same bf16-weight / f32-accumulation arithmetic as the kernel.  It keeps the
    (mathematically inert) pre-BN biases from the literal PyTorch graph."""
    emb, w1, b1, wh, bh, gamma, beta, wo, bo = params
    inv_b = 1.0 / ids.shape[0]

    def bn_relu(h, i):
        s1 = jnp.sum(h, axis=0, keepdims=True)
        s2 = jnp.sum(h * h, axis=0, keepdims=True)
        mean = s1 * inv_b
        var = jnp.maximum(s2 * inv_b - mean * mean, 0.0)
        scale = gamma[i] * lax.rsqrt(var + BN_EPS)
        return jnp.maximum((h - mean) * scale + beta[i], 0.0)

    # Embedding -> Flatten -> Linear #1, expressed through the identical folded
    # bf16 table the kernel uses (so the comparison isolates kernel error).
    ew1 = _fold_embedding_into_w1(emb, w1).astype(jnp.float32)    # (512, 256)
    cols = ids + jnp.arange(SENTENCE_LEN, dtype=ids.dtype) * VOCAB_SIZE
    h = jnp.sum(ew1[cols], axis=1) + b1                           # (B, 256)
    h = bn_relu(h, 0)
    for i in range(N_HIDDEN_BLOCKS):
        h = jnp.dot(h.astype(jnp.bfloat16), wh[i].astype(jnp.bfloat16),
                    preferred_element_type=jnp.float32) + bh[i]
        h = bn_relu(h, i + 1)
    return jnp.dot(h.astype(jnp.bfloat16), wo.astype(jnp.bfloat16),
                   preferred_element_type=jnp.float32) + bo


def init_params(key):
    """PyTorch-style init; master copies in f32 (cast to bf16 at pack time)."""
    ks = jax.random.split(key, 7)
    in_features = SENTENCE_LEN * EMBED_DIM                        # 1024

    emb = jax.random.normal(ks[0], (VOCAB_SIZE, EMBED_DIM), jnp.float32)

    k1 = 1.0 / (in_features ** 0.5)
    w1 = jax.random.uniform(ks[1], (in_features, HIDDEN), jnp.float32, -k1, k1)
    b1 = jax.random.uniform(ks[2], (HIDDEN,), jnp.float32, -k1, k1)

    kh = 1.0 / (HIDDEN ** 0.5)
    wh = jax.random.uniform(ks[3], (N_HIDDEN_BLOCKS, HIDDEN, HIDDEN),
                            jnp.float32, -kh, kh)
    bh = jax.random.uniform(ks[4], (N_HIDDEN_BLOCKS, HIDDEN), jnp.float32, -kh, kh)

    gamma = jnp.ones((N_BN, HIDDEN), jnp.float32)                 # PyTorch BN defaults
    beta = jnp.zeros((N_BN, HIDDEN), jnp.float32)

    wo = jax.random.uniform(ks[5], (HIDDEN, N_CLASSES), jnp.float32, -kh, kh)
    bo = jax.random.uniform(ks[6], (N_CLASSES,), jnp.float32, -kh, kh)
    return emb, w1, b1, wh, bh, gamma, beta, wo, bo


if __name__ == "__main__":
    BATCH = 8   # one full sublane: (8,128) f32 vreg tiles are dense and train-mode
                # BN batch statistics are well conditioned.
    key = jax.random.PRNGKey(0)
    k_param, k_ids = jax.random.split(key)
    params = init_params(k_param)
    packed = pack_params(params)
    ids = jax.random.randint(k_ids, (BATCH, SENTENCE_LEN), 0, VOCAB_SIZE, jnp.int32)

    out = jax.block_until_ready(textmlp_forward(ids, packed))
    assert out.shape == (BATCH, N_CLASSES), out.shape

    expected = ref_forward(ids, params)
    err = float(jnp.max(jnp.abs(out - expected)))
    assert jnp.allclose(out, expected, atol=2e-2, rtol=2e-2), f"max abs err {err}"

    # Padding path (arbitrary batch -> next multiple of 8 rows, masked BN stats).
    # Value assert at batch=2 intentionally omitted: train-mode BN over 2 samples
    # saturates at +/-gamma with ~1/sqrt(eps) sensitivity near ties, so ulp-level
    # Pallas-vs-XLA differences can flip it; shape/finiteness is checked instead.
    out2 = jax.block_until_ready(textmlp_forward(ids[:2], packed))
    assert out2.shape == (2, N_CLASSES), out2.shape
    assert bool(jnp.all(jnp.isfinite(out2)))

    print("KERNEL_OK")
</pallas_src>

<mosaic_0001>
module attributes {stable_mosaic.version = 11 : i64} {
  func.func @kernel(%arg0: memref<8x8xi32, #tpu.memory_space<vmem>>, %arg1: memref<512x256xbf16, #tpu.memory_space<vmem>>, %arg2: memref<8x256x256xbf16, #tpu.memory_space<vmem>>, %arg3: memref<256x128xbf16, #tpu.memory_space<vmem>>, %arg4: memref<19x256xf32, #tpu.memory_space<vmem>>, %arg5: memref<8x128xf32, #tpu.memory_space<vmem>>) attributes {dimension_semantics = [], scalar_prefetch = 0 : i64, scratch_operands = 0 : i64, tpu.core_type = #tpu.core_type<tc>} {
    %c0 = arith.constant 0 : index
    %c0_0 = arith.constant 0 : index
    %0 = vector.load %arg0[%c0, %c0_0] : memref<8x8xi32, #tpu.memory_space<vmem>>, vector<8x8xi32>
    %1 = tpu.iota {dimensions = array<i32: 1>} : vector<8x512xi32>
    %2 = vector.extract_strided_slice %0 {offsets = [0, 0], sizes = [8, 1], strides = [1, 1]} : vector<8x8xi32> to vector<8x1xi32>
    %3 = vector.broadcast %2 : vector<8x1xi32> to vector<8x512xi32>
    %4 = arith.cmpi eq, %1, %3 : vector<8x512xi32>
    %5 = vector.extract_strided_slice %0 {offsets = [0, 1], sizes = [8, 1], strides = [1, 1]} : vector<8x8xi32> to vector<8x1xi32>
    %c64_i32 = arith.constant 64 : i32
    %6 = vector.broadcast %c64_i32 : i32 to vector<8x1xi32>
    %7 = arith.addi %5, %6 : vector<8x1xi32>
    %8 = vector.broadcast %7 : vector<8x1xi32> to vector<8x512xi32>
    %9 = arith.cmpi eq, %1, %8 : vector<8x512xi32>
    %10 = arith.ori %4, %9 : vector<8x512xi1>
    %11 = vector.extract_strided_slice %0 {offsets = [0, 2], sizes = [8, 1], strides = [1, 1]} : vector<8x8xi32> to vector<8x1xi32>
    %c128_i32 = arith.constant 128 : i32
    %12 = vector.broadcast %c128_i32 : i32 to vector<8x1xi32>
    %13 = arith.addi %11, %12 : vector<8x1xi32>
    %14 = vector.broadcast %13 : vector<8x1xi32> to vector<8x512xi32>
    %15 = arith.cmpi eq, %1, %14 : vector<8x512xi32>
    %16 = arith.ori %10, %15 : vector<8x512xi1>
    %17 = vector.extract_strided_slice %0 {offsets = [0, 3], sizes = [8, 1], strides = [1, 1]} : vector<8x8xi32> to vector<8x1xi32>
    %c192_i32 = arith.constant 192 : i32
    %18 = vector.broadcast %c192_i32 : i32 to vector<8x1xi32>
    %19 = arith.addi %17, %18 : vector<8x1xi32>
    %20 = vector.broadcast %19 : vector<8x1xi32> to vector<8x512xi32>
    %21 = arith.cmpi eq, %1, %20 : vector<8x512xi32>
    %22 = arith.ori %16, %21 : vector<8x512xi1>
    %23 = vector.extract_strided_slice %0 {offsets = [0, 4], sizes = [8, 1], strides = [1, 1]} : vector<8x8xi32> to vector<8x1xi32>
    %c256_i32 = arith.constant 256 : i32
    %24 = vector.broadcast %c256_i32 : i32 to vector<8x1xi32>
    %25 = arith.addi %23, %24 : vector<8x1xi32>
    %26 = vector.broadcast %25 : vector<8x1xi32> to vector<8x512xi32>
    %27 = arith.cmpi eq, %1, %26 : vector<8x512xi32>
    %28 = arith.ori %22, %27 : vector<8x512xi1>
    %29 = vector.extract_strided_slice %0 {offsets = [0, 5], sizes = [8, 1], strides = [1, 1]} : vector<8x8xi32> to vector<8x1xi32>
    %c320_i32 = arith.constant 320 : i32
    %30 = vector.broadcast %c320_i32 : i32 to vector<8x1xi32>
    %31 = arith.addi %29, %30 : vector<8x1xi32>
    %32 = vector.broadcast %31 : vector<8x1xi32> to vector<8x512xi32>
    %33 = arith.cmpi eq, %1, %32 : vector<8x512xi32>
    %34 = arith.ori %28, %33 : vector<8x512xi1>
    %35 = vector.extract_strided_slice %0 {offsets = [0, 6], sizes = [8, 1], strides = [1, 1]} : vector<8x8xi32> to vector<8x1xi32>
    %c384_i32 = arith.constant 384 : i32
    %36 = vector.broadcast %c384_i32 : i32 to vector<8x1xi32>
    %37 = arith.addi %35, %36 : vector<8x1xi32>
    %38 = vector.broadcast %37 : vector<8x1xi32> to vector<8x512xi32>
    %39 = arith.cmpi eq, %1, %38 : vector<8x512xi32>
    %40 = arith.ori %34, %39 : vector<8x512xi1>
    %41 = vector.extract_strided_slice %0 {offsets = [0, 7], sizes = [8, 1], strides = [1, 1]} : vector<8x8xi32> to vector<8x1xi32>
    %c448_i32 = arith.constant 448 : i32
    %42 = vector.broadcast %c448_i32 : i32 to vector<8x1xi32>
    %43 = arith.addi %41, %42 : vector<8x1xi32>
    %44 = vector.broadcast %43 : vector<8x1xi32> to vector<8x512xi32>
    %45 = arith.cmpi eq, %1, %44 : vector<8x512xi32>
    %46 = arith.ori %40, %45 : vector<8x512xi1>
    %cst = arith.constant 1.000000e+00 : f32
    %cst_1 = arith.constant 0.000000e+00 : f32
    %47 = vector.broadcast %cst : f32 to vector<8x512xf32>
    %48 = vector.broadcast %cst_1 : f32 to vector<8x512xf32>
    %49 = arith.select %46, %47, %48 : vector<8x512xi1>, vector<8x512xf32>
    %50 = arith.truncf %49 : vector<8x512xf32> to vector<8x512xbf16>
    %c0_2 = arith.constant 0 : index
    %c0_3 = arith.constant 0 : index
    %51 = vector.load %arg1[%c0_2, %c0_3] : memref<512x256xbf16, #tpu.memory_space<vmem>>, vector<512x256xbf16>
    %cst_4 = arith.constant dense<0.000000e+00> : vector<8x256xf32>
    %52 = tpu.matmul %50, %51, %cst_4 {dimension_numbers = #tpu.dot_dimension_numbers<[1], [0], [0], [1], [0, 0, 1, 1], [], []>} : vector<8x512xbf16>, vector<512x256xbf16>, vector<8x256xf32> -> vector<8x256xf32>
    %cst_5 = arith.constant dense<0.000000e+00> : vector<256xf32>
    %53 = vector.multi_reduction <add>, %52, %cst_5 [0] : vector<8x256xf32> to vector<256xf32>
    %54 = vector.shape_cast %53 : vector<256xf32> to vector<1x256xf32>
    %55 = arith.mulf %52, %52 : vector<8x256xf32>
    %cst_6 = arith.constant dense<0.000000e+00> : vector<256xf32>
    %56 = vector.multi_reduction <add>, %55, %cst_6 [0] : vector<8x256xf32> to vector<256xf32>
    %57 = vector.shape_cast %56 : vector<256xf32> to vector<1x256xf32>
    %cst_7 = arith.constant 1.250000e-01 : f32
    %58 = vector.broadcast %cst_7 : f32 to vector<1x256xf32>
    %59 = arith.mulf %54, %58 : vector<1x256xf32>
    %cst_8 = arith.constant 1.250000e-01 : f32
    %60 = vector.broadcast %cst_8 : f32 to vector<1x256xf32>
    %61 = arith.mulf %57, %60 : vector<1x256xf32>
    %62 = arith.mulf %59, %59 : vector<1x256xf32>
    %63 = arith.subf %61, %62 : vector<1x256xf32>
    %cst_9 = arith.constant 0.000000e+00 : f32
    %64 = vector.broadcast %cst_9 : f32 to vector<1x256xf32>
    %65 = arith.maximumf %63, %64 : vector<1x256xf32>
    %c0_10 = arith.constant 0 : index
    %c0_11 = arith.constant 0 : index
    %66 = vector.load %arg4[%c0_10, %c0_11] : memref<19x256xf32, #tpu.memory_space<vmem>>, vector<1x256xf32>
    %c1 = arith.constant 1 : index
    %c0_12 = arith.constant 0 : index
    %67 = vector.load %arg4[%c1, %c0_12] : memref<19x256xf32, #tpu.memory_space<vmem>>, vector<1x256xf32>
    %cst_13 = arith.constant 9.99999974E-6 : f32
    %68 = vector.broadcast %cst_13 : f32 to vector<1x256xf32>
    %69 = arith.addf %65, %68 : vector<1x256xf32>
    %70 = math.rsqrt %69 : vector<1x256xf32>
    %71 = arith.mulf %66, %70 : vector<1x256xf32>
    %72 = arith.mulf %59, %71 : vector<1x256xf32>
    %73 = arith.subf %67, %72 : vector<1x256xf32>
    %74 = vector.broadcast %71 : vector<1x256xf32> to vector<8x256xf32>
    %75 = arith.mulf %52, %74 : vector<8x256xf32>
    %76 = vector.broadcast %73 : vector<1x256xf32> to vector<8x256xf32>
    %77 = arith.addf %75, %76 : vector<8x256xf32>
    %cst_14 = arith.constant 0.000000e+00 : f32
    %78 = vector.broadcast %cst_14 : f32 to vector<8x256xf32>
    %79 = arith.maximumf %77, %78 : vector<8x256xf32>
    %80 = arith.truncf %79 : vector<8x256xf32> to vector<8x256xbf16>
    %c0_15 = arith.constant 0 : index
    %c0_16 = arith.constant 0 : index
    %c0_17 = arith.constant 0 : index
    %81 = vector.load %arg2[%c0_15, %c0_16, %c0_17] : memref<8x256x256xbf16, #tpu.memory_space<vmem>>, vector<1x256x256xbf16>
    %82 = vector.shape_cast %81 : vector<1x256x256xbf16> to vector<256x256xbf16>
    %cst_18 = arith.constant dense<0.000000e+00> : vector<8x256xf32>
    %83 = tpu.matmul %80, %82, %cst_18 {dimension_numbers = #tpu.dot_dimension_numbers<[1], [0], [0], [1], [0, 0, 1, 1], [], []>} : vector<8x256xbf16>, vector<256x256xbf16>, vector<8x256xf32> -> vector<8x256xf32>
    %cst_19 = arith.constant dense<0.000000e+00> : vector<256xf32>
    %84 = vector.multi_reduction <add>, %83, %cst_19 [0] : vector<8x256xf32> to vector<256xf32>
    %85 = vector.shape_cast %84 : vector<256xf32> to vector<1x256xf32>
    %86 = arith.mulf %83, %83 : vector<8x256xf32>
    %cst_20 = arith.constant dense<0.000000e+00> : vector<256xf32>
    %87 = vector.multi_reduction <add>, %86, %cst_20 [0] : vector<8x256xf32> to vector<256xf32>
    %88 = vector.shape_cast %87 : vector<256xf32> to vector<1x256xf32>
    %cst_21 = arith.constant 1.250000e-01 : f32
    %89 = vector.broadcast %cst_21 : f32 to vector<1x256xf32>
    %90 = arith.mulf %85, %89 : vector<1x256xf32>
    %cst_22 = arith.constant 1.250000e-01 : f32
    %91 = vector.broadcast %cst_22 : f32 to vector<1x256xf32>
    %92 = arith.mulf %88, %91 : vector<1x256xf32>
    %93 = arith.mulf %90, %90 : vector<1x256xf32>
    %94 = arith.subf %92, %93 : vector<1x256xf32>
    %cst_23 = arith.constant 0.000000e+00 : f32
    %95 = vector.broadcast %cst_23 : f32 to vector<1x256xf32>
    %96 = arith.maximumf %94, %95 : vector<1x256xf32>
    %c2 = arith.constant 2 : index
    %c0_24 = arith.constant 0 : index
    %97 = vector.load %arg4[%c2, %c0_24] : memref<19x256xf32, #tpu.memory_space<vmem>>, vector<1x256xf32>
    %c3 = arith.constant 3 : index
    %c0_25 = arith.constant 0 : index
    %98 = vector.load %arg4[%c3, %c0_25] : memref<19x256xf32, #tpu.memory_space<vmem>>, vector<1x256xf32>
    %cst_26 = arith.constant 9.99999974E-6 : f32
    %99 = vector.broadcast %cst_26 : f32 to vector<1x256xf32>
    %100 = arith.addf %96, %99 : vector<1x256xf32>
    %101 = math.rsqrt %100 : vector<1x256xf32>
    %102 = arith.mulf %97, %101 : vector<1x256xf32>
    %103 = arith.mulf %90, %102 : vector<1x256xf32>
    %104 = arith.subf %98, %103 : vector<1x256xf32>
    %105 = vector.broadcast %102 : vector<1x256xf32> to vector<8x256xf32>
    %106 = arith.mulf %83, %105 : vector<8x256xf32>
    %107 = vector.broadcast %104 : vector<1x256xf32> to vector<8x256xf32>
    %108 = arith.addf %106, %107 : vector<8x256xf32>
    %cst_27 = arith.constant 0.000000e+00 : f32
    %109 = vector.broadcast %cst_27 : f32 to vector<8x256xf32>
    %110 = arith.maximumf %108, %109 : vector<8x256xf32>
    %111 = arith.truncf %110 : vector<8x256xf32> to vector<8x256xbf16>
    %c1_28 = arith.constant 1 : index
    %c0_29 = arith.constant 0 : index
    %c0_30 = arith.constant 0 : index
    %112 = vector.load %arg2[%c1_28, %c0_29, %c0_30] : memref<8x256x256xbf16, #tpu.memory_space<vmem>>, vector<1x256x256xbf16>
    %113 = vector.shape_cast %112 : vector<1x256x256xbf16> to vector<256x256xbf16>
    %cst_31 = arith.constant dense<0.000000e+00> : vector<8x256xf32>
    %114 = tpu.matmul %111, %113, %cst_31 {dimension_numbers = #tpu.dot_dimension_numbers<[1], [0], [0], [1], [0, 0, 1, 1], [], []>} : vector<8x256xbf16>, vector<256x256xbf16>, vector<8x256xf32> -> vector<8x256xf32>
    %cst_32 = arith.constant dense<0.000000e+00> : vector<256xf32>
    %115 = vector.multi_reduction <add>, %114, %cst_32 [0] : vector<8x256xf32> to vector<256xf32>
    %116 = vector.shape_cast %115 : vector<256xf32> to vector<1x256xf32>
    %117 = arith.mulf %114, %114 : vector<8x256xf32>
    %cst_33 = arith.constant dense<0.000000e+00> : vector<256xf32>
    %118 = vector.multi_reduction <add>, %117, %cst_33 [0] : vector<8x256xf32> to vector<256xf32>
    %119 = vector.shape_cast %118 : vector<256xf32> to vector<1x256xf32>
    %cst_34 = arith.constant 1.250000e-01 : f32
    %120 = vector.broadcast %cst_34 : f32 to vector<1x256xf32>
    %121 = arith.mulf %116, %120 : vector<1x256xf32>
    %cst_35 = arith.constant 1.250000e-01 : f32
    %122 = vector.broadcast %cst_35 : f32 to vector<1x256xf32>
    %123 = arith.mulf %119, %122 : vector<1x256xf32>
    %124 = arith.mulf %121, %121 : vector<1x256xf32>
    %125 = arith.subf %123, %124 : vector<1x256xf32>
    %cst_36 = arith.constant 0.000000e+00 : f32
    %126 = vector.broadcast %cst_36 : f32 to vector<1x256xf32>
    %127 = arith.maximumf %125, %126 : vector<1x256xf32>
    %c4 = arith.constant 4 : index
    %c0_37 = arith.constant 0 : index
    %128 = vector.load %arg4[%c4, %c0_37] : memref<19x256xf32, #tpu.memory_space<vmem>>, vector<1x256xf32>
    %c5 = arith.constant 5 : index
    %c0_38 = arith.constant 0 : index
    %129 = vector.load %arg4[%c5, %c0_38] : memref<19x256xf32, #tpu.memory_space<vmem>>, vector<1x256xf32>
    %cst_39 = arith.constant 9.99999974E-6 : f32
    %130 = vector.broadcast %cst_39 : f32 to vector<1x256xf32>
    %131 = arith.addf %127, %130 : vector<1x256xf32>
    %132 = math.rsqrt %131 : vector<1x256xf32>
    %133 = arith.mulf %128, %132 : vector<1x256xf32>
    %134 = arith.mulf %121, %133 : vector<1x256xf32>
    %135 = arith.subf %129, %134 : vector<1x256xf32>
    %136 = vector.broadcast %133 : vector<1x256xf32> to vector<8x256xf32>
    %137 = arith.mulf %114, %136 : vector<8x256xf32>
    %138 = vector.broadcast %135 : vector<1x256xf32> to vector<8x256xf32>
    %139 = arith.addf %137, %138 : vector<8x256xf32>
    %cst_40 = arith.constant 0.000000e+00 : f32
    %140 = vector.broadcast %cst_40 : f32 to vector<8x256xf32>
    %141 = arith.maximumf %139, %140 : vector<8x256xf32>
    %142 = arith.truncf %141 : vector<8x256xf32> to vector<8x256xbf16>
    %c2_41 = arith.constant 2 : index
    %c0_42 = arith.constant 0 : index
    %c0_43 = arith.constant 0 : index
    %143 = vector.load %arg2[%c2_41, %c0_42, %c0_43] : memref<8x256x256xbf16, #tpu.memory_space<vmem>>, vector<1x256x256xbf16>
    %144 = vector.shape_cast %143 : vector<1x256x256xbf16> to vector<256x256xbf16>
    %cst_44 = arith.constant dense<0.000000e+00> : vector<8x256xf32>
    %145 = tpu.matmul %142, %144, %cst_44 {dimension_numbers = #tpu.dot_dimension_numbers<[1], [0], [0], [1], [0, 0, 1, 1], [], []>} : vector<8x256xbf16>, vector<256x256xbf16>, vector<8x256xf32> -> vector<8x256xf32>
    %cst_45 = arith.constant dense<0.000000e+00> : vector<256xf32>
    %146 = vector.multi_reduction <add>, %145, %cst_45 [0] : vector<8x256xf32> to vector<256xf32>
    %147 = vector.shape_cast %146 : vector<256xf32> to vector<1x256xf32>
    %148 = arith.mulf %145, %145 : vector<8x256xf32>
    %cst_46 = arith.constant dense<0.000000e+00> : vector<256xf32>
    %149 = vector.multi_reduction <add>, %148, %cst_46 [0] : vector<8x256xf32> to vector<256xf32>
    %150 = vector.shape_cast %149 : vector<256xf32> to vector<1x256xf32>
    %cst_47 = arith.constant 1.250000e-01 : f32
    %151 = vector.broadcast %cst_47 : f32 to vector<1x256xf32>
    %152 = arith.mulf %147, %151 : vector<1x256xf32>
    %cst_48 = arith.constant 1.250000e-01 : f32
    %153 = vector.broadcast %cst_48 : f32 to vector<1x256xf32>
    %154 = arith.mulf %150, %153 : vector<1x256xf32>
    %155 = arith.mulf %152, %152 : vector<1x256xf32>
    %156 = arith.subf %154, %155 : vector<1x256xf32>
    %cst_49 = arith.constant 0.000000e+00 : f32
    %157 = vector.broadcast %cst_49 : f32 to vector<1x256xf32>
    %158 = arith.maximumf %156, %157 : vector<1x256xf32>
    %c6 = arith.constant 6 : index
    %c0_50 = arith.constant 0 : index
    %159 = vector.load %arg4[%c6, %c0_50] : memref<19x256xf32, #tpu.memory_space<vmem>>, vector<1x256xf32>
    %c7 = arith.constant 7 : index
    %c0_51 = arith.constant 0 : index
    %160 = vector.load %arg4[%c7, %c0_51] : memref<19x256xf32, #tpu.memory_space<vmem>>, vector<1x256xf32>
    %cst_52 = arith.constant 9.99999974E-6 : f32
    %161 = vector.broadcast %cst_52 : f32 to vector<1x256xf32>
    %162 = arith.addf %158, %161 : vector<1x256xf32>
    %163 = math.rsqrt %162 : vector<1x256xf32>
    %164 = arith.mulf %159, %163 : vector<1x256xf32>
    %165 = arith.mulf %152, %164 : vector<1x256xf32>
    %166 = arith.subf %160, %165 : vector<1x256xf32>
    %167 = vector.broadcast %164 : vector<1x256xf32> to vector<8x256xf32>
    %168 = arith.mulf %145, %167 : vector<8x256xf32>
    %169 = vector.broadcast %166 : vector<1x256xf32> to vector<8x256xf32>
    %170 = arith.addf %168, %169 : vector<8x256xf32>
    %cst_53 = arith.constant 0.000000e+00 : f32
    %171 = vector.broadcast %cst_53 : f32 to vector<8x256xf32>
    %172 = arith.maximumf %170, %171 : vector<8x256xf32>
    %173 = arith.truncf %172 : vector<8x256xf32> to vector<8x256xbf16>
    %c3_54 = arith.constant 3 : index
    %c0_55 = arith.constant 0 : index
    %c0_56 = arith.constant 0 : index
    %174 = vector.load %arg2[%c3_54, %c0_55, %c0_56] : memref<8x256x256xbf16, #tpu.memory_space<vmem>>, vector<1x256x256xbf16>
    %175 = vector.shape_cast %174 : vector<1x256x256xbf16> to vector<256x256xbf16>
    %cst_57 = arith.constant dense<0.000000e+00> : vector<8x256xf32>
    %176 = tpu.matmul %173, %175, %cst_57 {dimension_numbers = #tpu.dot_dimension_numbers<[1], [0], [0], [1], [0, 0, 1, 1], [], []>} : vector<8x256xbf16>, vector<256x256xbf16>, vector<8x256xf32> -> vector<8x256xf32>
    %cst_58 = arith.constant dense<0.000000e+00> : vector<256xf32>
    %177 = vector.multi_reduction <add>, %176, %cst_58 [0] : vector<8x256xf32> to vector<256xf32>
    %178 = vector.shape_cast %177 : vector<256xf32> to vector<1x256xf32>
    %179 = arith.mulf %176, %176 : vector<8x256xf32>
    %cst_59 = arith.constant dense<0.000000e+00> : vector<256xf32>
    %180 = vector.multi_reduction <add>, %179, %cst_59 [0] : vector<8x256xf32> to vector<256xf32>
    %181 = vector.shape_cast %180 : vector<256xf32> to vector<1x256xf32>
    %cst_60 = arith.constant 1.250000e-01 : f32
    %182 = vector.broadcast %cst_60 : f32 to vector<1x256xf32>
    %183 = arith.mulf %178, %182 : vector<1x256xf32>
    %cst_61 = arith.constant 1.250000e-01 : f32
    %184 = vector.broadcast %cst_61 : f32 to vector<1x256xf32>
    %185 = arith.mulf %181, %184 : vector<1x256xf32>
    %186 = arith.mulf %183, %183 : vector<1x256xf32>
    %187 = arith.subf %185, %186 : vector<1x256xf32>
    %cst_62 = arith.constant 0.000000e+00 : f32
    %188 = vector.broadcast %cst_62 : f32 to vector<1x256xf32>
    %189 = arith.maximumf %187, %188 : vector<1x256xf32>
    %c8 = arith.constant 8 : index
    %c0_63 = arith.constant 0 : index
    %190 = vector.load %arg4[%c8, %c0_63] : memref<19x256xf32, #tpu.memory_space<vmem>>, vector<1x256xf32>
    %c9 = arith.constant 9 : index
    %c0_64 = arith.constant 0 : index
    %191 = vector.load %arg4[%c9, %c0_64] : memref<19x256xf32, #tpu.memory_space<vmem>>, vector<1x256xf32>
    %cst_65 = arith.constant 9.99999974E-6 : f32
    %192 = vector.broadcast %cst_65 : f32 to vector<1x256xf32>
    %193 = arith.addf %189, %192 : vector<1x256xf32>
    %194 = math.rsqrt %193 : vector<1x256xf32>
    %195 = arith.mulf %190, %194 : vector<1x256xf32>
    %196 = arith.mulf %183, %195 : vector<1x256xf32>
    %197 = arith.subf %191, %196 : vector<1x256xf32>
    %198 = vector.broadcast %195 : vector<1x256xf32> to vector<8x256xf32>
    %199 = arith.mulf %176, %198 : vector<8x256xf32>
    %200 = vector.broadcast %197 : vector<1x256xf32> to vector<8x256xf32>
    %201 = arith.addf %199, %200 : vector<8x256xf32>
    %cst_66 = arith.constant 0.000000e+00 : f32
    %202 = vector.broadcast %cst_66 : f32 to vector<8x256xf32>
    %203 = arith.maximumf %201, %202 : vector<8x256xf32>
    %204 = arith.truncf %203 : vector<8x256xf32> to vector<8x256xbf16>
    %c4_67 = arith.constant 4 : index
    %c0_68 = arith.constant 0 : index
    %c0_69 = arith.constant 0 : index
    %205 = vector.load %arg2[%c4_67, %c0_68, %c0_69] : memref<8x256x256xbf16, #tpu.memory_space<vmem>>, vector<1x256x256xbf16>
    %206 = vector.shape_cast %205 : vector<1x256x256xbf16> to vector<256x256xbf16>
    %cst_70 = arith.constant dense<0.000000e+00> : vector<8x256xf32>
    %207 = tpu.matmul %204, %206, %cst_70 {dimension_numbers = #tpu.dot_dimension_numbers<[1], [0], [0], [1], [0, 0, 1, 1], [], []>} : vector<8x256xbf16>, vector<256x256xbf16>, vector<8x256xf32> -> vector<8x256xf32>
    %cst_71 = arith.constant dense<0.000000e+00> : vector<256xf32>
    %208 = vector.multi_reduction <add>, %207, %cst_71 [0] : vector<8x256xf32> to vector<256xf32>
    %209 = vector.shape_cast %208 : vector<256xf32> to vector<1x256xf32>
    %210 = arith.mulf %207, %207 : vector<8x256xf32>
    %cst_72 = arith.constant dense<0.000000e+00> : vector<256xf32>
    %211 = vector.multi_reduction <add>, %210, %cst_72 [0] : vector<8x256xf32> to vector<256xf32>
    %212 = vector.shape_cast %211 : vector<256xf32> to vector<1x256xf32>
    %cst_73 = arith.constant 1.250000e-01 : f32
    %213 = vector.broadcast %cst_73 : f32 to vector<1x256xf32>
    %214 = arith.mulf %209, %213 : vector<1x256xf32>
    %cst_74 = arith.constant 1.250000e-01 : f32
    %215 = vector.broadcast %cst_74 : f32 to vector<1x256xf32>
    %216 = arith.mulf %212, %215 : vector<1x256xf32>
    %217 = arith.mulf %214, %214 : vector<1x256xf32>
    %218 = arith.subf %216, %217 : vector<1x256xf32>
    %cst_75 = arith.constant 0.000000e+00 : f32
    %219 = vector.broadcast %cst_75 : f32 to vector<1x256xf32>
    %220 = arith.maximumf %218, %219 : vector<1x256xf32>
    %c10 = arith.constant 10 : index
    %c0_76 = arith.constant 0 : index
    %221 = vector.load %arg4[%c10, %c0_76] : memref<19x256xf32, #tpu.memory_space<vmem>>, vector<1x256xf32>
    %c11 = arith.constant 11 : index
    %c0_77 = arith.constant 0 : index
    %222 = vector.load %arg4[%c11, %c0_77] : memref<19x256xf32, #tpu.memory_space<vmem>>, vector<1x256xf32>
    %cst_78 = arith.constant 9.99999974E-6 : f32
    %223 = vector.broadcast %cst_78 : f32 to vector<1x256xf32>
    %224 = arith.addf %220, %223 : vector<1x256xf32>
    %225 = math.rsqrt %224 : vector<1x256xf32>
    %226 = arith.mulf %221, %225 : vector<1x256xf32>
    %227 = arith.mulf %214, %226 : vector<1x256xf32>
    %228 = arith.subf %222, %227 : vector<1x256xf32>
    %229 = vector.broadcast %226 : vector<1x256xf32> to vector<8x256xf32>
    %230 = arith.mulf %207, %229 : vector<8x256xf32>
    %231 = vector.broadcast %228 : vector<1x256xf32> to vector<8x256xf32>
    %232 = arith.addf %230, %231 : vector<8x256xf32>
    %cst_79 = arith.constant 0.000000e+00 : f32
    %233 = vector.broadcast %cst_79 : f32 to vector<8x256xf32>
    %234 = arith.maximumf %232, %233 : vector<8x256xf32>
    %235 = arith.truncf %234 : vector<8x256xf32> to vector<8x256xbf16>
    %c5_80 = arith.constant 5 : index
    %c0_81 = arith.constant 0 : index
    %c0_82 = arith.constant 0 : index
    %236 = vector.load %arg2[%c5_80, %c0_81, %c0_82] : memref<8x256x256xbf16, #tpu.memory_space<vmem>>, vector<1x256x256xbf16>
    %237 = vector.shape_cast %236 : vector<1x256x256xbf16> to vector<256x256xbf16>
    %cst_83 = arith.constant dense<0.000000e+00> : vector<8x256xf32>
    %238 = tpu.matmul %235, %237, %cst_83 {dimension_numbers = #tpu.dot_dimension_numbers<[1], [0], [0], [1], [0, 0, 1, 1], [], []>} : vector<8x256xbf16>, vector<256x256xbf16>, vector<8x256xf32> -> vector<8x256xf32>
    %cst_84 = arith.constant dense<0.000000e+00> : vector<256xf32>
    %239 = vector.multi_reduction <add>, %238, %cst_84 [0] : vector<8x256xf32> to vector<256xf32>
    %240 = vector.shape_cast %239 : vector<256xf32> to vector<1x256xf32>
    %241 = arith.mulf %238, %238 : vector<8x256xf32>
    %cst_85 = arith.constant dense<0.000000e+00> : vector<256xf32>
    %242 = vector.multi_reduction <add>, %241, %cst_85 [0] : vector<8x256xf32> to vector<256xf32>
    %243 = vector.shape_cast %242 : vector<256xf32> to vector<1x256xf32>
    %cst_86 = arith.constant 1.250000e-01 : f32
    %244 = vector.broadcast %cst_86 : f32 to vector<1x256xf32>
    %245 = arith.mulf %240, %244 : vector<1x256xf32>
    %cst_87 = arith.constant 1.250000e-01 : f32
    %246 = vector.broadcast %cst_87 : f32 to vector<1x256xf32>
    %247 = arith.mulf %243, %246 : vector<1x256xf32>
    %248 = arith.mulf %245, %245 : vector<1x256xf32>
    %249 = arith.subf %247, %248 : vector<1x256xf32>
    %cst_88 = arith.constant 0.000000e+00 : f32
    %250 = vector.broadcast %cst_88 : f32 to vector<1x256xf32>
    %251 = arith.maximumf %249, %250 : vector<1x256xf32>
    %c12 = arith.constant 12 : index
    %c0_89 = arith.constant 0 : index
    %252 = vector.load %arg4[%c12, %c0_89] : memref<19x256xf32, #tpu.memory_space<vmem>>, vector<1x256xf32>
    %c13 = arith.constant 13 : index
    %c0_90 = arith.constant 0 : index
    %253 = vector.load %arg4[%c13, %c0_90] : memref<19x256xf32, #tpu.memory_space<vmem>>, vector<1x256xf32>
    %cst_91 = arith.constant 9.99999974E-6 : f32
    %254 = vector.broadcast %cst_91 : f32 to vector<1x256xf32>
    %255 = arith.addf %251, %254 : vector<1x256xf32>
    %256 = math.rsqrt %255 : vector<1x256xf32>
    %257 = arith.mulf %252, %256 : vector<1x256xf32>
    %258 = arith.mulf %245, %257 : vector<1x256xf32>
    %259 = arith.subf %253, %258 : vector<1x256xf32>
    %260 = vector.broadcast %257 : vector<1x256xf32> to vector<8x256xf32>
    %261 = arith.mulf %238, %260 : vector<8x256xf32>
    %262 = vector.broadcast %259 : vector<1x256xf32> to vector<8x256xf32>
    %263 = arith.addf %261, %262 : vector<8x256xf32>
    %cst_92 = arith.constant 0.000000e+00 : f32
    %264 = vector.broadcast %cst_92 : f32 to vector<8x256xf32>
    %265 = arith.maximumf %263, %264 : vector<8x256xf32>
    %266 = arith.truncf %265 : vector<8x256xf32> to vector<8x256xbf16>
    %c6_93 = arith.constant 6 : index
    %c0_94 = arith.constant 0 : index
    %c0_95 = arith.constant 0 : index
    %267 = vector.load %arg2[%c6_93, %c0_94, %c0_95] : memref<8x256x256xbf16, #tpu.memory_space<vmem>>, vector<1x256x256xbf16>
    %268 = vector.shape_cast %267 : vector<1x256x256xbf16> to vector<256x256xbf16>
    %cst_96 = arith.constant dense<0.000000e+00> : vector<8x256xf32>
    %269 = tpu.matmul %266, %268, %cst_96 {dimension_numbers = #tpu.dot_dimension_numbers<[1], [0], [0], [1], [0, 0, 1, 1], [], []>} : vector<8x256xbf16>, vector<256x256xbf16>, vector<8x256xf32> -> vector<8x256xf32>
    %cst_97 = arith.constant dense<0.000000e+00> : vector<256xf32>
    %270 = vector.multi_reduction <add>, %269, %cst_97 [0] : vector<8x256xf32> to vector<256xf32>
    %271 = vector.shape_cast %270 : vector<256xf32> to vector<1x256xf32>
    %272 = arith.mulf %269, %269 : vector<8x256xf32>
    %cst_98 = arith.constant dense<0.000000e+00> : vector<256xf32>
    %273 = vector.multi_reduction <add>, %272, %cst_98 [0] : vector<8x256xf32> to vector<256xf32>
    %274 = vector.shape_cast %273 : vector<256xf32> to vector<1x256xf32>
    %cst_99 = arith.constant 1.250000e-01 : f32
    %275 = vector.broadcast %cst_99 : f32 to vector<1x256xf32>
    %276 = arith.mulf %271, %275 : vector<1x256xf32>
    %cst_100 = arith.constant 1.250000e-01 : f32
    %277 = vector.broadcast %cst_100 : f32 to vector<1x256xf32>
    %278 = arith.mulf %274, %277 : vector<1x256xf32>
    %279 = arith.mulf %276, %276 : vector<1x256xf32>
    %280 = arith.subf %278, %279 : vector<1x256xf32>
    %cst_101 = arith.constant 0.000000e+00 : f32
    %281 = vector.broadcast %cst_101 : f32 to vector<1x256xf32>
    %282 = arith.maximumf %280, %281 : vector<1x256xf32>
    %c14 = arith.constant 14 : index
    %c0_102 = arith.constant 0 : index
    %283 = vector.load %arg4[%c14, %c0_102] : memref<19x256xf32, #tpu.memory_space<vmem>>, vector<1x256xf32>
    %c15 = arith.constant 15 : index
    %c0_103 = arith.constant 0 : index
    %284 = vector.load %arg4[%c15, %c0_103] : memref<19x256xf32, #tpu.memory_space<vmem>>, vector<1x256xf32>
    %cst_104 = arith.constant 9.99999974E-6 : f32
    %285 = vector.broadcast %cst_104 : f32 to vector<1x256xf32>
    %286 = arith.addf %282, %285 : vector<1x256xf32>
    %287 = math.rsqrt %286 : vector<1x256xf32>
    %288 = arith.mulf %283, %287 : vector<1x256xf32>
    %289 = arith.mulf %276, %288 : vector<1x256xf32>
    %290 = arith.subf %284, %289 : vector<1x256xf32>
    %291 = vector.broadcast %288 : vector<1x256xf32> to vector<8x256xf32>
    %292 = arith.mulf %269, %291 : vector<8x256xf32>
    %293 = vector.broadcast %290 : vector<1x256xf32> to vector<8x256xf32>
    %294 = arith.addf %292, %293 : vector<8x256xf32>
    %cst_105 = arith.constant 0.000000e+00 : f32
    %295 = vector.broadcast %cst_105 : f32 to vector<8x256xf32>
    %296 = arith.maximumf %294, %295 : vector<8x256xf32>
    %297 = arith.truncf %296 : vector<8x256xf32> to vector<8x256xbf16>
    %c7_106 = arith.constant 7 : index
    %c0_107 = arith.constant 0 : index
    %c0_108 = arith.constant 0 : index
    %298 = vector.load %arg2[%c7_106, %c0_107, %c0_108] : memref<8x256x256xbf16, #tpu.memory_space<vmem>>, vector<1x256x256xbf16>
    %299 = vector.shape_cast %298 : vector<1x256x256xbf16> to vector<256x256xbf16>
    %cst_109 = arith.constant dense<0.000000e+00> : vector<8x256xf32>
    %300 = tpu.matmul %297, %299, %cst_109 {dimension_numbers = #tpu.dot_dimension_numbers<[1], [0], [0], [1], [0, 0, 1, 1], [], []>} : vector<8x256xbf16>, vector<256x256xbf16>, vector<8x256xf32> -> vector<8x256xf32>
    %cst_110 = arith.constant dense<0.000000e+00> : vector<256xf32>
    %301 = vector.multi_reduction <add>, %300, %cst_110 [0] : vector<8x256xf32> to vector<256xf32>
    %302 = vector.shape_cast %301 : vector<256xf32> to vector<1x256xf32>
    %303 = arith.mulf %300, %300 : vector<8x256xf32>
    %cst_111 = arith.constant dense<0.000000e+00> : vector<256xf32>
    %304 = vector.multi_reduction <add>, %303, %cst_111 [0] : vector<8x256xf32> to vector<256xf32>
    %305 = vector.shape_cast %304 : vector<256xf32> to vector<1x256xf32>
    %cst_112 = arith.constant 1.250000e-01 : f32
    %306 = vector.broadcast %cst_112 : f32 to vector<1x256xf32>
    %307 = arith.mulf %302, %306 : vector<1x256xf32>
    %cst_113 = arith.constant 1.250000e-01 : f32
    %308 = vector.broadcast %cst_113 : f32 to vector<1x256xf32>
    %309 = arith.mulf %305, %308 : vector<1x256xf32>
    %310 = arith.mulf %307, %307 : vector<1x256xf32>
    %311 = arith.subf %309, %310 : vector<1x256xf32>
    %cst_114 = arith.constant 0.000000e+00 : f32
    %312 = vector.broadcast %cst_114 : f32 to vector<1x256xf32>
    %313 = arith.maximumf %311, %312 : vector<1x256xf32>
    %c16 = arith.constant 16 : index
    %c0_115 = arith.constant 0 : index
    %314 = vector.load %arg4[%c16, %c0_115] : memref<19x256xf32, #tpu.memory_space<vmem>>, vector<1x256xf32>
    %c17 = arith.constant 17 : index
    %c0_116 = arith.constant 0 : index
    %315 = vector.load %arg4[%c17, %c0_116] : memref<19x256xf32, #tpu.memory_space<vmem>>, vector<1x256xf32>
    %cst_117 = arith.constant 9.99999974E-6 : f32
    %316 = vector.broadcast %cst_117 : f32 to vector<1x256xf32>
    %317 = arith.addf %313, %316 : vector<1x256xf32>
    %318 = math.rsqrt %317 : vector<1x256xf32>
    %319 = arith.mulf %314, %318 : vector<1x256xf32>
    %320 = arith.mulf %307, %319 : vector<1x256xf32>
    %321 = arith.subf %315, %320 : vector<1x256xf32>
    %322 = vector.broadcast %319 : vector<1x256xf32> to vector<8x256xf32>
    %323 = arith.mulf %300, %322 : vector<8x256xf32>
    %324 = vector.broadcast %321 : vector<1x256xf32> to vector<8x256xf32>
    %325 = arith.addf %323, %324 : vector<8x256xf32>
    %cst_118 = arith.constant 0.000000e+00 : f32
    %326 = vector.broadcast %cst_118 : f32 to vector<8x256xf32>
    %327 = arith.maximumf %325, %326 : vector<8x256xf32>
    %328 = arith.truncf %327 : vector<8x256xf32> to vector<8x256xbf16>
    %c0_119 = arith.constant 0 : index
    %c0_120 = arith.constant 0 : index
    %329 = vector.load %arg3[%c0_119, %c0_120] : memref<256x128xbf16, #tpu.memory_space<vmem>>, vector<256x128xbf16>
    %cst_121 = arith.constant dense<0.000000e+00> : vector<8x128xf32>
    %330 = tpu.matmul %328, %329, %cst_121 {dimension_numbers = #tpu.dot_dimension_numbers<[1], [0], [0], [1], [0, 0, 1, 1], [], []>} : vector<8x256xbf16>, vector<256x128xbf16>, vector<8x128xf32> -> vector<8x128xf32>
    %c18 = arith.constant 18 : index
    %c0_122 = arith.constant 0 : index
    %331 = vector.load %arg4[%c18, %c0_122] : memref<19x256xf32, #tpu.memory_space<vmem>>, vector<1x256xf32>
    %332 = vector.extract_strided_slice %331 {offsets = [0, 0], sizes = [1, 128], strides = [1, 1]} : vector<1x256xf32> to vector<1x128xf32>
    %333 = vector.broadcast %332 : vector<1x128xf32> to vector<8x128xf32>
    %334 = arith.addf %330, %333 : vector<8x128xf32>
    %c0_123 = arith.constant 0 : index
    %c0_124 = arith.constant 0 : index
    %335 = vector.load %arg5[%c0_123, %c0_124] : memref<8x128xf32, #tpu.memory_space<vmem>>, vector<8x128xf32>
    tpu.vector_store %arg5[%c0_123, %c0_124], %334 {strides = array<i32>} : memref<8x128xf32, #tpu.memory_space<vmem>>, vector<8x128xf32>,
    return
  }
}

</mosaic_0001>

<bundles_post_ra>
// kernel: textmlp_forward.1
= control target key start
LH: loop header
LB: loop body
LE: loop exit
PB: predicated region body
PF: predicated region fallthrough
CT: control target
= control target key end

     0   :  { %10 = vsyncpa [#allocation3], 0  ;;  %s6097_s0 = inlined_call_operand.hbm [shape: s32[8,8], index: 0, kind: input, shape index: {}]   ;;  %s6098_s1 = inlined_call_operand.hbm [shape: bf16[512,256], index: 1, kind: input, shape index: {}]   ;;  %s6099_s2 = inlined_call_operand.hbm [shape: bf16[8,256,256], index: 2, kind: input, shape index: {}]   ;;  %s6100_s3 = inlined_call_operand.hbm [shape: bf16[256,128], index: 3, kind: input, shape index: {}]   ;;  %s6101_s4 = inlined_call_operand.hbm [shape: f32[19,256], index: 4, kind: input, shape index: {}]   ;;  %s6102_s5 = inlined_call_operand.vmem [shape: f32[8,128], index: 5, kind: output, shape index: {}]  }
   0x1   :  { %11 = vsyncpa [#allocation5], 0  ;;  %s28_s20 = sshll.u32 %s6098_s1, 4  ;;  %s29_s20 = int_to_ptr.hbm [resolvable:$true] %s28_s20 }
   0x2   :  { %12 = vsyncpa [#allocation8], 0  ;;  %s5532_s21 = smov [#allocation4]   ;;  %s54_s25 = sshll.u32 %s6100_s3, 4  ;;  %s55_s25 = int_to_ptr.hbm [resolvable:$true] %s54_s25 }
   0x3   :  { %s30_s22 = sshll.u32 %s5532_s21, 4  ;;  %s5533_s26 = smov 128   ;;  %s31_s22 = int_to_ptr.vmem [resolvable:$true] %s30_s22 }
   0x4   :  { %s5534_s27 = smov 8   ;;  %s5535_s28 = smov [#allocation7]  }
   0x5   :  { %36 = dma.hbm_to_vmem [thread:$0]  %s29_s20, 8192, %s31_s22, [#allocation5], %s5533_s26, %s5533_s26, %s5534_s27  }
   0x6   :  { %s56_s29 = sshll.u32 %s5535_s28, 4  ;;  %s5536_s30 = smov 64   ;;  %s57_s29 = int_to_ptr.vmem [resolvable:$true] %s56_s29 }
   0x7   :  { %s5537_s6 = smov 4   ;;  %s18_s8 = sshll.u32 %s6097_s0, 4  ;;  %s19_s8 = int_to_ptr.hbm [resolvable:$true] %s18_s8 }
   0x8   :  { %62 = dma.hbm_to_vmem [thread:$0]  %s55_s25, 2048, %s57_s29, [#allocation8], %s5536_s30, %s5536_s30, %s5537_s6  }
   0x9   :  { %s5538_s9 = smov [#allocation2]   ;;  %s41_s12 = sshll.u32 %s6099_s2, 4  ;;  %s42_s12 = int_to_ptr.hbm [resolvable:$true] %s41_s12 }
   0xa   :  { %s20_s10 = sshll.u32 %s5538_s9, 4  ;;  %s5539_s13 = smov [#allocation6]   ;;  %s21_s10 = int_to_ptr.vmem [resolvable:$true] %s20_s10 }
   0xb   :  { %23 = dma.hbm_to_vmem [thread:$0]  %s19_s8, 128, %s21_s10, [#allocation3]  }
   0xc   :  { %s43_s14 = sshll.u32 %s5539_s13, 4  ;;  %s67_s17 = sshll.u32 %s6101_s4, 4  ;;  %s44_s14 = int_to_ptr.vmem [resolvable:$true] %s43_s14  ;;  %s68_s17 = int_to_ptr.hbm [resolvable:$true] %s67_s17 }
   0xd   :  { %49 = dma.hbm_to_vmem [thread:$0]  %s42_s12, 32768, %s44_s14, [#allocation5], %s5533_s26, %s5533_s26, %s5534_s27  }
   0xe   :  { %s5540_s0 = smov [#allocation9]   ;;  %s5541_s19 = smov 256  }
   0xf   :  { %s69_s18 = sshll.u32 %s5540_s0, 4  ;;  %s5542_s20 = smov 16   ;;  %s70_s18 = int_to_ptr.vmem [resolvable:$true] %s69_s18 }
  0x10   :  { %75 = dma.hbm_to_vmem [thread:$0]  %s68_s17, 768, %s70_s18, [#allocation8], %s5541_s19, %s5541_s19, %s5542_s20  }
  0x11   :  { %5526 = dma.done.wait [#allocation3], 128  }
  0x12   :  { %5527 = vsyncadd [#allocation3], 4294967168 }
  0x13   :  { %5528 = dma.done.wait [#allocation5], 40960  }
  0x14   :  { %5529 = vsyncadd [#allocation5], 4294926336 }
  0x15   :  { %5530 = dma.done.wait [#allocation8], 2816  }
  0x16   :  { %5531 = vsyncadd [#allocation8], 4294964480  ;;  %v5543_v0 = vmov 0   ;;  %v5544_v1 = vmov 2   ;;  %v5545_v2 = vmov 4   ;;  %v5597_v3 = vld [vmem:[#allocation2] sm:$0xff] }
  0x17   :  { %5361 = vset.pattern.permute.xlu0 %v5543_v0  ;;  %5363 = vset.pattern.permute.xlu1 %v5544_v1  ;;  %v3719_v4 = vld [vmem:[#allocation4 + $0x70] sm:$0xf]  ;;  %v5020_v5 = vld [vmem:[#allocation4 + $0x74] sm:$0xf0]  ;;  %v121_v6 = vadd.s32 128, %v5597_v3  ;;  %v109_v8 = vadd.s32 64, %v5597_v3 }
  0x18   :  { %5365 = vset.pattern.permute.xlu2 %v5545_v2  ;;  %103 = vperm.xlu0 %5361, %v5597_v3   ;;  %v3783_v7 = vld [vmem:[#allocation4 + $0xf0] sm:$0xf]  ;;  %v133_v9 = vadd.s32 192, %v5597_v3  ;;  %v145_v10 = vadd.s32 256, %v5597_v3  ;;  %v3720_v11 = vor.u32 %v5020_v5, %v3719_v4  ;;  %v5036_v12 = vld [vmem:[#allocation4 + $0xf4] sm:$0xf0] }
  0x19   :  { %123 = vperm.xlu1 %5363, %v121_v6   ;;  %v3784_v13 = vor.u32 %v5036_v12, %v3783_v7  ;;  %v3847_v14 = vld [vmem:[#allocation4 + $0x170] sm:$0xf]  ;;  %v5052_v15 = vld [vmem:[#allocation4 + $0x174] sm:$0xf0]  ;;  %v3711_v19 = vld [vmem:[#allocation4 + $0x60] sm:$0xf] }
  0x1a   :  { %v3911_v16 = vld [vmem:[#allocation4 + $0x1f0] sm:$0xf]  ;;  %147 = vperm.xlu2 %5365, %v145_v10   ;;  %585 = vmatpush.bf16.msra.mxu0 %v3720_v11  ;;  %v3848_v17 = vor.u32 %v5052_v15, %v3847_v14  ;;  %v5068_v18 = vld [vmem:[#allocation4 + $0x1f4] sm:$0xf0]  ;;  %v5018_v20 = vld [vmem:[#allocation4 + $0x64] sm:$0xf0] }
  0x1b   :  { %598 = vmatpush.bf16.msra.mxu1 %v3784_v13  ;;  %v3912_v21 = vor.u32 %v5068_v18, %v3911_v16  ;;  %v3712_v22 = vor.u32 %v5018_v20, %v3711_v19  ;;  %v3775_v23 = vld [vmem:[#allocation4 + $0xe0] sm:$0xf]  ;;  %v5034_v24 = vld [vmem:[#allocation4 + $0xe4] sm:$0xf0]  ;;  %v3703_v32 = vld [vmem:[#allocation4 + $0x50] sm:$0xf] }
  0x1c   :  { %v3839_v25 = vld [vmem:[#allocation4 + $0x160] sm:$0xf]  ;;  %611 = vmatpush.bf16.msra.mxu2 %v3848_v17  ;;  %v3776_v26 = vor.u32 %v5034_v24, %v3775_v23  ;;  %v5050_v27 = vld [vmem:[#allocation4 + $0x164] sm:$0xf0]  ;;  %v5016_v33 = vld [vmem:[#allocation4 + $0x54] sm:$0xf0] }
  0x1d   :  { %v3903_v28 = vld [vmem:[#allocation4 + $0x1e0] sm:$0xf]  ;;  %v5066_v29 = vld [vmem:[#allocation4 + $0x1e4] sm:$0xf0]  ;;  %624 = vmatpush.bf16.msra.mxu3 %v3912_v21  ;;  %v3840_v30 = vor.u32 %v5050_v27, %v3839_v25  ;;  %v3767_v34 = vld [vmem:[#allocation4 + $0xd0] sm:$0xf]  ;;  %v3704_v40 = vor.u32 %v5016_v33, %v3703_v32 }
  0x1e   :  { %v3904_v31 = vor.u32 %v5066_v29, %v3903_v28  ;;  %586 = vmatpush.bf16.msra.mxu0 %v3712_v22  ;;  %v5032_v35 = vld [vmem:[#allocation4 + $0xd4] sm:$0xf0]  ;;  %v3831_v36 = vld [vmem:[#allocation4 + $0x150] sm:$0xf]  ;;  %v5546_v38 = vmov 1   ;;  %v157_v39 = vadd.s32 320, %v5597_v3 }
  0x1f   :  { %v5048_v37 = vld [vmem:[#allocation4 + $0x154] sm:$0xf0]  ;;  %599 = vmatpush.bf16.msra.mxu1 %v3776_v26  ;;  %v3895_v41 = vld [vmem:[#allocation4 + $0x1d0] sm:$0xf]  ;;  %v3768_v43 = vor.u32 %v5032_v35, %v3767_v34  ;;  %v3695_v45 = vld [vmem:[#allocation4 + $0x40] sm:$0xf] }
  0x20   :  { %5362 = vset.pattern.permute.xlu0 %v5546_v38  ;;  %v5064_v42 = vld [vmem:[#allocation4 + $0x1d4] sm:$0xf0]  ;;  %612 = vmatpush.bf16.msra.mxu2 %v3840_v30  ;;  %v3832_v44 = vor.u32 %v5048_v37, %v3831_v36  ;;  %v5014_v46 = vld [vmem:[#allocation4 + $0x44] sm:$0xf0]  ;;  %v3759_v47 = vld [vmem:[#allocation4 + $0xc0] sm:$0xf] }
  0x21   :  { %111 = vperm.xlu0 %5362, %v109_v8   ;;  %v5547_v48 = vmov 3   ;;  %625 = vmatpush.bf16.msra.mxu3 %v3904_v31  ;;  %v3896_v49 = vor.u32 %v5064_v42, %v3895_v41  ;;  %v5030_v50 = vld [vmem:[#allocation4 + $0xc4] sm:$0xf0]  ;;  %v3823_v51 = vld [vmem:[#allocation4 + $0x140] sm:$0xf]  ;;  %v5548_v53 = vmov 5   ;;  %v3696_v56 = vor.u32 %v5014_v46, %v3695_v45 }
  0x22   :  { %5364 = vset.pattern.permute.xlu1 %v5547_v48  ;;  %v5046_v52 = vld [vmem:[#allocation4 + $0x144] sm:$0xf0]  ;;  %5366 = vset.pattern.permute.xlu2 %v5548_v53  ;;  %v3887_v54 = vld [vmem:[#allocation4 + $0x1c0] sm:$0xf]  ;;  %v3760_v57 = vor.u32 %v5030_v50, %v3759_v47  ;;  %v3687_v60 = vld [vmem:[#allocation4 + $0x30] sm:$0xf] }
  0x23   :  { %135 = vperm.xlu1 %5364, %v133_v9   ;;  %v5062_v55 = vld [vmem:[#allocation4 + $0x1c4] sm:$0xf0]  ;;  %159 = vperm.xlu2 %5366, %v157_v39   ;;  %v3824_v58 = vor.u32 %v5046_v52, %v3823_v51  ;;  %v5012_v61 = vld [vmem:[#allocation4 + $0x34] sm:$0xf0]  ;;  %v3751_v62 = vld [vmem:[#allocation4 + $0xb0] sm:$0xf] }
  0x24   :  { %587 = vmatpush.bf16.msra.mxu0 %v3704_v40  ;;  %600 = vmatpush.bf16.msra.mxu1 %v3768_v43  ;;  %v3888_v59 = vor.u32 %v5062_v55, %v3887_v54  ;;  %v5028_v63 = vld [vmem:[#allocation4 + $0xb4] sm:$0xf0]  ;;  %v3815_v0 = vld [vmem:[#allocation4 + $0x130] sm:$0xf]  ;;  %v169_v2 = vadd.s32 384, %v5597_v3  ;;  %v181_v6 = vadd.s32 448, %v5597_v3  ;;  %v3688_v7 = vor.u32 %v5012_v61, %v3687_v60 }
  0x25   :  { %613 = vmatpush.bf16.msra.mxu2 %v3832_v44  ;;  %626 = vmatpush.bf16.msra.mxu3 %v3896_v49  ;;  %v5044_v1 = vld [vmem:[#allocation4 + $0x134] sm:$0xf0]  ;;  %v3879_v4 = vld [vmem:[#allocation4 + $0x1b0] sm:$0xf]  ;;  %v3752_v8 = vor.u32 %v5028_v63, %v3751_v62  ;;  %v5549_v10 = vmov 7   ;;  %v5550_v11 = vmov 6  }
  0x26   :  { %v5060_v5 = vld [vmem:[#allocation4 + $0x1b4] sm:$0xf0]  ;;  %v3816_v9 = vor.u32 %v5044_v1, %v3815_v0  ;;  %v3679_v13 = vld [vmem:[#allocation4 + $0x20] sm:$0xf]  ;;  %v5010_v3 = vld [vmem:[#allocation4 + $0x24] sm:$0xf0] }
  0x27   :  { %v3880_v12 = vor.u32 %v5060_v5, %v3879_v4  ;;  %v3743_v14 = vld [vmem:[#allocation4 + $0xa0] sm:$0xf]  ;;  %v3680_v15 = vor.u32 %v5010_v3, %v3679_v13  ;;  %v5026_v16 = vld [vmem:[#allocation4 + $0xa4] sm:$0xf0]  ;;  %v3671_v23 = vld [vmem:[#allocation4 + $0x10] sm:$0xf] }
  0x28   :  { %588 = vmatpush.bf16.msra.mxu0 %v3696_v56  ;;  %601 = vmatpush.bf16.msra.mxu1 %v3760_v57  ;;  %v3744_v17 = vor.u32 %v5026_v16, %v3743_v14  ;;  %v3807_v18 = vld [vmem:[#allocation4 + $0x120] sm:$0xf]  ;;  %v5042_v19 = vld [vmem:[#allocation4 + $0x124] sm:$0xf0]  ;;  %v5008_v24 = vld [vmem:[#allocation4 + $0x14] sm:$0xf0] }
  0x29   :  { %614 = vmatpush.bf16.msra.mxu2 %v3824_v58  ;;  %627 = vmatpush.bf16.msra.mxu3 %v3888_v59  ;;  %v3871_v20 = vld [vmem:[#allocation4 + $0x1a0] sm:$0xf]  ;;  %v3808_v21 = vor.u32 %v5042_v19, %v3807_v18  ;;  %v5058_v22 = vld [vmem:[#allocation4 + $0x1a4] sm:$0xf0]  ;;  %v3672_v26 = vor.u32 %v5008_v24, %v3671_v23  ;;  %v3735_v27 = vld [vmem:[#allocation4 + $0x90] sm:$0xf] }
  0x2a   :  { %5369 = vset.pattern.permute.xlu0 %v5549_v10  ;;  %v3872_v25 = vor.u32 %v5058_v22, %v3871_v20  ;;  %v5024_v28 = vld [vmem:[#allocation4 + $0x94] sm:$0xf0]  ;;  %v3799_v29 = vld [vmem:[#allocation4 + $0x110] sm:$0xf]  ;;  %v3663_v36 = vld [vmem:[#allocation4] sm:$0xf] }
  0x2b   :  { %5367 = vset.pattern.permute.xlu1 %v5550_v11  ;;  %5368 = vset.pattern.permute.xlu2 %v5549_v10  ;;  %v3736_v30 = vor.u32 %v5024_v28, %v3735_v27  ;;  %v5040_v31 = vld [vmem:[#allocation4 + $0x114] sm:$0xf0]  ;;  %v3863_v32 = vld [vmem:[#allocation4 + $0x190] sm:$0xf]  ;;  %v5006_v37 = vld [vmem:[#allocation4 + $0x4] sm:$0xf0] }
  0x2c   :  { %171 = vperm.xlu1 %5367, %v169_v2   ;;  %183 = vperm.xlu2 %5368, %v181_v6   ;;  %v5056_v33 = vld [vmem:[#allocation4 + $0x194] sm:$0xf0]  ;;  %v3800_v34 = vor.u32 %v5040_v31, %v3799_v29  ;;  %v3727_v38 = vld [vmem:[#allocation4 + $0x80] sm:$0xf]  ;;  %v3664_v39 = vor.u32 %v5006_v37, %v3663_v36  ;;  %v5022_v40 = vld [vmem:[#allocation4 + $0x84] sm:$0xf0] }
  0x2d   :  { %589 = vmatpush.bf16.msra.mxu0 %v3688_v7  ;;  %602 = vmatpush.bf16.msra.mxu1 %v3752_v8  ;;  %v3864_v35 = vor.u32 %v5056_v33, %v3863_v32  ;;  %v3791_v41 = vld [vmem:[#allocation4 + $0x100] sm:$0xf]  ;;  %v5038_v42 = vld [vmem:[#allocation4 + $0x104] sm:$0xf0]  ;;  %v3728_v43 = vor.u32 %v5022_v40, %v3727_v38  ;;  %v5019_v47 = vld [vmem:[#allocation4 + $0x74] sm:$0xf] }
  0x2e   :  { %615 = vmatpush.bf16.msra.mxu2 %v3816_v9  ;;  %628 = vmatpush.bf16.msra.mxu3 %v3880_v12  ;;  %v3792_v44 = vor.u32 %v5038_v42, %v3791_v41  ;;  %v3855_v45 = vld [vmem:[#allocation4 + $0x180] sm:$0xf]  ;;  %v5054_v46 = vld [vmem:[#allocation4 + $0x184] sm:$0xf0]  ;;  %v3721_v49 = vld [vmem:[#allocation4 + $0x78] sm:$0xf0] }
  0x2f   :  { %v3856_v48 = vor.u32 %v5054_v46, %v3855_v45  ;;  %v5035_v50 = vld [vmem:[#allocation4 + $0xf4] sm:$0xf]  ;;  %v3785_v51 = vld [vmem:[#allocation4 + $0xf8] sm:$0xf0]  ;;  %v3724_v52 = vor.u32 %v5019_v47, %v3721_v49  ;;  %v5017_v59 = vld [vmem:[#allocation4 + $0x64] sm:$0xf] }
  0x30   :  { %v3788_v53 = vor.u32 %v5035_v50, %v3785_v51  ;;  %v5051_v54 = vld [vmem:[#allocation4 + $0x174] sm:$0xf]  ;;  %v3849_v55 = vld [vmem:[#allocation4 + $0x178] sm:$0xf0]  ;;  %v3713_v60 = vld [vmem:[#allocation4 + $0x68] sm:$0xf0] }
  0x31   :  { %590 = vmatpush.bf16.msra.mxu0 %v3680_v15  ;;  %603 = vmatpush.bf16.msra.mxu1 %v3744_v17  ;;  %v5067_v56 = vld [vmem:[#allocation4 + $0x1f4] sm:$0xf]  ;;  %v3852_v57 = vor.u32 %v5051_v54, %v3849_v55  ;;  %v3913_v58 = vld [vmem:[#allocation4 + $0x1f8] sm:$0xf0]  ;;  %v3716_v62 = vor.u32 %v5017_v59, %v3713_v60  ;;  %v5033_v63 = vld [vmem:[#allocation4 + $0xe4] sm:$0xf] }
  0x32   :  { %616 = vmatpush.bf16.msra.mxu2 %v3808_v21  ;;  %629 = vmatpush.bf16.msra.mxu3 %v3872_v25  ;;  %v3916_v61 = vor.u32 %v5067_v56, %v3913_v58  ;;  %v3777_v0 = vld [vmem:[#allocation4 + $0xe8] sm:$0xf0]  ;;  %v5049_v1 = vld [vmem:[#allocation4 + $0x164] sm:$0xf]  ;;  %v5015_v9 = vld [vmem:[#allocation4 + $0x54] sm:$0xf] }
  0x33   :  { %v3780_v2 = vor.u32 %v5033_v63, %v3777_v0  ;;  %v3841_v4 = vld [vmem:[#allocation4 + $0x168] sm:$0xf0]  ;;  %v5065_v5 = vld [vmem:[#allocation4 + $0x1e4] sm:$0xf]  ;;  %v3705_v10 = vld [vmem:[#allocation4 + $0x58] sm:$0xf0] }
  0x34   :  { %v3905_v6 = vld [vmem:[#allocation4 + $0x1e8] sm:$0xf0]  ;;  %v3844_v7 = vor.u32 %v5049_v1, %v3841_v4  ;;  %v5031_v11 = vld [vmem:[#allocation4 + $0xd4] sm:$0xf]  ;;  %v3769_v12 = vld [vmem:[#allocation4 + $0xd8] sm:$0xf0]  ;;  %v3708_v14 = vor.u32 %v5015_v9, %v3705_v10 }
  0x35   :  { %591 = vmatpush.bf16.msra.mxu0 %v3672_v26  ;;  %604 = vmatpush.bf16.msra.mxu1 %v3736_v30  ;;  %v3908_v8 = vor.u32 %v5065_v5, %v3905_v6  ;;  %v5047_v13 = vld [vmem:[#allocation4 + $0x154] sm:$0xf]  ;;  %v3833_v3 = vld [vmem:[#allocation4 + $0x158] sm:$0xf0]  ;;  %v3772_v15 = vor.u32 %v5031_v11, %v3769_v12  ;;  %v5013_v18 = vld [vmem:[#allocation4 + $0x44] sm:$0xf] }
  0x36   :  { %617 = vmatpush.bf16.msra.mxu2 %v3800_v34  ;;  %630 = vmatpush.bf16.msra.mxu3 %v3864_v35  ;;  %v5063_v16 = vld [vmem:[#allocation4 + $0x1d4] sm:$0xf]  ;;  %v3897_v17 = vld [vmem:[#allocation4 + $0x1d8] sm:$0xf0]  ;;  %v3836_v19 = vor.u32 %v5047_v13, %v3833_v3  ;;  %v3697_v20 = vld [vmem:[#allocation4 + $0x48] sm:$0xf0]  ;;  %v97_v34 = vlaneseq }
  0x37   :  { %v5029_v21 = vld [vmem:[#allocation4 + $0xc4] sm:$0xf]  ;;  %v3761_v22 = vld [vmem:[#allocation4 + $0xc8] sm:$0xf0]  ;;  %v3900_v23 = vor.u32 %v5063_v16, %v3897_v17  ;;  %v3700_v28 = vor.u32 %v5013_v18, %v3697_v20  ;;  %v5011_v42 = vld [vmem:[#allocation4 + $0x34] sm:$0xf] }
  0x38   :  { %v5045_v24 = vld [vmem:[#allocation4 + $0x144] sm:$0xf]  ;;  %v3825_v25 = vld [vmem:[#allocation4 + $0x148] sm:$0xf0]  ;;  %v3764_v29 = vor.u32 %v5029_v21, %v3761_v22  ;;  %v5611_v36 = vand.u32 127, %v97_v34 }
  0x39   :  { %592 = vmatpush.bf16.msra.mxu0 %v3664_v39  ;;  %605 = vmatpush.bf16.msra.mxu1 %v3728_v43  ;;  %v5061_v26 = vld [vmem:[#allocation4 + $0x1c4] sm:$0xf]  ;;  %v3889_v27 = vld [vmem:[#allocation4 + $0x1c8] sm:$0xf0]  ;;  %v3828_v31 = vor.u32 %v5045_v24, %v3825_v25  ;;  %v3689_v43 = vld [vmem:[#allocation4 + $0x38] sm:$0xf0] }
  0x3a   :  { %618 = vmatpush.bf16.msra.mxu2 %v3792_v44  ;;  %631 = vmatpush.bf16.msra.mxu3 %v3856_v48  ;;  %v3892_v32 = vor.u32 %v5061_v26, %v3889_v27  ;;  %v5616_v38 = vadd.s32 128, %v5611_v36  ;;  %v5619_v39 = vadd.s32 256, %v5611_v36  ;;  %v5622_v40 = vadd.s32 384, %v5611_v36  ;;  %v5027_v44 = vld [vmem:[#allocation4 + $0xb4] sm:$0xf] }
  0x3b   :  { %v3692_v46 = vor.u32 %v5011_v42, %v3689_v43  ;;  %v3753_v47 = vld [vmem:[#allocation4 + $0xb8] sm:$0xf0]  ;;  %v5043_v48 = vld [vmem:[#allocation4 + $0x134] sm:$0xf]  ;;  %v5009_v56 = vld [vmem:[#allocation4 + $0x24] sm:$0xf] }
  0x3c   :  { %v3817_v50 = vld [vmem:[#allocation4 + $0x138] sm:$0xf0]  ;;  %v5059_v51 = vld [vmem:[#allocation4 + $0x1b4] sm:$0xf]  ;;  %v3681_v59 = vld [vmem:[#allocation4 + $0x28] sm:$0xf0] }
  0x3d   :  { %637 = vmatpush.bf16.msrb.mxu0 %v3724_v52  ;;  %650 = vmatpush.bf16.msrb.mxu1 %v3788_v53  ;;  %v3756_v53 = vor.u32 %v5027_v44, %v3753_v47  ;;  %v3820_v54 = vor.u32 %v5043_v48, %v3817_v50  ;;  %v3881_v55 = vld [vmem:[#allocation4 + $0x1b8] sm:$0xf0]  ;;  %v5025_v60 = vld [vmem:[#allocation4 + $0xa4] sm:$0xf]  ;;  %v3745_v63 = vld [vmem:[#allocation4 + $0xa8] sm:$0xf0] }
  0x3e   :  { %663 = vmatpush.bf16.msrb.mxu2 %v3852_v57  ;;  %676 = vmatpush.bf16.msrb.mxu3 %v3916_v61  ;;  %v3884_v58 = vor.u32 %v5059_v51, %v3881_v55  ;;  %v5041_v0 = vld [vmem:[#allocation4 + $0x124] sm:$0xf]  ;;  %v3809_v4 = vld [vmem:[#allocation4 + $0x128] sm:$0xf0]  ;;  %v5007_v10 = vld [vmem:[#allocation4 + $0x14] sm:$0xf] }
  0x3f   :  { %v5057_v5 = vld [vmem:[#allocation4 + $0x1a4] sm:$0xf]  ;;  %v3873_v9 = vld [vmem:[#allocation4 + $0x1a8] sm:$0xf0]  ;;  %v3673_v13 = vld [vmem:[#allocation4 + $0x18] sm:$0xf0] }
  0x40   :  { %v3876_v12 = vor.u32 %v5057_v5, %v3873_v9  ;;  %v5023_v3 = vld [vmem:[#allocation4 + $0x94] sm:$0xf]  ;;  %v3865_v21 = vld [vmem:[#allocation4 + $0x198] sm:$0xf0]  ;;  %v5005_v22 = vld [vmem:[#allocation4 + $0x4] sm:$0xf] }
  0x41   :  { %638 = vmatpush.bf16.msrb.mxu0 %v3716_v62  ;;  %651 = vmatpush.bf16.msrb.mxu1 %v3780_v2  ;;  %v3684_v62 = vor.u32 %v5009_v56, %v3681_v59  ;;  %v3748_v2 = vor.u32 %v5025_v60, %v3745_v63  ;;  %v5039_v16 = vld [vmem:[#allocation4 + $0x114] sm:$0xf]  ;;  %v3665_v25 = vld [vmem:[#allocation4 + $0x8] sm:$0xf0]  ;;  %v5021_v26 = vld [vmem:[#allocation4 + $0x84] sm:$0xf] }
  0x42   :  { %664 = vmatpush.bf16.msrb.mxu2 %v3844_v7  ;;  %677 = vmatpush.bf16.msrb.mxu3 %v3908_v8  ;;  %v3812_v8 = vor.u32 %v5041_v0, %v3809_v4  ;;  %v5055_v20 = vld [vmem:[#allocation4 + $0x194] sm:$0xf]  ;;  %v3857_v43 = vld [vmem:[#allocation4 + $0x188] sm:$0xf0]  ;;  %v3975_v27 = vld [vmem:[#allocation6 + $0x70] sm:$0xf] }
  0x43   :  { %v3868_v24 = vor.u32 %v5055_v20, %v3865_v21 }
  0x45   :  { %639 = vmatpush.bf16.msrb.mxu0 %v3708_v14  ;;  %652 = vmatpush.bf16.msrb.mxu1 %v3772_v15  ;;  %v3676_v14 = vor.u32 %v5007_v10, %v3673_v13  ;;  %v3737_v15 = vld [vmem:[#allocation4 + $0x98] sm:$0xf0] }
  0x46   :  { %665 = vmatpush.bf16.msrb.mxu2 %v3836_v19  ;;  %678 = vmatpush.bf16.msrb.mxu3 %v3900_v23  ;;  %v3740_v18 = vor.u32 %v5023_v3, %v3737_v15  ;;  %v3801_v19 = vld [vmem:[#allocation4 + $0x118] sm:$0xf0] }
  0x47   :  { %v3804_v23 = vor.u32 %v5039_v16, %v3801_v19 }
  0x49   :  { %640 = vmatpush.bf16.msrb.mxu0 %v3700_v28  ;;  %653 = vmatpush.bf16.msrb.mxu1 %v3764_v29  ;;  %v3668_v28 = vor.u32 %v5005_v22, %v3665_v25  ;;  %v3729_v29 = vld [vmem:[#allocation4 + $0x88] sm:$0xf0] }
  0x4a   :  { %666 = vmatpush.bf16.msrb.mxu2 %v3828_v31  ;;  %679 = vmatpush.bf16.msrb.mxu3 %v3892_v32  ;;  %v5037_v31 = vld [vmem:[#allocation4 + $0x104] sm:$0xf]  ;;  %v5551_v32 = vmov 0.0   ;;  %v3732_v34 = vor.u32 %v5021_v26, %v3729_v29  ;;  %v5084_v29 = vld [vmem:[#allocation6 + $0x74] sm:$0xf0] }
  0x4d   :  { %641 = vmatpush.bf16.msrb.mxu0 %v3692_v46  ;;  %654 = vmatpush.bf16.msrb.mxu1 %v3756_v53 }
  0x4e   :  { %667 = vmatpush.bf16.msrb.mxu2 %v3820_v54  ;;  %680 = vmatpush.bf16.msrb.mxu3 %v3884_v58 }
  0x51   :  { %642 = vmatpush.bf16.msrb.mxu0 %v3684_v62  ;;  %655 = vmatpush.bf16.msrb.mxu1 %v3748_v2 }
  0x52   :  { %668 = vmatpush.bf16.msrb.mxu2 %v3812_v8  ;;  %681 = vmatpush.bf16.msrb.mxu3 %v3876_v12 }
  0x55   :  { %643 = vmatpush.bf16.msrb.mxu0 %v3676_v14  ;;  %656 = vmatpush.bf16.msrb.mxu1 %v3740_v18 }
  0x56   :  { %669 = vmatpush.bf16.msrb.mxu2 %v3804_v23  ;;  %682 = vmatpush.bf16.msrb.mxu3 %v3868_v24 }
  0x59   :  { %644 = vmatpush.bf16.msrb.mxu0 %v3668_v28  ;;  %657 = vmatpush.bf16.msrb.mxu1 %v3732_v34 }
  0x74   :  { %v5607_v30 = vpop.permute.xlu2 %147 }
  0x7d   :  { %v5613_v37 = vpop.permute.xlu2 %159 }
  0x86   :  { %v5676_v7 = vpop.permute.xlu2 %183 }
  0x8a   :  { %v104_v33 = vpop.permute.xlu0 %103 }
  0x8b   :  { %v5609_v35 = vpop.permute.xlu1 %123  ;;  %vm105_vm2 = vcmp.eq.s32.totalorder %v5611_v36, %v104_v33  ;;  %vm106_vm4 = vcmp.eq.s32.totalorder %v5616_v38, %v104_v33  ;;  %vm107_vm7 = vcmp.eq.s32.totalorder %v5619_v39, %v104_v33  ;;  %vm108_vm9 = vcmp.eq.s32.totalorder %v5622_v40, %v104_v33 }
  0x8c   :  { %vm125_vm11 = vcmp.eq.s32.totalorder %v5611_v36, %v5609_v35  ;;  %vm126_vm13 = vcmp.eq.s32.totalorder %v5616_v38, %v5609_v35 }
  0x93   :  { %v112_v41 = vpop.permute.xlu0 %111 }
  0x94   :  { %vm113_vm0 = vcmp.eq.s32.totalorder %v5611_v36, %v112_v41  ;;  %vm114_vm1 = vcmp.eq.s32.totalorder %v5616_v38, %v112_v41  ;;  %vm115_vm3 = vcmp.eq.s32.totalorder %v5619_v39, %v112_v41  ;;  %vm116_vm5 = vcmp.eq.s32.totalorder %v5622_v40, %v112_v41 }
  0x95   :  { %v5628_v45 = vpop.permute.xlu1 %135  ;;  %vm5632_vm6 = vmor %vm105_vm2, %vm113_vm0  ;;  %vm127_vm0 = vcmp.eq.s32.totalorder %v5619_v39, %v5609_v35 }
  0x96   :  { %vm5639_vm8 = vmor %vm106_vm4, %vm114_vm1  ;;  %vm137_vm15 = vcmp.eq.s32.totalorder %v5611_v36, %v5628_v45  ;;  %vm149_vm4 = vcmp.eq.s32.totalorder %v5611_v36, %v5607_v30 }
  0x97   :  { %vm5646_vm10 = vmor %vm107_vm7, %vm115_vm3  ;;  %vm161_vm3 = vcmp.eq.s32.totalorder %v5611_v36, %v5613_v37 }
  0x98   :  { %vm5654_vm12 = vmor %vm108_vm9, %vm116_vm5 }
  0x99   :  { %vm5662_vm14 = vmor %vm5632_vm6, %vm125_vm11  ;;  %vm185_vm6 = vcmp.eq.s32.totalorder %v5611_v36, %v5676_v7  ;;  %vm128_vm11 = vcmp.eq.s32.totalorder %v5622_v40, %v5609_v35  ;;  %v3793_v35 = vld [vmem:[#allocation4 + $0x108] sm:$0xf0] }
  0x9a   :  { %vm5672_vm1 = vmor %vm5639_vm8, %vm126_vm13  ;;  %vm138_vm8 = vcmp.eq.s32.totalorder %v5616_v38, %v5628_v45  ;;  %v3796_v42 = vor.u32 %v5037_v31, %v3793_v35  ;;  %v4039_v31 = vld [vmem:[#allocation6 + $0xf0] sm:$0xf]  ;;  %v5083_v35 = vld [vmem:[#allocation6 + $0x74] sm:$0xf] }
  0x9b   :  { %vm5680_vm2 = vmor %vm5646_vm10, %vm127_vm0  ;;  %vm162_vm0 = vcmp.eq.s32.totalorder %v5616_v38, %v5613_v37 }
  0x9c   :  { %vm141_vm5 = vmor %vm5662_vm14, %vm137_vm15  ;;  %670 = vmatpush.bf16.msrb.mxu2 %v3796_v42  ;;  %v3976_v42 = vor.u32 %v5084_v29, %v3975_v27  ;;  %v4017_v27 = vld [vmem:[#allocation6 + $0xc8] sm:$0xf0] }
  0x9d   :  { %vm153_vm7 = vmor %vm141_vm5, %vm149_vm4  ;;  %vm186_vm5 = vcmp.eq.s32.totalorder %v5616_v38, %v5676_v7 }
  0x9e   :  { %v5693_v17 = vpop.permute.xlu1 %171  ;;  %vm165_vm10 = vmor %vm153_vm7, %vm161_vm3  ;;  %vm150_vm3 = vcmp.eq.s32.totalorder %v5616_v38, %v5607_v30  ;;  %vm139_vm7 = vcmp.eq.s32.totalorder %v5619_v39, %v5628_v45 }
  0x9f   :  { %vm173_vm9 = vcmp.eq.s32.totalorder %v5611_v36, %v5693_v17  ;;  %vm5708_vm14 = vmor %vm5654_vm12, %vm128_vm11  ;;  %vm174_vm12 = vcmp.eq.s32.totalorder %v5616_v38, %v5693_v17  ;;  %v5053_v36 = vld [vmem:[#allocation4 + $0x184] sm:$0xf]  ;;  %vm151_vm11 = vcmp.eq.s32.totalorder %v5619_v39, %v5607_v30 }
  0xa0   :  { %vm177_vm13 = vmor %vm165_vm10, %vm173_vm9  ;;  %v3860_v44 = vor.u32 %v5053_v36, %v3857_v43  ;;  %vm163_vm10 = vcmp.eq.s32.totalorder %v5619_v39, %v5613_v37  ;;  %v3977_v36 = vld [vmem:[#allocation6 + $0x78] sm:$0xf0] }
  0xa1   :  { %vm189_vm15 = vmor %vm177_vm13, %vm185_vm6  ;;  %vm175_vm13 = vcmp.eq.s32.totalorder %v5619_v39, %v5693_v17 }
  0xa2   :  { %v193_v33 = vsel %vm189_vm15, 1.0, %v5551_v32  ;;  %vm142_vm4 = vmor %vm5672_vm1, %vm138_vm8  ;;  %683 = vmatpush.bf16.msrb.mxu3 %v3860_v44  ;;  %v3980_v44 = vor.u32 %v5083_v35, %v3977_v36  ;;  %v5092_v36 = vld [vmem:[#allocation6 + $0xb4] sm:$0xf0] }
  0xa3   :  { %v197_v41 = vpack.c.bf16 %v193_v33, %v193_v33  ;;  %vm154_vm6 = vmor %vm142_vm4, %vm150_vm3 }
  0xa4   :  { %vm166_vm1 = vmor %vm154_vm6, %vm162_vm0  ;;  %vm187_vm0 = vcmp.eq.s32.totalorder %v5619_v39, %v5676_v7 }
  0xa5   :  { %593 = vmatmul.bf16.vlgmr.msra.gmra.mxu0 %v197_v41  ;;  %vm178_vm8 = vmor %vm166_vm1, %vm174_vm12  ;;  %vm140_vm12 = vcmp.eq.s32.totalorder %v5622_v40, %v5628_v45  ;;  %vm164_vm1 = vcmp.eq.s32.totalorder %v5622_v40, %v5613_v37 }
  0xa6   :  { %vm190_vm9 = vmor %vm178_vm8, %vm186_vm5  ;;  %vm152_vm8 = vcmp.eq.s32.totalorder %v5622_v40, %v5607_v30  ;;  %975 = vmatpush.bf16.msra.mxu0 %v3976_v42  ;;  %v5075_v42 = vld [vmem:[#allocation6 + $0x34] sm:$0xf] }
  0xa7   :  { %v194_v46 = vsel %vm190_vm9, 1.0, %v5551_v32  ;;  %vm143_vm15 = vmor %vm5680_vm2, %vm139_vm7  ;;  %vm176_vm2 = vcmp.eq.s32.totalorder %v5622_v40, %v5693_v17  ;;  %vm188_vm9 = vcmp.eq.s32.totalorder %v5622_v40, %v5676_v7 }
  0xa8   :  { %v198_v38 = vpack.c.bf16 %v194_v46, %v194_v46  ;;  %vm155_vm3 = vmor %vm143_vm15, %vm151_vm11  ;;  %v5099_v46 = vld [vmem:[#allocation6 + $0xf4] sm:$0xf] }
  0xa9   :  { %vm167_vm4 = vmor %vm155_vm3, %vm163_vm10 }
  0xaa   :  { %606 = vmatmul.bf16.vlgmr.msra.gmra.mxu1 %v198_v38  ;;  %vm179_vm5 = vmor %vm167_vm4, %vm175_vm13 }
  0xab   :  { %vm191_vm6 = vmor %vm179_vm5, %vm187_vm0  ;;  %vm753_vm5 = vcmask 1040384  }
  0xac   :  { %v195_v47 = vsel %vm191_vm6, 1.0, %v5551_v32  ;;  %vm144_vm7 = vmor %vm5708_vm14, %vm140_vm12 }
  0xad   :  { %v199_v39 = vpack.c.bf16 %v195_v47, %v195_v47  ;;  %vm156_vm10 = vmor %vm144_vm7, %vm152_vm8 }
  0xae   :  { %vm168_vm11 = vmor %vm156_vm10, %vm164_vm1 }
  0xaf   :  { %619 = vmatmul.bf16.vlgmr.msra.gmra.mxu2 %v199_v39  ;;  %vm180_vm13 = vmor %vm168_vm11, %vm176_vm2 }
  0xb0   :  { %vm192_vm15 = vmor %vm180_vm13, %vm188_vm9  ;;  %1001 = vmatpush.bf16.msra.mxu2 %v3980_v44 }
  0xb1   :  { %v196_v37 = vsel %vm192_vm15, 1.0, %v5551_v32  ;;  %v5100_v32 = vld [vmem:[#allocation6 + $0xf4] sm:$0xf0] }
  0xb2   :  { %v200_v45 = vpack.c.bf16 %v196_v37, %v196_v37  ;;  %v4040_v43 = vor.u32 %v5100_v32, %v4039_v31  ;;  %v5076_v32 = vld [vmem:[#allocation6 + $0x34] sm:$0xf0] }
  0xb4   :  { %632 = vmatmul.bf16.vlgmr.msra.gmra.mxu3 %v200_v45  ;;  %988 = vmatpush.bf16.msra.mxu1 %v4040_v43  ;;  %v3945_v43 = vld [vmem:[#allocation6 + $0x38] sm:$0xf0] }
  0xb5   :  { %645 = vmatmul.bf16.vlgmr.msrb.gmra.mxu0 %v197_v41 }
  0xba   :  { %658 = vmatmul.bf16.vlgmr.msrb.gmra.mxu1 %v198_v38  ;;  %v4041_v38 = vld [vmem:[#allocation6 + $0xf8] sm:$0xf0] }
  0xbb   :  { %v4044_v37 = vor.u32 %v5099_v46, %v4041_v38  ;;  %v3948_v46 = vor.u32 %v5075_v42, %v3945_v43  ;;  %v5091_v38 = vld [vmem:[#allocation6 + $0xb4] sm:$0xf] }
  0xbd   :  { %1014 = vmatpush.bf16.msra.mxu3 %v4044_v37 }
  0xbf   :  { %671 = vmatmul.bf16.vlgmr.msrb.gmra.mxu2 %v199_v39 }
  0xc4   :  { %684 = vmatmul.bf16.vlgmr.msrb.gmra.mxu3 %v200_v45  ;;  %v3967_v45 = vld [vmem:[#allocation6 + $0x60] sm:$0xf] }
 0x122   :  { %v594_v30 = vpop.f32.mrf.mxu0 }
 0x127   :  { %v607_v48 = vpop.f32.mrf.mxu1 }
 0x128   :  { %v608_v51 = vadd.f32 %v607_v48, %v594_v30  ;;  %v5082_v30 = vld [vmem:[#allocation6 + $0x64] sm:$0xf0] }
 0x129   :  { %v3968_v48 = vor.u32 %v5082_v30, %v3967_v45  ;;  %v5074_v45 = vld [vmem:[#allocation6 + $0x24] sm:$0xf0]  ;;  %v3999_v30 = vld [vmem:[#allocation6 + $0xa0] sm:$0xf] }
 0x12a   :  { %v596_v49 = vpop.f32.mrf.mxu0 }
 0x12b   :  { %v4031_v49 = vld [vmem:[#allocation6 + $0xe0] sm:$0xf]  ;;  %976 = vmatpush.bf16.msra.mxu0 %v3968_v48  ;;  %v5090_v48 = vld [vmem:[#allocation6 + $0xa4] sm:$0xf0] }
 0x12f   :  { %v609_v50 = vpop.f32.mrf.mxu1 }
 0x130   :  { %v5098_v50 = vld [vmem:[#allocation6 + $0xe4] sm:$0xf0] }
 0x132   :  { %v620_v52 = vpop.f32.mrf.mxu2  ;;  %v646_v40 = vpop.f32.mrf.mxu0 }
 0x133   :  { %v621_v53 = vadd.f32 %v620_v52, %v608_v51  ;;  %v5081_v51 = vld [vmem:[#allocation6 + $0x64] sm:$0xf] }
 0x137   :  { %v633_v54 = vpop.f32.mrf.mxu3  ;;  %v659_v55 = vpop.f32.mrf.mxu1 }
 0x138   :  { %v5758_v56 = vadd.f32 %v633_v54, %v621_v53  ;;  %v660_v8 = vadd.f32 %v659_v55, %v646_v40  ;;  %v4032_v53 = vor.u32 %v5098_v50, %v4031_v49  ;;  %v3969_v54 = vld [vmem:[#allocation6 + $0x68] sm:$0xf0]  ;;  %v5097_v55 = vld [vmem:[#allocation6 + $0xe4] sm:$0xf] }
 0x139   :  { %v5073_v49 = vld [vmem:[#allocation6 + $0x24] sm:$0xf]  ;;  %v3937_v50 = vld [vmem:[#allocation6 + $0x28] sm:$0xf0] }
 0x13a   :  { %v689_v57 = vrot.slane %v5758_v56, 4  ;;  %v701_v58 = vmul.f32 %v5758_v56, %v5758_v56  ;;  %v622_v59 = vpop.f32.mrf.mxu2  ;;  %v648_v60 = vpop.f32.mrf.mxu0  ;;  %989 = vmatpush.bf16.msra.mxu1 %v4032_v53  ;;  %v4000_v53 = vor.u32 %v5090_v48, %v3999_v30 }
 0x13c   :  { %v690_v61 = vadd.f32 %v689_v57, %v5758_v56  ;;  %v703_v62 = vrot.slane %v701_v58, 4  ;;  %v3972_v57 = vor.u32 %v5081_v51, %v3969_v54  ;;  %v5089_v51 = vld [vmem:[#allocation6 + $0xa4] sm:$0xf]  ;;  %v4001_v54 = vld [vmem:[#allocation6 + $0xa8] sm:$0xf0] }
 0x13e   :  { %v691_v63 = vrot.slane %v690_v61, 2  ;;  %v704_v0 = vadd.f32 %v703_v62, %v701_v58  ;;  %v4033_v58 = vld [vmem:[#allocation6 + $0xe8] sm:$0xf0]  ;;  %v3959_v62 = vld [vmem:[#allocation6 + $0x50] sm:$0xf]  ;;  %1002 = vmatpush.bf16.msra.mxu2 %v3972_v57 }
 0x13f   :  { %v635_v1 = vpop.f32.mrf.mxu3  ;;  %v661_v2 = vpop.f32.mrf.mxu1  ;;  %v5072_v57 = vld [vmem:[#allocation6 + $0x14] sm:$0xf0] }
 0x140   :  { %v692_v4 = vadd.f32 %v691_v63, %v690_v61  ;;  %v705_v5 = vrot.slane %v704_v0, 2  ;;  %v4036_v61 = vor.u32 %v5097_v55, %v4033_v58  ;;  %v5080_v63 = vld [vmem:[#allocation6 + $0x54] sm:$0xf0]  ;;  %v4023_v1 = vld [vmem:[#allocation6 + $0xd0] sm:$0xf]  ;;  %v3940_v58 = vor.u32 %v5073_v49, %v3937_v50 }
 0x141   :  { %v5096_v2 = vld [vmem:[#allocation6 + $0xd4] sm:$0xf0]  ;;  %v3927_v55 = vld [vmem:[#allocation6 + $0x10] sm:$0xf] }
 0x142   :  { %v693_v6 = vrot.slane %v692_v4, 1  ;;  %v706_v7 = vadd.f32 %v705_v5, %v704_v0  ;;  %v672_v9 = vpop.f32.mrf.mxu2  ;;  %v3960_v0 = vor.u32 %v5080_v63, %v3959_v62  ;;  %1015 = vmatpush.bf16.msra.mxu3 %v4036_v61  ;;  %v3991_v61 = vld [vmem:[#allocation6 + $0x90] sm:$0xf]  ;;  %v5088_v62 = vld [vmem:[#allocation6 + $0x94] sm:$0xf0] }
 0x143   :  { %v673_v12 = vadd.f32 %v672_v9, %v660_v8  ;;  %v3961_v8 = vld [vmem:[#allocation6 + $0x58] sm:$0xf0]  ;;  %v5095_v9 = vld [vmem:[#allocation6 + $0xd4] sm:$0xf] }
 0x144   :  { %v694_v10 = vadd.f32 %v693_v6, %v692_v4  ;;  %v707_v11 = vrot.slane %v706_v7, 1  ;;  %v5079_v4 = vld [vmem:[#allocation6 + $0x54] sm:$0xf]  ;;  %977 = vmatpush.bf16.msra.mxu0 %v3960_v0  ;;  %v3929_v0 = vld [vmem:[#allocation6 + $0x18] sm:$0xf0] }
 0x145   :  { %v5071_v63 = vld [vmem:[#allocation6 + $0x14] sm:$0xf] }
 0x146   :  { %v708_v13 = vadd.f32 %v707_v11, %v706_v7  ;;  %v5764_v3 = vmul.f32 0.125, %v694_v10  ;;  %v4024_v7 = vor.u32 %v5096_v2, %v4023_v1  ;;  %v3964_v10 = vor.u32 %v5079_v4, %v3961_v8  ;;  %v4025_v11 = vld [vmem:[#allocation6 + $0xd8] sm:$0xf0]  ;;  %v5087_v1 = vld [vmem:[#allocation6 + $0x94] sm:$0xf] }
 0x147   :  { %v685_v14 = vpop.f32.mrf.mxu3  ;;  %v3993_v2 = vld [vmem:[#allocation6 + $0x98] sm:$0xf0]  ;;  %v3992_v8 = vor.u32 %v5088_v62, %v3991_v61 }
 0x148   :  { %v717_v15 = vmul.f32 0.125, %v708_v13  ;;  %v719_v16 = vmul.f32 %v5764_v3, %v5764_v3  ;;  %v5768_v17 = vadd.f32 %v685_v14, %v673_v12  ;;  %v4028_v13 = vor.u32 %v5095_v9, %v4025_v11  ;;  %v3951_v14 = vld [vmem:[#allocation6 + $0x40] sm:$0xf]  ;;  %990 = vmatpush.bf16.msra.mxu1 %v4024_v7  ;;  %1003 = vmatpush.bf16.msra.mxu2 %v3964_v10  ;;  %v5070_v10 = vld [vmem:[#allocation6 + $0x4] sm:$0xf0] }
 0x149   :  { %v3928_v7 = vor.u32 %v5072_v57, %v3927_v55  ;;  %v3919_v9 = vld [vmem:[#allocation6] sm:$0xf]  ;;  %v3932_v11 = vor.u32 %v5071_v63, %v3929_v0 }
 0x14a   :  { %v721_v18 = vsub.f32 %v717_v15, %v719_v16  ;;  %v695_v19 = vrot.slane %v5768_v17, 4  ;;  %v702_v20 = vmul.f32 %v5768_v17, %v5768_v17  ;;  %v674_v21 = vpop.f32.mrf.mxu2  ;;  %v5078_v15 = vld [vmem:[#allocation6 + $0x44] sm:$0xf0]  ;;  %v4015_v16 = vld [vmem:[#allocation6 + $0xc0] sm:$0xf]  ;;  %1016 = vmatpush.bf16.msra.mxu3 %v4028_v13 }
 0x14b   :  { %v3983_v13 = vld [vmem:[#allocation6 + $0x80] sm:$0xf] }
 0x14c   :  { %v696_v22 = vadd.f32 %v695_v19, %v5768_v17  ;;  %v709_v23 = vrot.slane %v702_v20, 4  ;;  %v723_v24 = vmax.f32 %v721_v18, 0.0  ;;  %v3952_v18 = vor.u32 %v5078_v15, %v3951_v14  ;;  %v5094_v19 = vld [vmem:[#allocation6 + $0xc4] sm:$0xf0]  ;;  %v5069_v15 = vld [vmem:[#allocation6 + $0x4] sm:$0xf] }
 0x14d   :  { %v5086_v14 = vld [vmem:[#allocation6 + $0x84] sm:$0xf0] }
 0x14e   :  { %v697_v25 = vrot.slane %v696_v22, 2  ;;  %v710_v26 = vadd.f32 %v709_v23, %v702_v20  ;;  %v5774_v41 = vadd.f32 1e-05, %v723_v24  ;;  %v5077_v20 = vld [vmem:[#allocation6 + $0x44] sm:$0xf]  ;;  %v4016_v23 = vor.u32 %v5094_v19, %v4015_v16  ;;  %978 = vmatpush.bf16.msra.mxu0 %v3952_v18 }
 0x14f   :  { %v687_v28 = vpop.f32.mrf.mxu3  ;;  %v3953_v24 = vld [vmem:[#allocation6 + $0x48] sm:$0xf0]  ;;  %v5085_v19 = vld [vmem:[#allocation6 + $0x84] sm:$0xf] }
 0x150   :  { %v698_v33 = vadd.f32 %v697_v25, %v696_v22  ;;  %v711_v34 = vrot.slane %v710_v26, 2  ;;  %5370 = vrsqrt.f32 %v5774_v41  ;;  %v5093_v25 = vld [vmem:[#allocation6 + $0xc4] sm:$0xf]  ;;  %v3943_v28 = vld [vmem:[#allocation6 + $0x30] sm:$0xf]  ;;  %991 = vmatpush.bf16.msra.mxu1 %v4016_v23  ;;  %vm736_vm4 = vweird.f32 %v5774_v41 }
 0x151   :  { %v4020_v31 = vor.u32 %v5093_v25, %v4017_v27  ;;  %v3944_v35 = vor.u32 %v5076_v32, %v3943_v28  ;;  %v3921_v18 = vld [vmem:[#allocation6 + $0x8] sm:$0xf0]  ;;  %v3984_v25 = vor.u32 %v5086_v14, %v3983_v13  ;;  %v4103_v13 = vld [vmem:[#allocation6 + $0x170] sm:$0xf]  ;;  %v5116_v14 = vld [vmem:[#allocation6 + $0x174] sm:$0xf0] }
 0x152   :  { %v699_v47 = vrot.slane %v698_v33, 1  ;;  %v712_v39 = vadd.f32 %v711_v34, %v710_v26  ;;  %v3956_v26 = vor.u32 %v5077_v20, %v3953_v24  ;;  %v3985_v20 = vld [vmem:[#allocation6 + $0x88] sm:$0xf0]  ;;  %v3920_v24 = vor.u32 %v5070_v10, %v3919_v9 }
 0x153   :  { %1017 = vmatpush.bf16.msra.mxu3 %v4020_v31  ;;  %979 = vmatpush.bf16.msra.mxu0 %v3944_v35  ;;  %v3988_v27 = vor.u32 %v5085_v19, %v3985_v20  ;;  %v4167_v19 = vld [vmem:[#allocation6 + $0x1f0] sm:$0xf]  ;;  %v5132_v20 = vld [vmem:[#allocation6 + $0x1f4] sm:$0xf0] }
 0x154   :  { %v700_v52 = vadd.f32 %v699_v47, %v698_v33  ;;  %v713_v40 = vrot.slane %v712_v39, 1  ;;  %v4007_v33 = vld [vmem:[#allocation6 + $0xb0] sm:$0xf]  ;;  %1004 = vmatpush.bf16.msra.mxu2 %v3956_v26  ;;  %v4009_v47 = vld [vmem:[#allocation6 + $0xb8] sm:$0xf0]  ;;  %v3924_v26 = vor.u32 %v5069_v15, %v3921_v18  ;;  %v4104_v18 = vor.u32 %v5116_v14, %v4103_v13 }
 0x155   :  { %v4008_v44 = vor.u32 %v5092_v36, %v4007_v33  ;;  %v4012_v37 = vor.u32 %v5091_v38, %v4009_v47  ;;  %v727_v47 = vld [vmem:[#allocation9 + $0x1] ss:$8 sm:$0x3]  ;;  %v5109_v14 = vld [vmem:[#allocation6 + $0x144] sm:$0xf] }
 0x156   :  { %v714_v59 = vadd.f32 %v713_v40, %v712_v39  ;;  %v5777_v60 = vmul.f32 0.125, %v700_v52  ;;  %v5781_v21 = vpop.eup %5370  ;;  %v3935_v39 = vld [vmem:[#allocation6 + $0x20] sm:$0xf]  ;;  %v5126_v13 = vld [vmem:[#allocation6 + $0x1c4] sm:$0xf0] }
 0x157   :  { %v731_v34 = vmul.f32 %v5781_v21, %v5774_v41  ;;  %992 = vmatpush.bf16.msra.mxu1 %v4008_v44  ;;  %v3936_v40 = vor.u32 %v5074_v45, %v3935_v39  ;;  %1018 = vmatpush.bf16.msra.mxu3 %v4012_v37  ;;  %vm737_vm0 = vweird.f32 %v5781_v21 }
 0x158   :  { %v718_v5 = vmul.f32 0.125, %v714_v59  ;;  %v720_v6 = vmul.f32 %v5777_v60, %v5777_v60  ;;  %1005 = vmatpush.bf16.msra.mxu2 %v3948_v46  ;;  %v4004_v59 = vor.u32 %v5089_v51, %v4001_v54  ;;  %vm738_vm6 = vmor %vm736_vm4, %vm737_vm0 }
 0x159   :  { %v732_v52 = vmul.f32 %v5781_v21, %v731_v34  ;;  %980 = vmatpush.bf16.msra.mxu0 %v3936_v40  ;;  %v725_v34 = vld [vmem:[#allocation9] ss:$8 sm:$0x3] }
 0x15a   :  { %v722_v12 = vsub.f32 %v718_v5, %v720_v6 }
 0x15b   :  { %v733_v5 = vmul.f32 0.5, %v732_v52  ;;  %993 = vmatpush.bf16.msra.mxu1 %v4000_v53  ;;  %1019 = vmatpush.bf16.msra.mxu3 %v4004_v59 }
 0x15c   :  { %v724_v22 = vmax.f32 %v722_v12, 0.0  ;;  %1006 = vmatpush.bf16.msra.mxu2 %v3940_v58  ;;  %v3996_v12 = vor.u32 %v5087_v1, %v3993_v2 }
 0x15d   :  { %981 = vmatpush.bf16.msra.mxu0 %v3928_v7 }
 0x15e   :  { %v5783_v29 = vadd.f32 1e-05, %v724_v22  ;;  %v734_v22 = vsub.f32 1.5, %v733_v5 }
 0x15f   :  { %994 = vmatpush.bf16.msra.mxu1 %v3992_v8  ;;  %1020 = vmatpush.bf16.msra.mxu3 %v3996_v12 }
 0x160   :  { %5372 = vrsqrt.f32 %v5783_v29  ;;  %1007 = vmatpush.bf16.msra.mxu2 %v3932_v11  ;;  %v735_v31 = vmul.f32 %v5781_v21, %v734_v22  ;;  %vm746_vm3 = vweird.f32 %v5783_v29 }
 0x161   :  { %982 = vmatpush.bf16.msra.mxu0 %v3920_v24 }
 0x162   :  { %v739_v36 = vsel %vm738_vm6, %v5781_v21, %v735_v31 }
 0x163   :  { %995 = vmatpush.bf16.msra.mxu1 %v3984_v25  ;;  %1021 = vmatpush.bf16.msra.mxu3 %v3988_v27  ;;  %v5115_v27 = vld [vmem:[#allocation6 + $0x174] sm:$0xf] }
 0x164   :  { %1008 = vmatpush.bf16.msra.mxu2 %v3924_v26  ;;  %v4168_v26 = vor.u32 %v5132_v20, %v4167_v19  ;;  %v5125_v19 = vld [vmem:[#allocation6 + $0x1c4] sm:$0xf]  ;;  %v4145_v20 = vld [vmem:[#allocation6 + $0x1c8] sm:$0xf0] }
 0x165   :  { %1314 = vmatpush.bf16.msrb.mxu0 %v4104_v18 }
 0x166   :  { %v5373_v4 = vpop.eup %5372 }
 0x167   :  { %v741_v6 = vmul.f32 %v5373_v4, %v5783_v29  ;;  %vm747_vm14 = vweird.f32 %v5373_v4  ;;  %1327 = vmatpush.bf16.msrb.mxu1 %v4168_v26  ;;  %v5108_v26 = vld [vmem:[#allocation6 + $0x134] sm:$0xf0] }
 0x168   :  { %vm748_vm12 = vmor %vm746_vm3, %vm747_vm14 }
 0x169   :  { %v742_v16 = vmul.f32 %v5373_v4, %v741_v6 }
 0x16b   :  { %v743_v23 = vmul.f32 0.5, %v742_v16 }
 0x16d   :  { %v744_v28 = vsub.f32 1.5, %v743_v23 }
 0x16f   :  { %v745_v32 = vmul.f32 %v5373_v4, %v744_v28  ;;  %v4105_v28 = vld [vmem:[#allocation6 + $0x178] sm:$0xf0] }
 0x171   :  { %v749_v33 = vsel %vm748_vm12, %v5373_v4, %v745_v32 }
 0x172   :  { %v752_v35 = vrot.slane %v749_v33, 7  ;;  %v4108_v33 = vor.u32 %v5115_v27, %v4105_v28  ;;  %v4135_v27 = vld [vmem:[#allocation6 + $0x1b0] sm:$0xf] }
 0x174   :  { %v754_v42 = vsel %vm753_vm5, %v739_v36, %v752_v35  ;;  %v4169_v35 = vld [vmem:[#allocation6 + $0x1f8] sm:$0xf0]  ;;  %1340 = vmatpush.bf16.msrb.mxu2 %v4108_v33 }
 0x175   :  { %v756_v43 = vmul.f32 %v754_v42, %v725_v34  ;;  %v5131_v34 = vld [vmem:[#allocation6 + $0x1f4] sm:$0xf]  ;;  %v4073_v33 = vld [vmem:[#allocation6 + $0x138] sm:$0xf0] }
 0x177   :  { %v759_v44 = vperm.slane %v756_v43, 1  ;;  %v758_v46 = vperm.slane %v756_v43, 0  ;;  %v4172_v43 = vor.u32 %v5131_v34, %v4169_v35 }
 0x179   :  { %v763_v29 = vmul.f32 %v759_v44, %v5777_v60  ;;  %v762_v39 = vmul.f32 %v758_v46, %v5764_v3  ;;  %v771_v45 = vmul.f32 %v759_v44, %v5768_v17  ;;  %v770_v30 = vmul.f32 %v758_v46, %v5758_v56  ;;  %v4095_v44 = vld [vmem:[#allocation6 + $0x160] sm:$0xf]  ;;  %v5114_v46 = vld [vmem:[#allocation6 + $0x164] sm:$0xf0]  ;;  %1353 = vmatpush.bf16.msrb.mxu3 %v4172_v43  ;;  %v4137_v43 = vld [vmem:[#allocation6 + $0x1b8] sm:$0xf0] }
 0x17b   :  { %v766_v38 = vrot.slane %v763_v29, 7 }
 0x17d   :  { %v767_v41 = vsel %vm753_vm5, %v762_v39, %v766_v38  ;;  %v4159_v39 = vld [vmem:[#allocation6 + $0x1e0] sm:$0xf] }
 0x17e   :  { %v769_v37 = vsub.f32 %v727_v47, %v767_v41  ;;  %v4096_v47 = vor.u32 %v5114_v46, %v4095_v44  ;;  %v5130_v41 = vld [vmem:[#allocation6 + $0x1e4] sm:$0xf0] }
 0x180   :  { %v773_v48 = vperm.slane %v769_v37, 0  ;;  %v774_v21 = vperm.slane %v769_v37, 1  ;;  %1315 = vmatpush.bf16.msrb.mxu0 %v4096_v47  ;;  %v4127_v47 = vld [vmem:[#allocation6 + $0x1a0] sm:$0xf] }
 0x182   :  { %v777_v49 = vadd.f32 %v773_v48, %v770_v30  ;;  %v778_v50 = vadd.f32 %v774_v21, %v771_v45  ;;  %v4160_v45 = vor.u32 %v5130_v41, %v4159_v39  ;;  %v5113_v30 = vld [vmem:[#allocation6 + $0x164] sm:$0xf]  ;;  %v4097_v48 = vld [vmem:[#allocation6 + $0x168] sm:$0xf0]  ;;  %v5122_v41 = vld [vmem:[#allocation6 + $0x1a4] sm:$0xf0] }
 0x183   :  { %v5129_v21 = vld [vmem:[#allocation6 + $0x1e4] sm:$0xf] }
 0x184   :  { %v779_v51 = vmax.f32 %v777_v49, 0.0  ;;  %v780_v52 = vmax.f32 %v778_v50, 0.0  ;;  %1328 = vmatpush.bf16.msrb.mxu1 %v4160_v45  ;;  %v4065_v45 = vld [vmem:[#allocation6 + $0x128] sm:$0xf0] }
 0x186   :  { %v781_v40 = vpack.c.bf16 %v779_v51, %v779_v51  ;;  %v782_v53 = vpack.c.bf16 %v780_v52, %v780_v52  ;;  %v4100_v51 = vor.u32 %v5113_v30, %v4097_v48  ;;  %v4161_v52 = vld [vmem:[#allocation6 + $0x1e8] sm:$0xf0]  ;;  %v4128_v48 = vor.u32 %v5122_v41, %v4127_v47 }
 0x188   :  { %983 = vmatmul.bf16.vlgmr.msra.gmra.mxu0 %v781_v40  ;;  %996 = vmatmul.bf16.vlgmr.msra.gmra.mxu1 %v782_v53 }
 0x189   :  { %1009 = vmatmul.bf16.vlgmr.msra.gmra.mxu2 %v781_v40  ;;  %1022 = vmatmul.bf16.vlgmr.msra.gmra.mxu3 %v782_v53  ;;  %v4164_v53 = vor.u32 %v5129_v21, %v4161_v52  ;;  %v5121_v21 = vld [vmem:[#allocation6 + $0x1a4] sm:$0xf]  ;;  %v5104_v52 = vld [vmem:[#allocation6 + $0x114] sm:$0xf0] }
 0x18a   :  { %1341 = vmatpush.bf16.msrb.mxu2 %v4100_v51  ;;  %v4055_v51 = vld [vmem:[#allocation6 + $0x110] sm:$0xf] }
 0x18b   :  { %1354 = vmatpush.bf16.msrb.mxu3 %v4164_v53 }
 0x205   :  { %v984_v3 = vpop.f32.mrf.mxu0  ;;  %v997_v60 = vpop.f32.mrf.mxu1 }
 0x206   :  { %v5801_v54 = vadd.f32 %v997_v60, %v984_v3  ;;  %v4087_v3 = vld [vmem:[#allocation6 + $0x150] sm:$0xf]  ;;  %v5112_v60 = vld [vmem:[#allocation6 + $0x154] sm:$0xf0] }
 0x208   :  { %v1027_v17 = vrot.slane %v5801_v54, 4  ;;  %v1039_v56 = vmul.f32 %v5801_v54, %v5801_v54 }
 0x20a   :  { %v1028_v55 = vadd.f32 %v1027_v17, %v5801_v54  ;;  %v1041_v57 = vrot.slane %v1039_v56, 4 }
 0x20c   :  { %v1029_v58 = vrot.slane %v1028_v55, 2  ;;  %v1042_v59 = vadd.f32 %v1041_v57, %v1039_v56  ;;  %v1010_v61 = vpop.f32.mrf.mxu2  ;;  %v1023_v62 = vpop.f32.mrf.mxu3  ;;  %v4151_v57 = vld [vmem:[#allocation6 + $0x1d0] sm:$0xf] }
 0x20d   :  { %v5807_v63 = vadd.f32 %v1023_v62, %v1010_v61  ;;  %v986_v0 = vpop.f32.mrf.mxu0  ;;  %v999_v1 = vpop.f32.mrf.mxu1  ;;  %v5111_v62 = vld [vmem:[#allocation6 + $0x154] sm:$0xf] }
 0x20e   :  { %v1030_v2 = vadd.f32 %v1029_v58, %v1028_v55  ;;  %v1043_v4 = vrot.slane %v1042_v59, 2  ;;  %v4088_v55 = vor.u32 %v5112_v60, %v4087_v3  ;;  %v5128_v58 = vld [vmem:[#allocation6 + $0x1d4] sm:$0xf0]  ;;  %v4089_v0 = vld [vmem:[#allocation6 + $0x158] sm:$0xf0] }
 0x20f   :  { %v1033_v5 = vrot.slane %v5807_v63, 4  ;;  %v1040_v6 = vmul.f32 %v5807_v63, %v5807_v63  ;;  %v4152_v61 = vor.u32 %v5128_v58, %v4151_v57  ;;  %v5120_v60 = vld [vmem:[#allocation6 + $0x194] sm:$0xf0]  ;;  %v4056_v57 = vor.u32 %v5104_v52, %v4055_v51  ;;  %v5119_v58 = vld [vmem:[#allocation6 + $0x194] sm:$0xf] }
 0x210   :  { %v1031_v7 = vrot.slane %v1030_v2, 1  ;;  %v1044_v8 = vadd.f32 %v1043_v4, %v1042_v59  ;;  %1316 = vmatpush.bf16.msrb.mxu0 %v4088_v55  ;;  %v4092_v4 = vor.u32 %v5111_v62, %v4089_v0  ;;  %v4057_v55 = vld [vmem:[#allocation6 + $0x118] sm:$0xf0]  ;;  %v4047_v0 = vld [vmem:[#allocation6 + $0x100] sm:$0xf] }
 0x211   :  { %v1034_v9 = vadd.f32 %v1033_v5, %v5807_v63  ;;  %v1047_v10 = vrot.slane %v1040_v6, 4  ;;  %v5127_v5 = vld [vmem:[#allocation6 + $0x1d4] sm:$0xf]  ;;  %1329 = vmatpush.bf16.msrb.mxu1 %v4152_v61  ;;  %v4121_v61 = vld [vmem:[#allocation6 + $0x198] sm:$0xf0] }
 0x212   :  { %v1032_v11 = vadd.f32 %v1031_v7, %v1030_v2  ;;  %v1045_v12 = vrot.slane %v1044_v8, 1  ;;  %1342 = vmatpush.bf16.msrb.mxu2 %v4092_v4 }
 0x213   :  { %v1035_v15 = vrot.slane %v1034_v9, 2  ;;  %v1048_v16 = vadd.f32 %v1047_v10, %v1040_v6  ;;  %v4153_v6 = vld [vmem:[#allocation6 + $0x1d8] sm:$0xf0]  ;;  %v4143_v10 = vld [vmem:[#allocation6 + $0x1c0] sm:$0xf] }
 0x214   :  { %v1046_v22 = vadd.f32 %v1045_v12, %v1044_v8  ;;  %v5813_v23 = vmul.f32 0.125, %v1032_v11  ;;  %v1012_v24 = vpop.f32.mrf.mxu2  ;;  %v1025_v25 = vpop.f32.mrf.mxu3  ;;  %v4156_v7 = vor.u32 %v5127_v5, %v4153_v6  ;;  %v4079_v8 = vld [vmem:[#allocation6 + $0x140] sm:$0xf]  ;;  %v5118_v6 = vld [vmem:[#allocation6 + $0x184] sm:$0xf0] }
 0x215   :  { %v1036_v31 = vadd.f32 %v1035_v15, %v1034_v9  ;;  %v1049_v32 = vrot.slane %v1048_v16, 2  ;;  %v5110_v9 = vld [vmem:[#allocation6 + $0x144] sm:$0xf0]  ;;  %v4081_v15 = vld [vmem:[#allocation6 + $0x148] sm:$0xf0]  ;;  %v4148_v25 = vor.u32 %v5125_v19, %v4145_v20 }
 0x216   :  { %v1055_v36 = vmul.f32 0.125, %v1046_v22  ;;  %v1057_v42 = vmul.f32 %v5813_v23, %v5813_v23  ;;  %v4080_v12 = vor.u32 %v5110_v9, %v4079_v8  ;;  %1355 = vmatpush.bf16.msrb.mxu3 %v4156_v7  ;;  %v4084_v18 = vor.u32 %v5109_v14, %v4081_v15  ;;  %v4071_v22 = vld [vmem:[#allocation6 + $0x130] sm:$0xf]  ;;  %v4111_v5 = vld [vmem:[#allocation6 + $0x180] sm:$0xf] }
 0x217   :  { %v1037_v29 = vrot.slane %v1036_v31, 1  ;;  %v1050_v38 = vadd.f32 %v1049_v32, %v1048_v16  ;;  %v4144_v16 = vor.u32 %v5126_v13, %v4143_v10  ;;  %v4072_v28 = vor.u32 %v5108_v26, %v4071_v22  ;;  %v5107_v32 = vld [vmem:[#allocation6 + $0x134] sm:$0xf]  ;;  %v5101_v10 = vld [vmem:[#allocation6 + $0x104] sm:$0xf] }
 0x218   :  { %v1059_v37 = vsub.f32 %v1055_v36, %v1057_v42  ;;  %1317 = vmatpush.bf16.msrb.mxu0 %v4080_v12  ;;  %1343 = vmatpush.bf16.msrb.mxu2 %v4084_v18  ;;  %v4076_v36 = vor.u32 %v5107_v32, %v4073_v33  ;;  %v5123_v42 = vld [vmem:[#allocation6 + $0x1b4] sm:$0xf]  ;;  %v4124_v9 = vor.u32 %v5119_v58, %v4121_v61  ;;  %v5117_v13 = vld [vmem:[#allocation6 + $0x184] sm:$0xf]  ;;  %v4113_v14 = vld [vmem:[#allocation6 + $0x188] sm:$0xf0] }
 0x219   :  { %v1038_v49 = vadd.f32 %v1037_v29, %v1036_v31  ;;  %v1051_v50 = vrot.slane %v1050_v38, 1  ;;  %1330 = vmatpush.bf16.msrb.mxu1 %v4144_v16  ;;  %v5124_v31 = vld [vmem:[#allocation6 + $0x1b4] sm:$0xf0]  ;;  %v4140_v46 = vor.u32 %v5123_v42, %v4137_v43  ;;  %v4063_v29 = vld [vmem:[#allocation6 + $0x120] sm:$0xf]  ;;  %v4112_v16 = vor.u32 %v5118_v6, %v4111_v5 }
 0x21a   :  { %v1061_v40 = vmax.f32 %v1059_v37, 0.0  ;;  %v4136_v35 = vor.u32 %v5124_v31, %v4135_v27  ;;  %1356 = vmatpush.bf16.msrb.mxu3 %v4148_v25  ;;  %v5105_v37 = vld [vmem:[#allocation6 + $0x124] sm:$0xf]  ;;  %v4116_v22 = vor.u32 %v5117_v13, %v4113_v14  ;;  %v4231_v6 = vld [vmem:[#allocation6 + $0x270] sm:$0xf] }
 0x21b   :  { %v1052_v17 = vadd.f32 %v1051_v50, %v1050_v38  ;;  %v5817_v56 = vmul.f32 0.125, %v1038_v49  ;;  %v5106_v38 = vld [vmem:[#allocation6 + $0x124] sm:$0xf0]  ;;  %v4129_v49 = vld [vmem:[#allocation6 + $0x1a8] sm:$0xf0]  ;;  %v4068_v50 = vor.u32 %v5105_v37, %v4065_v45 }
 0x21c   :  { %v5819_v59 = vadd.f32 1e-05, %v1061_v40  ;;  %1318 = vmatpush.bf16.msrb.mxu0 %v4072_v28  ;;  %v4064_v30 = vor.u32 %v5106_v38, %v4063_v29  ;;  %1344 = vmatpush.bf16.msrb.mxu2 %v4076_v36  ;;  %v4119_v40 = vld [vmem:[#allocation6 + $0x190] sm:$0xf]  ;;  %v4132_v3 = vor.u32 %v5121_v21, %v4129_v49 }
 0x21d   :  { %v1056_v1 = vmul.f32 0.125, %v1052_v17  ;;  %v1058_v2 = vmul.f32 %v5817_v56, %v5817_v56  ;;  %1331 = vmatpush.bf16.msrb.mxu1 %v4136_v35  ;;  %v5103_v17 = vld [vmem:[#allocation6 + $0x114] sm:$0xf]  ;;  %v4120_v62 = vor.u32 %v5120_v60, %v4119_v40  ;;  %v1064_v28 = vld [vmem:[#allocation9 + $0x2] ss:$8 sm:$0x3] }
 0x21e   :  { %5374 = vrsqrt.f32 %v5819_v59  ;;  %1357 = vmatpush.bf16.msrb.mxu3 %v4140_v46  ;;  %v4060_v4 = vor.u32 %v5103_v17, %v4057_v55  ;;  %vm1075_vm9 = vweird.f32 %v5819_v59  ;;  %v1066_v29 = vld [vmem:[#allocation9 + $0x3] ss:$8 sm:$0x3] }
 0x21f   :  { %v1060_v11 = vsub.f32 %v1056_v1, %v1058_v2  ;;  %v5102_v1 = vld [vmem:[#allocation6 + $0x104] sm:$0xf0] }
 0x220   :  { %1319 = vmatpush.bf16.msrb.mxu0 %v4064_v30  ;;  %1345 = vmatpush.bf16.msrb.mxu2 %v4068_v50  ;;  %v4048_v12 = vor.u32 %v5102_v1, %v4047_v0 }
 0x221   :  { %v1062_v24 = vmax.f32 %v1060_v11, 0.0  ;;  %1332 = vmatpush.bf16.msrb.mxu1 %v4128_v48  ;;  %v4049_v11 = vld [vmem:[#allocation6 + $0x108] sm:$0xf0] }
 0x222   :  { %1358 = vmatpush.bf16.msrb.mxu3 %v4132_v3  ;;  %v4052_v18 = vor.u32 %v5101_v10, %v4049_v11  ;;  %v4295_v11 = vld [vmem:[#allocation6 + $0x2f0] sm:$0xf] }
 0x223   :  { %v5824_v34 = vadd.f32 1e-05, %v1062_v24 }
 0x224   :  { %v5826_v44 = vpop.eup %5374  ;;  %1320 = vmatpush.bf16.msrb.mxu0 %v4056_v57  ;;  %1346 = vmatpush.bf16.msrb.mxu2 %v4060_v4 }
 0x225   :  { %v1070_v39 = vmul.f32 %v5826_v44, %v5819_v59  ;;  %5376 = vrsqrt.f32 %v5824_v34  ;;  %1333 = vmatpush.bf16.msrb.mxu1 %v4120_v62  ;;  %vm1076_vm8 = vweird.f32 %v5826_v44  ;;  %vm1085_vm2 = vweird.f32 %v5824_v34 }
 0x226   :  { %1359 = vmatpush.bf16.msrb.mxu3 %v4124_v9  ;;  %vm1077_vm10 = vmor %vm1075_vm9, %vm1076_vm8 }
 0x227   :  { %v1071_v53 = vmul.f32 %v5826_v44, %v1070_v39 }
 0x228   :  { %1321 = vmatpush.bf16.msrb.mxu0 %v4048_v12  ;;  %1347 = vmatpush.bf16.msrb.mxu2 %v4052_v18  ;;  %v5164_v12 = vld [vmem:[#allocation6 + $0x2f4] sm:$0xf0]  ;;  %v4233_v18 = vld [vmem:[#allocation6 + $0x278] sm:$0xf0] }
 0x229   :  { %v1072_v7 = vmul.f32 0.5, %v1071_v53  ;;  %1334 = vmatpush.bf16.msrb.mxu1 %v4112_v16  ;;  %v5147_v16 = vld [vmem:[#allocation6 + $0x274] sm:$0xf] }
 0x22a   :  { %1360 = vmatpush.bf16.msrb.mxu3 %v4116_v22 }
 0x22b   :  { %v5377_v2 = vpop.eup %5376  ;;  %v1073_v19 = vsub.f32 1.5, %v1072_v7  ;;  %v5148_v7 = vld [vmem:[#allocation6 + $0x274] sm:$0xf0] }
 0x22c   :  { %v1080_v8 = vmul.f32 %v5377_v2, %v5824_v34  ;;  %vm1086_vm1 = vweird.f32 %v5377_v2  ;;  %v4232_v10 = vor.u32 %v5148_v7, %v4231_v6  ;;  %v4271_v6 = vld [vmem:[#allocation6 + $0x2c0] sm:$0xf]  ;;  %v5158_v7 = vld [vmem:[#allocation6 + $0x2c4] sm:$0xf0] }
 0x22d   :  { %v1074_v25 = vmul.f32 %v5826_v44, %v1073_v19  ;;  %vm1087_vm7 = vmor %vm1085_vm2, %vm1086_vm1 }
 0x22e   :  { %v1081_v15 = vmul.f32 %v5377_v2, %v1080_v8  ;;  %1653 = vmatpush.bf16.msra.mxu0 %v4232_v10  ;;  %v4272_v10 = vor.u32 %v5158_v7, %v4271_v6 }
 0x22f   :  { %v1078_v32 = vsel %vm1077_vm10, %v5826_v44, %v1074_v25  ;;  %v4236_v25 = vor.u32 %v5147_v16, %v4233_v18  ;;  %v4199_v16 = vld [vmem:[#allocation6 + $0x230] sm:$0xf]  ;;  %v5140_v18 = vld [vmem:[#allocation6 + $0x234] sm:$0xf0] }
 0x230   :  { %v1082_v20 = vmul.f32 0.5, %v1081_v15  ;;  %v4296_v15 = vor.u32 %v5164_v12, %v4295_v11  ;;  %v4209_v11 = vld [vmem:[#allocation6 + $0x248] sm:$0xf0]  ;;  %v5157_v12 = vld [vmem:[#allocation6 + $0x2c4] sm:$0xf] }
 0x231   :  { %1679 = vmatpush.bf16.msra.mxu2 %v4236_v25  ;;  %v5156_v25 = vld [vmem:[#allocation6 + $0x2b4] sm:$0xf0] }
 0x232   :  { %v1083_v24 = vsub.f32 1.5, %v1082_v20  ;;  %1666 = vmatpush.bf16.msra.mxu1 %v4296_v15 }
 0x234   :  { %v1084_v26 = vmul.f32 %v5377_v2, %v1083_v24 }
 0x236   :  { %v1088_v27 = vsel %vm1087_vm7, %v5377_v2, %v1084_v26  ;;  %v5163_v26 = vld [vmem:[#allocation6 + $0x2f4] sm:$0xf] }
 0x237   :  { %v1091_v31 = vrot.slane %v1088_v27, 7  ;;  %v4297_v27 = vld [vmem:[#allocation6 + $0x2f8] sm:$0xf0] }
 0x239   :  { %v1092_v33 = vsel %vm753_vm5, %v1078_v32, %v1091_v31  ;;  %v4300_v32 = vor.u32 %v5163_v26, %v4297_v27  ;;  %v5139_v26 = vld [vmem:[#allocation6 + $0x234] sm:$0xf] }
 0x23a   :  { %v1094_v35 = vmul.f32 %v1092_v33, %v1064_v28  ;;  %v4223_v33 = vld [vmem:[#allocation6 + $0x260] sm:$0xf] }
 0x23b   :  { %1692 = vmatpush.bf16.msra.mxu3 %v4300_v32  ;;  %v4265_v32 = vld [vmem:[#allocation6 + $0x2b8] sm:$0xf0] }
 0x23c   :  { %v1097_v36 = vperm.slane %v1094_v35, 1  ;;  %v1096_v42 = vperm.slane %v1094_v35, 0  ;;  %v5146_v35 = vld [vmem:[#allocation6 + $0x264] sm:$0xf0] }
 0x23e   :  { %v1101_v43 = vmul.f32 %v1097_v36, %v5817_v56  ;;  %v1100_v34 = vmul.f32 %v1096_v42, %v5813_v23  ;;  %v1109_v47 = vmul.f32 %v1097_v36, %v5807_v63  ;;  %v1108_v39 = vmul.f32 %v1096_v42, %v5801_v54 }
 0x240   :  { %v1104_v46 = vrot.slane %v1101_v43, 7  ;;  %v4224_v43 = vor.u32 %v5146_v35, %v4223_v33 }
 0x242   :  { %v1105_v38 = vsel %vm753_vm5, %v1100_v34, %v1104_v46  ;;  %v4287_v46 = vld [vmem:[#allocation6 + $0x2e0] sm:$0xf]  ;;  %1654 = vmatpush.bf16.msra.mxu0 %v4224_v43  ;;  %v5138_v43 = vld [vmem:[#allocation6 + $0x224] sm:$0xf0] }
 0x243   :  { %v1107_v59 = vsub.f32 %v1066_v29, %v1105_v38  ;;  %v5162_v29 = vld [vmem:[#allocation6 + $0x2e4] sm:$0xf0] }
 0x245   :  { %v1111_v41 = vperm.slane %v1107_v59, 0  ;;  %v1112_v44 = vperm.slane %v1107_v59, 1  ;;  %v4288_v59 = vor.u32 %v5162_v29, %v4287_v46 }
 0x247   :  { %v1115_v37 = vadd.f32 %v1111_v41, %v1108_v39  ;;  %v1116_v45 = vadd.f32 %v1112_v44, %v1109_v47  ;;  %v5145_v47 = vld [vmem:[#allocation6 + $0x264] sm:$0xf]  ;;  %v4225_v39 = vld [vmem:[#allocation6 + $0x268] sm:$0xf0]  ;;  %1667 = vmatpush.bf16.msra.mxu1 %v4288_v59 }
 0x248   :  { %v4228_v44 = vor.u32 %v5145_v47, %v4225_v39  ;;  %v5137_v59 = vld [vmem:[#allocation6 + $0x224] sm:$0xf]  ;;  %v4193_v39 = vld [vmem:[#allocation6 + $0x228] sm:$0xf0] }
 0x249   :  { %v1117_v30 = vmax.f32 %v1115_v37, 0.0  ;;  %v1118_v48 = vmax.f32 %v1116_v45, 0.0  ;;  %v5161_v37 = vld [vmem:[#allocation6 + $0x2e4] sm:$0xf]  ;;  %v4289_v45 = vld [vmem:[#allocation6 + $0x2e8] sm:$0xf0] }
 0x24a   :  { %1680 = vmatpush.bf16.msra.mxu2 %v4228_v44  ;;  %v4257_v44 = vld [vmem:[#allocation6 + $0x2a8] sm:$0xf0] }
 0x24b   :  { %v1119_v21 = vpack.c.bf16 %v1117_v30, %v1117_v30  ;;  %v1120_v49 = vpack.c.bf16 %v1118_v48, %v1118_v48 }
 0x24d   :  { %1322 = vmatmul.bf16.vlgmr.msrb.gmra.mxu0 %v1119_v21  ;;  %1335 = vmatmul.bf16.vlgmr.msrb.gmra.mxu1 %v1120_v49 }
 0x24e   :  { %1348 = vmatmul.bf16.vlgmr.msrb.gmra.mxu2 %v1119_v21  ;;  %1361 = vmatmul.bf16.vlgmr.msrb.gmra.mxu3 %v1120_v49  ;;  %v4292_v21 = vor.u32 %v5161_v37, %v4289_v45  ;;  %v4215_v49 = vld [vmem:[#allocation6 + $0x250] sm:$0xf]  ;;  %v4196_v45 = vor.u32 %v5137_v59, %v4193_v39 }
 0x250   :  { %1693 = vmatpush.bf16.msra.mxu3 %v4292_v21 }
 0x2ca   :  { %v1323_v23 = vpop.f32.mrf.mxu0  ;;  %v1336_v56 = vpop.f32.mrf.mxu1 }
 0x2cb   :  { %v5844_v50 = vadd.f32 %v1336_v56, %v1323_v23  ;;  %v5144_v23 = vld [vmem:[#allocation6 + $0x254] sm:$0xf0] }
 0x2cd   :  { %v1366_v63 = vrot.slane %v5844_v50, 4  ;;  %v1378_v54 = vmul.f32 %v5844_v50, %v5844_v50 }
 0x2cf   :  { %v1367_v51 = vadd.f32 %v1366_v63, %v5844_v50  ;;  %v1380_v52 = vrot.slane %v1378_v54, 4  ;;  %v4216_v63 = vor.u32 %v5144_v23, %v4215_v49  ;;  %v4247_v49 = vld [vmem:[#allocation6 + $0x290] sm:$0xf]  ;;  %v5152_v23 = vld [vmem:[#allocation6 + $0x294] sm:$0xf0] }
 0x2d1   :  { %v1368_v40 = vrot.slane %v1367_v51, 2  ;;  %v1381_v53 = vadd.f32 %v1380_v52, %v1378_v54  ;;  %v1349_v3 = vpop.f32.mrf.mxu2  ;;  %v1362_v60 = vpop.f32.mrf.mxu3  ;;  %v4279_v54 = vld [vmem:[#allocation6 + $0x2d0] sm:$0xf]  ;;  %1655 = vmatpush.bf16.msra.mxu0 %v4216_v63 }
 0x2d2   :  { %v5850_v17 = vadd.f32 %v1362_v60, %v1349_v3  ;;  %v1325_v55 = vpop.f32.mrf.mxu0  ;;  %v1338_v57 = vpop.f32.mrf.mxu1  ;;  %v5143_v3 = vld [vmem:[#allocation6 + $0x254] sm:$0xf]  ;;  %v4217_v60 = vld [vmem:[#allocation6 + $0x258] sm:$0xf0] }
 0x2d3   :  { %v1369_v58 = vadd.f32 %v1368_v40, %v1367_v51  ;;  %v1382_v61 = vrot.slane %v1381_v53, 2  ;;  %v5160_v51 = vld [vmem:[#allocation6 + $0x2d4] sm:$0xf0]  ;;  %v4220_v57 = vor.u32 %v5143_v3, %v4217_v60  ;;  %v4248_v3 = vor.u32 %v5152_v23, %v4247_v49  ;;  %v4175_v60 = vld [vmem:[#allocation6 + $0x200] sm:$0xf] }
 0x2d4   :  { %v1372_v62 = vrot.slane %v5850_v17, 4  ;;  %v1379_v0 = vmul.f32 %v5850_v17, %v5850_v17 }
 0x2d5   :  { %v1370_v1 = vrot.slane %v1369_v58, 1  ;;  %v1383_v2 = vadd.f32 %v1382_v61, %v1381_v53  ;;  %v4280_v53 = vor.u32 %v5160_v51, %v4279_v54  ;;  %v4281_v61 = vld [vmem:[#allocation6 + $0x2d8] sm:$0xf0]  ;;  %1681 = vmatpush.bf16.msra.mxu2 %v4220_v57  ;;  %v5134_v57 = vld [vmem:[#allocation6 + $0x204] sm:$0xf0] }
 0x2d6   :  { %v1373_v4 = vadd.f32 %v1372_v62, %v5850_v17  ;;  %v1386_v5 = vrot.slane %v1379_v0, 4  ;;  %v4185_v51 = vld [vmem:[#allocation6 + $0x218] sm:$0xf0]  ;;  %v4176_v7 = vor.u32 %v5134_v57, %v4175_v60 }
 0x2d7   :  { %v1371_v8 = vadd.f32 %v1370_v1, %v1369_v58  ;;  %v1384_v9 = vrot.slane %v1383_v2, 1  ;;  %v5159_v58 = vld [vmem:[#allocation6 + $0x2d4] sm:$0xf]  ;;  %1668 = vmatpush.bf16.msra.mxu1 %v4280_v53  ;;  %v4249_v53 = vld [vmem:[#allocation6 + $0x298] sm:$0xf0] }
 0x2d8   :  { %v1374_v13 = vrot.slane %v1373_v4, 2  ;;  %v1387_v14 = vadd.f32 %v1386_v5, %v1379_v0  ;;  %v4284_v1 = vor.u32 %v5159_v58, %v4281_v61  ;;  %v4239_v61 = vld [vmem:[#allocation6 + $0x280] sm:$0xf] }
 0x2d9   :  { %v1385_v19 = vadd.f32 %v1384_v9, %v1383_v2  ;;  %v5856_v20 = vmul.f32 0.125, %v1371_v8  ;;  %v1351_v22 = vpop.f32.mrf.mxu2  ;;  %v1364_v24 = vpop.f32.mrf.mxu3  ;;  %v4207_v2 = vld [vmem:[#allocation6 + $0x240] sm:$0xf]  ;;  %v5141_v8 = vld [vmem:[#allocation6 + $0x244] sm:$0xf] }
 0x2da   :  { %v1375_v28 = vadd.f32 %v1374_v13, %v1373_v4  ;;  %v1388_v31 = vrot.slane %v1387_v14, 2  ;;  %v5142_v4 = vld [vmem:[#allocation6 + $0x244] sm:$0xf0]  ;;  %1694 = vmatpush.bf16.msra.mxu3 %v4284_v1  ;;  %v4273_v13 = vld [vmem:[#allocation6 + $0x2c8] sm:$0xf0]  ;;  %v4200_v24 = vor.u32 %v5140_v18, %v4199_v16 }
 0x2db   :  { %v1394_v36 = vmul.f32 0.125, %v1385_v19  ;;  %v1396_v42 = vmul.f32 %v5856_v20, %v5856_v20  ;;  %v4208_v5 = vor.u32 %v5142_v4, %v4207_v2  ;;  %v4276_v15 = vor.u32 %v5157_v12, %v4273_v13  ;;  %v4263_v19 = vld [vmem:[#allocation6 + $0x2b0] sm:$0xf]  ;;  %1669 = vmatpush.bf16.msra.mxu1 %v4272_v10  ;;  %v5133_v2 = vld [vmem:[#allocation6 + $0x204] sm:$0xf] }
 0x2dc   :  { %v1376_v34 = vrot.slane %v1375_v28, 1  ;;  %v1389_v38 = vadd.f32 %v1388_v31, %v1387_v14  ;;  %v4212_v14 = vor.u32 %v5141_v8, %v4209_v11  ;;  %v4264_v27 = vor.u32 %v5156_v25, %v4263_v19  ;;  %v5155_v31 = vld [vmem:[#allocation6 + $0x2b4] sm:$0xf]  ;;  %v4177_v4 = vld [vmem:[#allocation6 + $0x208] sm:$0xf0] }
 0x2dd   :  { %v1398_v41 = vsub.f32 %v1394_v36, %v1396_v42  ;;  %1656 = vmatpush.bf16.msra.mxu0 %v4208_v5  ;;  %v4268_v36 = vor.u32 %v5155_v31, %v4265_v32  ;;  %v4191_v42 = vld [vmem:[#allocation6 + $0x220] sm:$0xf]  ;;  %v5149_v8 = vld [vmem:[#allocation6 + $0x284] sm:$0xf]  ;;  %v4180_v12 = vor.u32 %v5133_v2, %v4177_v4  ;;  %v4423_v4 = vld [vmem:[#allocation6 + $0x3f0] sm:$0xf] }
 0x2de   :  { %v1377_v30 = vadd.f32 %v1376_v34, %v1375_v28  ;;  %v1390_v48 = vrot.slane %v1389_v38, 1  ;;  %1682 = vmatpush.bf16.msra.mxu2 %v4212_v14  ;;  %v4201_v28 = vld [vmem:[#allocation6 + $0x238] sm:$0xf0]  ;;  %1695 = vmatpush.bf16.msra.mxu3 %v4276_v15  ;;  %v4192_v29 = vor.u32 %v5138_v43, %v4191_v42  ;;  %v4255_v34 = vld [vmem:[#allocation6 + $0x2a0] sm:$0xf] }
 0x2df   :  { %v1400_v56 = vmax.f32 %v1398_v41, 0.0  ;;  %v4204_v35 = vor.u32 %v5139_v26, %v4201_v28  ;;  %1670 = vmatpush.bf16.msra.mxu1 %v4264_v27  ;;  %v5153_v41 = vld [vmem:[#allocation6 + $0x2a4] sm:$0xf] }
 0x2e0   :  { %v1391_v52 = vadd.f32 %v1390_v48, %v1389_v38  ;;  %v5860_v40 = vmul.f32 0.125, %v1377_v30  ;;  %v5154_v38 = vld [vmem:[#allocation6 + $0x2a4] sm:$0xf0]  ;;  %v4183_v30 = vld [vmem:[#allocation6 + $0x210] sm:$0xf]  ;;  %v4260_v21 = vor.u32 %v5153_v41, %v4257_v44 }
 0x2e1   :  { %v5862_v55 = vadd.f32 1e-05, %v1400_v56  ;;  %1657 = vmatpush.bf16.msra.mxu0 %v4200_v24  ;;  %v4256_v37 = vor.u32 %v5154_v38, %v4255_v34  ;;  %v5136_v48 = vld [vmem:[#allocation6 + $0x214] sm:$0xf0]  ;;  %v5135_v56 = vld [vmem:[#allocation6 + $0x214] sm:$0xf] }
 0x2e2   :  { %v1395_v62 = vmul.f32 0.125, %v1391_v52  ;;  %v1397_v0 = vmul.f32 %v5860_v40, %v5860_v40  ;;  %1683 = vmatpush.bf16.msra.mxu2 %v4204_v35  ;;  %1696 = vmatpush.bf16.msra.mxu3 %v4268_v36  ;;  %v4184_v54 = vor.u32 %v5136_v48, %v4183_v30  ;;  %v5151_v52 = vld [vmem:[#allocation6 + $0x294] sm:$0xf]  ;;  %v4188_v58 = vor.u32 %v5135_v56, %v4185_v51  ;;  %v1403_v24 = vld [vmem:[#allocation9 + $0x4] ss:$8 sm:$0x3] }
 0x2e3   :  { %5378 = vrsqrt.f32 %v5862_v55  ;;  %1671 = vmatpush.bf16.msra.mxu1 %v4256_v37  ;;  %v4252_v1 = vor.u32 %v5151_v52, %v4249_v53  ;;  %vm1414_vm0 = vweird.f32 %v5862_v55  ;;  %v1405_v42 = vld [vmem:[#allocation9 + $0x5] ss:$8 sm:$0x3] }
 0x2e4   :  { %v1399_v9 = vsub.f32 %v1395_v62, %v1397_v0  ;;  %v5150_v62 = vld [vmem:[#allocation6 + $0x284] sm:$0xf0] }
 0x2e5   :  { %1658 = vmatpush.bf16.msra.mxu0 %v4192_v29  ;;  %v4240_v10 = vor.u32 %v5150_v62, %v4239_v61  ;;  %v4359_v61 = vld [vmem:[#allocation6 + $0x370] sm:$0xf]  ;;  %v5180_v62 = vld [vmem:[#allocation6 + $0x374] sm:$0xf0] }
 0x2e6   :  { %v1401_v22 = vmax.f32 %v1399_v9, 0.0  ;;  %1684 = vmatpush.bf16.msra.mxu2 %v4196_v45  ;;  %1697 = vmatpush.bf16.msra.mxu3 %v4260_v21  ;;  %v4241_v9 = vld [vmem:[#allocation6 + $0x288] sm:$0xf0]  ;;  %v4360_v2 = vor.u32 %v5180_v62, %v4359_v61 }
 0x2e7   :  { %1672 = vmatpush.bf16.msra.mxu1 %v4248_v3  ;;  %v4244_v13 = vor.u32 %v5149_v8, %v4241_v9  ;;  %v5179_v9 = vld [vmem:[#allocation6 + $0x374] sm:$0xf] }
 0x2e8   :  { %v5867_v33 = vadd.f32 1e-05, %v1401_v22 }
 0x2e9   :  { %v5869_v46 = vpop.eup %5378  ;;  %1659 = vmatpush.bf16.msra.mxu0 %v4184_v54 }
 0x2ea   :  { %v1409_v47 = vmul.f32 %v5869_v46, %v5862_v55  ;;  %5380 = vrsqrt.f32 %v5867_v33  ;;  %1685 = vmatpush.bf16.msra.mxu2 %v4188_v58  ;;  %1698 = vmatpush.bf16.msra.mxu3 %v4252_v1  ;;  %vm1415_vm13 = vweird.f32 %v5869_v46  ;;  %vm1424_vm15 = vweird.f32 %v5867_v33 }
 0x2eb   :  { %1673 = vmatpush.bf16.msra.mxu1 %v4240_v10  ;;  %vm1416_vm3 = vmor %vm1414_vm0, %vm1415_vm13  ;;  %v4361_v10 = vld [vmem:[#allocation6 + $0x378] sm:$0xf0] }
 0x2ec   :  { %v1410_v63 = vmul.f32 %v5869_v46, %v1409_v47 }
 0x2ed   :  { %1660 = vmatpush.bf16.msra.mxu0 %v4176_v7 }
 0x2ee   :  { %v1411_v5 = vmul.f32 0.5, %v1410_v63  ;;  %1686 = vmatpush.bf16.msra.mxu2 %v4180_v12  ;;  %1699 = vmatpush.bf16.msra.mxu3 %v4244_v13  ;;  %v4364_v13 = vor.u32 %v5179_v9, %v4361_v10  ;;  %v4401_v9 = vld [vmem:[#allocation6 + $0x3c8] sm:$0xf0] }
 0x2f0   :  { %v5381_v0 = vpop.eup %5380  ;;  %v1412_v14 = vsub.f32 1.5, %v1411_v5  ;;  %v5196_v5 = vld [vmem:[#allocation6 + $0x3f4] sm:$0xf0] }
 0x2f1   :  { %v1419_v6 = vmul.f32 %v5381_v0, %v5867_v33  ;;  %vm1425_vm11 = vweird.f32 %v5381_v0  ;;  %v4424_v8 = vor.u32 %v5196_v5, %v4423_v4  ;;  %1992 = vmatpush.bf16.msrb.mxu0 %v4360_v2  ;;  %v5173_v4 = vld [vmem:[#allocation6 + $0x344] sm:$0xf]  ;;  %v4337_v5 = vld [vmem:[#allocation6 + $0x348] sm:$0xf0] }
 0x2f2   :  { %v1413_v18 = vmul.f32 %v5869_v46, %v1412_v14  ;;  %vm1426_vm14 = vmor %vm1424_vm15, %vm1425_vm11  ;;  %v5195_v14 = vld [vmem:[#allocation6 + $0x3f4] sm:$0xf]  ;;  %2018 = vmatpush.bf16.msrb.mxu2 %v4364_v13  ;;  %v4391_v13 = vld [vmem:[#allocation6 + $0x3b0] sm:$0xf] }
 0x2f3   :  { %v1420_v11 = vmul.f32 %v5381_v0, %v1419_v6  ;;  %2005 = vmatpush.bf16.msrb.mxu1 %v4424_v8  ;;  %v4340_v8 = vor.u32 %v5173_v4, %v4337_v5  ;;  %v4369_v5 = vld [vmem:[#allocation6 + $0x388] sm:$0xf0] }
 0x2f4   :  { %v1417_v26 = vsel %vm1416_vm3, %v5869_v46, %v1413_v18 }
 0x2f5   :  { %v1421_v15 = vmul.f32 0.5, %v1420_v11 }
 0x2f7   :  { %v1422_v16 = vsub.f32 1.5, %v1421_v15  ;;  %v4425_v15 = vld [vmem:[#allocation6 + $0x3f8] sm:$0xf0] }
 0x2f9   :  { %v1423_v19 = vmul.f32 %v5381_v0, %v1422_v16 }
 0x2fb   :  { %v1427_v22 = vsel %vm1426_vm14, %v5381_v0, %v1423_v19 }
 0x2fc   :  { %v1430_v25 = vrot.slane %v1427_v22, 7 }
 0x2fe   :  { %v1431_v27 = vsel %vm753_vm5, %v1417_v26, %v1430_v25  ;;  %v4351_v25 = vld [vmem:[#allocation6 + $0x360] sm:$0xf]  ;;  %v5178_v26 = vld [vmem:[#allocation6 + $0x364] sm:$0xf0] }
 0x2ff   :  { %v1433_v28 = vmul.f32 %v1431_v27, %v1403_v24  ;;  %v4428_v24 = vor.u32 %v5195_v14, %v4425_v15 }
 0x301   :  { %v1436_v31 = vperm.slane %v1433_v28, 1  ;;  %v1435_v32 = vperm.slane %v1433_v28, 0  ;;  %2031 = vmatpush.bf16.msrb.mxu3 %v4428_v24  ;;  %v4329_v24 = vld [vmem:[#allocation6 + $0x338] sm:$0xf0] }
 0x303   :  { %v1440_v35 = vmul.f32 %v1436_v31, %v5860_v40  ;;  %v1439_v33 = vmul.f32 %v1435_v32, %v5856_v20  ;;  %v1448_v29 = vmul.f32 %v1436_v31, %v5850_v17  ;;  %v1447_v34 = vmul.f32 %v1435_v32, %v5844_v50  ;;  %v4415_v32 = vld [vmem:[#allocation6 + $0x3e0] sm:$0xf] }
 0x304   :  { %v4352_v31 = vor.u32 %v5178_v26, %v4351_v25  ;;  %v5187_v25 = vld [vmem:[#allocation6 + $0x3b4] sm:$0xf]  ;;  %v4393_v26 = vld [vmem:[#allocation6 + $0x3b8] sm:$0xf0] }
 0x305   :  { %v1443_v36 = vrot.slane %v1440_v35, 7  ;;  %v5194_v35 = vld [vmem:[#allocation6 + $0x3e4] sm:$0xf0] }
 0x306   :  { %1993 = vmatpush.bf16.msrb.mxu0 %v4352_v31  ;;  %v4396_v31 = vor.u32 %v5187_v25, %v4393_v26 }
 0x307   :  { %v1444_v43 = vsel %vm753_vm5, %v1439_v33, %v1443_v36  ;;  %v4416_v33 = vor.u32 %v5194_v35, %v4415_v32  ;;  %v4319_v32 = vld [vmem:[#allocation6 + $0x320] sm:$0xf]  ;;  %v5170_v35 = vld [vmem:[#allocation6 + $0x324] sm:$0xf0] }
 0x308   :  { %v1446_v55 = vsub.f32 %v1405_v42, %v1444_v43  ;;  %v5177_v43 = vld [vmem:[#allocation6 + $0x364] sm:$0xf] }
 0x309   :  { %2006 = vmatpush.bf16.msrb.mxu1 %v4416_v33  ;;  %v4383_v33 = vld [vmem:[#allocation6 + $0x3a0] sm:$0xf] }
 0x30a   :  { %v1450_v38 = vperm.slane %v1446_v55, 0  ;;  %v1451_v46 = vperm.slane %v1446_v55, 1  ;;  %v4353_v55 = vld [vmem:[#allocation6 + $0x368] sm:$0xf0] }
 0x30c   :  { %v1454_v59 = vadd.f32 %v1450_v38, %v1447_v34  ;;  %v1455_v47 = vadd.f32 %v1451_v46, %v1448_v29  ;;  %v4356_v38 = vor.u32 %v5177_v43, %v4353_v55  ;;  %v5193_v46 = vld [vmem:[#allocation6 + $0x3e4] sm:$0xf]  ;;  %v5186_v43 = vld [vmem:[#allocation6 + $0x3a4] sm:$0xf0] }
 0x30d   :  { %v5169_v55 = vld [vmem:[#allocation6 + $0x324] sm:$0xf] }
 0x30e   :  { %v1456_v39 = vmax.f32 %v1454_v59, 0.0  ;;  %v1457_v41 = vmax.f32 %v1455_v47, 0.0  ;;  %v4417_v59 = vld [vmem:[#allocation6 + $0x3e8] sm:$0xf0]  ;;  %2019 = vmatpush.bf16.msrb.mxu2 %v4356_v38  ;;  %v5185_v38 = vld [vmem:[#allocation6 + $0x3a4] sm:$0xf] }
 0x310   :  { %v1458_v44 = vpack.c.bf16 %v1456_v39, %v1456_v39  ;;  %v1459_v37 = vpack.c.bf16 %v1457_v41, %v1457_v41  ;;  %v4420_v39 = vor.u32 %v5193_v46, %v4417_v59  ;;  %v4343_v41 = vld [vmem:[#allocation6 + $0x350] sm:$0xf]  ;;  %v4385_v46 = vld [vmem:[#allocation6 + $0x3a8] sm:$0xf0]  ;;  %v4384_v59 = vor.u32 %v5186_v43, %v4383_v33 }
 0x312   :  { %1661 = vmatmul.bf16.vlgmr.msra.gmra.mxu0 %v1458_v44  ;;  %1674 = vmatmul.bf16.vlgmr.msra.gmra.mxu1 %v1459_v37 }
 0x313   :  { %1687 = vmatmul.bf16.vlgmr.msra.gmra.mxu2 %v1458_v44  ;;  %1700 = vmatmul.bf16.vlgmr.msra.gmra.mxu3 %v1459_v37  ;;  %v5176_v44 = vld [vmem:[#allocation6 + $0x354] sm:$0xf0]  ;;  %v4407_v37 = vld [vmem:[#allocation6 + $0x3d0] sm:$0xf] }
 0x314   :  { %2032 = vmatpush.bf16.msrb.mxu3 %v4420_v39  ;;  %v4388_v39 = vor.u32 %v5185_v38, %v4385_v46 }
 0x38f   :  { %v1662_v20 = vpop.f32.mrf.mxu0  ;;  %v1675_v40 = vpop.f32.mrf.mxu1 }
 0x390   :  { %v5887_v45 = vadd.f32 %v1675_v40, %v1662_v20 }
 0x392   :  { %v1705_v17 = vrot.slane %v5887_v45, 4  ;;  %v1717_v50 = vmul.f32 %v5887_v45, %v5887_v45 }
 0x394   :  { %v1706_v30 = vadd.f32 %v1705_v17, %v5887_v45  ;;  %v1719_v48 = vrot.slane %v1717_v50, 4  ;;  %v4344_v17 = vor.u32 %v5176_v44, %v4343_v41  ;;  %v4311_v41 = vld [vmem:[#allocation6 + $0x310] sm:$0xf]  ;;  %v5168_v44 = vld [vmem:[#allocation6 + $0x314] sm:$0xf0] }
 0x396   :  { %v1707_v21 = vrot.slane %v1706_v30, 2  ;;  %v1720_v49 = vadd.f32 %v1719_v48, %v1717_v50  ;;  %v1688_v23 = vpop.f32.mrf.mxu2  ;;  %v1701_v56 = vpop.f32.mrf.mxu3  ;;  %v5192_v50 = vld [vmem:[#allocation6 + $0x3d4] sm:$0xf0]  ;;  %1994 = vmatpush.bf16.msrb.mxu0 %v4344_v17  ;;  %v5167_v17 = vld [vmem:[#allocation6 + $0x314] sm:$0xf] }
 0x397   :  { %v5893_v63 = vadd.f32 %v1701_v56, %v1688_v23  ;;  %v1664_v54 = vpop.f32.mrf.mxu0  ;;  %v1677_v51 = vpop.f32.mrf.mxu1  ;;  %v5191_v23 = vld [vmem:[#allocation6 + $0x3d4] sm:$0xf] }
 0x398   :  { %v1708_v52 = vadd.f32 %v1707_v21, %v1706_v30  ;;  %v1721_v53 = vrot.slane %v1720_v49, 2  ;;  %v5175_v30 = vld [vmem:[#allocation6 + $0x354] sm:$0xf]  ;;  %v4408_v21 = vor.u32 %v5192_v50, %v4407_v37  ;;  %v4312_v37 = vor.u32 %v5168_v44, %v4311_v41 }
 0x399   :  { %v1711_v3 = vrot.slane %v5893_v63, 4  ;;  %v1718_v60 = vmul.f32 %v5893_v63, %v5893_v63 }
 0x39a   :  { %v1709_v57 = vrot.slane %v1708_v52, 1  ;;  %v1722_v58 = vadd.f32 %v1721_v53, %v1720_v49  ;;  %v4345_v49 = vld [vmem:[#allocation6 + $0x358] sm:$0xf0]  ;;  %2007 = vmatpush.bf16.msrb.mxu1 %v4408_v21  ;;  %v5183_v21 = vld [vmem:[#allocation6 + $0x394] sm:$0xf] }
 0x39b   :  { %v1712_v0 = vadd.f32 %v1711_v3, %v5893_v63  ;;  %v1725_v1 = vrot.slane %v1718_v60, 4  ;;  %v4348_v51 = vor.u32 %v5175_v30, %v4345_v49  ;;  %v4377_v49 = vld [vmem:[#allocation6 + $0x398] sm:$0xf0] }
 0x39c   :  { %v1710_v6 = vadd.f32 %v1709_v57, %v1708_v52  ;;  %v1723_v7 = vrot.slane %v1722_v58, 1  ;;  %v4409_v52 = vld [vmem:[#allocation6 + $0x3d8] sm:$0xf0]  ;;  %v5174_v57 = vld [vmem:[#allocation6 + $0x344] sm:$0xf0] }
 0x39d   :  { %v1713_v11 = vrot.slane %v1712_v0, 2  ;;  %v1726_v12 = vadd.f32 %v1725_v1, %v1718_v60  ;;  %v4412_v3 = vor.u32 %v5191_v23, %v4409_v52  ;;  %v4335_v60 = vld [vmem:[#allocation6 + $0x340] sm:$0xf]  ;;  %2020 = vmatpush.bf16.msrb.mxu2 %v4348_v51  ;;  %v5190_v1 = vld [vmem:[#allocation6 + $0x3c4] sm:$0xf0]  ;;  %v4380_v52 = vor.u32 %v5183_v21, %v4377_v49 }
 0x39e   :  { %v1724_v16 = vadd.f32 %v1723_v7, %v1722_v58  ;;  %v5899_v18 = vmul.f32 0.125, %v1710_v6  ;;  %v1690_v19 = vpop.f32.mrf.mxu2  ;;  %v1703_v22 = vpop.f32.mrf.mxu3  ;;  %v4336_v62 = vor.u32 %v5174_v57, %v4335_v60  ;;  %v5189_v6 = vld [vmem:[#allocation6 + $0x3c4] sm:$0xf]  ;;  %v5166_v51 = vld [vmem:[#allocation6 + $0x304] sm:$0xf0] }
 0x39f   :  { %v1714_v27 = vadd.f32 %v1713_v11, %v1712_v0  ;;  %v1727_v28 = vrot.slane %v1726_v12, 2  ;;  %v4399_v0 = vld [vmem:[#allocation6 + $0x3c0] sm:$0xf]  ;;  %2033 = vmatpush.bf16.msrb.mxu3 %v4412_v3  ;;  %v4404_v10 = vor.u32 %v5189_v6, %v4401_v9  ;;  %v4327_v11 = vld [vmem:[#allocation6 + $0x330] sm:$0xf] }
 0x3a0   :  { %v1733_v36 = vmul.f32 0.125, %v1724_v16  ;;  %v1735_v42 = vmul.f32 %v5899_v18, %v5899_v18  ;;  %v4400_v2 = vor.u32 %v5190_v1, %v4399_v0  ;;  %1995 = vmatpush.bf16.msrb.mxu0 %v4336_v62  ;;  %v5188_v16 = vld [vmem:[#allocation6 + $0x3b4] sm:$0xf0]  ;;  %v5171_v19 = vld [vmem:[#allocation6 + $0x334] sm:$0xf] }
 0x3a1   :  { %v1715_v29 = vrot.slane %v1714_v27, 1  ;;  %v1728_v34 = vadd.f32 %v1727_v28, %v1726_v12  ;;  %v5172_v12 = vld [vmem:[#allocation6 + $0x334] sm:$0xf0]  ;;  %2021 = vmatpush.bf16.msrb.mxu2 %v4340_v8  ;;  %v4392_v22 = vor.u32 %v5188_v16, %v4391_v13  ;;  %v4332_v28 = vor.u32 %v5171_v19, %v4329_v24  ;;  %v4367_v3 = vld [vmem:[#allocation6 + $0x380] sm:$0xf] }
 0x3a2   :  { %v1737_v47 = vsub.f32 %v1733_v36, %v1735_v42  ;;  %2008 = vmatpush.bf16.msrb.mxu1 %v4400_v2  ;;  %v4328_v15 = vor.u32 %v5172_v12, %v4327_v11  ;;  %v4320_v42 = vor.u32 %v5170_v35, %v4319_v32  ;;  %v5182_v60 = vld [vmem:[#allocation6 + $0x384] sm:$0xf0]  ;;  %v5165_v57 = vld [vmem:[#allocation6 + $0x304] sm:$0xf]  ;;  %v4305_v62 = vld [vmem:[#allocation6 + $0x308] sm:$0xf0] }
 0x3a3   :  { %v1716_v20 = vadd.f32 %v1715_v29, %v1714_v27  ;;  %v1729_v40 = vrot.slane %v1728_v34, 1  ;;  %2034 = vmatpush.bf16.msrb.mxu3 %v4404_v10  ;;  %v5181_v0 = vld [vmem:[#allocation6 + $0x384] sm:$0xf]  ;;  %v4368_v4 = vor.u32 %v5182_v60, %v4367_v3  ;;  %v4308_v6 = vor.u32 %v5165_v57, %v4305_v62  ;;  %v4551_v57 = vld [vmem:[#allocation6 + $0x4f0] sm:$0xf] }
 0x3a4   :  { %v1739_v48 = vmax.f32 %v1737_v47, 0.0  ;;  %1996 = vmatpush.bf16.msrb.mxu0 %v4328_v15  ;;  %v4372_v8 = vor.u32 %v5181_v0, %v4369_v5  ;;  %v1742_v15 = vld [vmem:[#allocation9 + $0x6] ss:$8 sm:$0x3] }
 0x3a5   :  { %v1730_v56 = vadd.f32 %v1729_v40, %v1728_v34  ;;  %v5903_v54 = vmul.f32 0.125, %v1716_v20  ;;  %2022 = vmatpush.bf16.msrb.mxu2 %v4332_v28  ;;  %v4321_v34 = vld [vmem:[#allocation6 + $0x328] sm:$0xf0]  ;;  %v4375_v20 = vld [vmem:[#allocation6 + $0x390] sm:$0xf] }
 0x3a6   :  { %v5905_v53 = vadd.f32 1e-05, %v1739_v48  ;;  %2009 = vmatpush.bf16.msrb.mxu1 %v4392_v22  ;;  %v4324_v47 = vor.u32 %v5169_v55, %v4321_v34  ;;  %v5184_v40 = vld [vmem:[#allocation6 + $0x394] sm:$0xf0]  ;;  %v4313_v48 = vld [vmem:[#allocation6 + $0x318] sm:$0xf0] }
 0x3a7   :  { %v1734_v58 = vmul.f32 0.125, %v1730_v56  ;;  %v1736_v61 = vmul.f32 %v5903_v54, %v5903_v54  ;;  %2035 = vmatpush.bf16.msrb.mxu3 %v4396_v31  ;;  %v4376_v30 = vor.u32 %v5184_v40, %v4375_v20  ;;  %v4316_v23 = vor.u32 %v5167_v17, %v4313_v48  ;;  %v4303_v56 = vld [vmem:[#allocation6 + $0x300] sm:$0xf]  ;;  %v1744_v32 = vld [vmem:[#allocation9 + $0x7] ss:$8 sm:$0x3] }
 0x3a8   :  { %5382 = vrsqrt.f32 %v5905_v53  ;;  %1997 = vmatpush.bf16.msrb.mxu0 %v4320_v42  ;;  %vm1753_vm8 = vweird.f32 %v5905_v53 }
 0x3a9   :  { %v1738_v7 = vsub.f32 %v1734_v58, %v1736_v61  ;;  %2023 = vmatpush.bf16.msrb.mxu2 %v4324_v47  ;;  %v4304_v61 = vor.u32 %v5166_v51, %v4303_v56  ;;  %v4487_v56 = vld [vmem:[#allocation6 + $0x470] sm:$0xf]  ;;  %v5212_v51 = vld [vmem:[#allocation6 + $0x474] sm:$0xf0] }
 0x3aa   :  { %2010 = vmatpush.bf16.msrb.mxu1 %v4384_v59  ;;  %v4488_v60 = vor.u32 %v5212_v51, %v4487_v56 }
 0x3ab   :  { %v1740_v14 = vmax.f32 %v1738_v7, 0.0  ;;  %2036 = vmatpush.bf16.msrb.mxu3 %v4388_v39 }
 0x3ac   :  { %1998 = vmatpush.bf16.msrb.mxu0 %v4312_v37 }
 0x3ad   :  { %v5910_v27 = vadd.f32 1e-05, %v1740_v14  ;;  %2024 = vmatpush.bf16.msrb.mxu2 %v4316_v23 }
 0x3ae   :  { %v5912_v36 = vpop.eup %5382  ;;  %2011 = vmatpush.bf16.msrb.mxu1 %v4376_v30 }
 0x3af   :  { %v1748_v29 = vmul.f32 %v5912_v36, %v5905_v53  ;;  %5384 = vrsqrt.f32 %v5910_v27  ;;  %2037 = vmatpush.bf16.msrb.mxu3 %v4380_v52  ;;  %vm1754_vm4 = vweird.f32 %v5912_v36  ;;  %vm1763_vm6 = vweird.f32 %v5910_v27 }
 0x3b0   :  { %1999 = vmatpush.bf16.msrb.mxu0 %v4304_v61  ;;  %vm1755_vm2 = vmor %vm1753_vm8, %vm1754_vm4 }
 0x3b1   :  { %v1749_v50 = vmul.f32 %v5912_v36, %v1748_v29  ;;  %2025 = vmatpush.bf16.msrb.mxu2 %v4308_v6 }
 0x3b2   :  { %2012 = vmatpush.bf16.msrb.mxu1 %v4368_v4 }
 0x3b3   :  { %v1750_v1 = vmul.f32 0.5, %v1749_v50  ;;  %2038 = vmatpush.bf16.msrb.mxu3 %v4372_v8  ;;  %v4553_v8 = vld [vmem:[#allocation6 + $0x4f8] sm:$0xf0] }
 0x3b4   :  { %2331 = vmatpush.bf16.msra.mxu0 %v4488_v60 }
 0x3b5   :  { %v5385_v58 = vpop.eup %5384  ;;  %v1751_v9 = vsub.f32 1.5, %v1750_v1  ;;  %v5211_v1 = vld [vmem:[#allocation6 + $0x474] sm:$0xf] }
 0x3b6   :  { %v1758_v2 = vmul.f32 %v5385_v58, %v5910_v27  ;;  %vm1764_vm12 = vweird.f32 %v5385_v58 }
 0x3b7   :  { %v1752_v12 = vmul.f32 %v5912_v36, %v1751_v9  ;;  %vm1765_vm1 = vmor %vm1763_vm6, %vm1764_vm12 }
 0x3b8   :  { %v1759_v7 = vmul.f32 %v5385_v58, %v1758_v2  ;;  %v4489_v2 = vld [vmem:[#allocation6 + $0x478] sm:$0xf0] }
 0x3b9   :  { %v1756_v19 = vsel %vm1755_vm2, %v5912_v36, %v1752_v12  ;;  %v4492_v6 = vor.u32 %v5211_v1, %v4489_v2  ;;  %v4479_v12 = vld [vmem:[#allocation6 + $0x460] sm:$0xf]  ;;  %v5221_v1 = vld [vmem:[#allocation6 + $0x4c4] sm:$0xf]  ;;  %v4529_v2 = vld [vmem:[#allocation6 + $0x4c8] sm:$0xf0] }
 0x3ba   :  { %v1760_v10 = vmul.f32 0.5, %v1759_v7  ;;  %v5227_v7 = vld [vmem:[#allocation6 + $0x4f4] sm:$0xf] }
 0x3bb   :  { %2357 = vmatpush.bf16.msra.mxu2 %v4492_v6  ;;  %v4455_v6 = vld [vmem:[#allocation6 + $0x430] sm:$0xf] }
 0x3bc   :  { %v1761_v11 = vsub.f32 1.5, %v1760_v10 }
 0x3be   :  { %v1762_v13 = vmul.f32 %v5385_v58, %v1761_v11  ;;  %v4556_v11 = vor.u32 %v5227_v7, %v4553_v8  ;;  %v5204_v7 = vld [vmem:[#allocation6 + $0x434] sm:$0xf0]  ;;  %v4519_v8 = vld [vmem:[#allocation6 + $0x4b0] sm:$0xf] }
 0x3c0   :  { %v1766_v14 = vsel %vm1765_vm1, %v5385_v58, %v1762_v13  ;;  %v5228_v58 = vld [vmem:[#allocation6 + $0x4f4] sm:$0xf0]  ;;  %v5210_v13 = vld [vmem:[#allocation6 + $0x464] sm:$0xf0]  ;;  %2370 = vmatpush.bf16.msra.mxu3 %v4556_v11  ;;  %v5203_v11 = vld [vmem:[#allocation6 + $0x434] sm:$0xf] }
 0x3c1   :  { %v1769_v16 = vrot.slane %v1766_v14, 7  ;;  %v4552_v0 = vor.u32 %v5228_v58, %v4551_v57 }
 0x3c3   :  { %v1770_v22 = vsel %vm753_vm5, %v1756_v19, %v1769_v16  ;;  %2344 = vmatpush.bf16.msra.mxu1 %v4552_v0 }
 0x3c4   :  { %v1772_v24 = vmul.f32 %v1770_v22, %v1742_v15  ;;  %v4480_v22 = vor.u32 %v5210_v13, %v4479_v12  ;;  %v4457_v12 = vld [vmem:[#allocation6 + $0x438] sm:$0xf0] }
 0x3c6   :  { %v1775_v25 = vperm.slane %v1772_v24, 1  ;;  %v1774_v26 = vperm.slane %v1772_v24, 0  ;;  %v4543_v24 = vld [vmem:[#allocation6 + $0x4e0] sm:$0xf]  ;;  %2332 = vmatpush.bf16.msra.mxu0 %v4480_v22  ;;  %v4521_v22 = vld [vmem:[#allocation6 + $0x4b8] sm:$0xf0] }
 0x3c8   :  { %v1779_v28 = vmul.f32 %v1775_v25, %v5903_v54  ;;  %v1778_v27 = vmul.f32 %v1774_v26, %v5899_v18  ;;  %v1787_v42 = vmul.f32 %v1775_v25, %v5893_v63  ;;  %v1786_v33 = vmul.f32 %v1774_v26, %v5887_v45  ;;  %v5226_v25 = vld [vmem:[#allocation6 + $0x4e4] sm:$0xf0] }
 0x3ca   :  { %v1782_v31 = vrot.slane %v1779_v28, 7 }
 0x3cc   :  { %v1783_v35 = vsel %vm753_vm5, %v1778_v27, %v1782_v31  ;;  %v4544_v31 = vor.u32 %v5226_v25, %v4543_v24  ;;  %v4481_v27 = vld [vmem:[#allocation6 + $0x468] sm:$0xf0]  ;;  %v4447_v25 = vld [vmem:[#allocation6 + $0x420] sm:$0xf] }
 0x3cd   :  { %v1785_v53 = vsub.f32 %v1744_v32, %v1783_v35  ;;  %v5209_v32 = vld [vmem:[#allocation6 + $0x464] sm:$0xf] }
 0x3ce   :  { %2345 = vmatpush.bf16.msra.mxu1 %v4544_v31 }
 0x3cf   :  { %v1789_v43 = vperm.slane %v1785_v53, 0  ;;  %v1790_v36 = vperm.slane %v1785_v53, 1 }
 0x3d1   :  { %v1793_v55 = vadd.f32 %v1789_v43, %v1786_v33  ;;  %v1794_v29 = vadd.f32 %v1790_v36, %v1787_v42  ;;  %v4484_v42 = vor.u32 %v5209_v32, %v4481_v27  ;;  %v5225_v33 = vld [vmem:[#allocation6 + $0x4e4] sm:$0xf]  ;;  %v4545_v43 = vld [vmem:[#allocation6 + $0x4e8] sm:$0xf0]  ;;  %v5218_v27 = vld [vmem:[#allocation6 + $0x4a4] sm:$0xf0] }
 0x3d3   :  { %v1795_v34 = vmax.f32 %v1793_v55, 0.0  ;;  %v1796_v38 = vmax.f32 %v1794_v29, 0.0  ;;  %v4548_v29 = vor.u32 %v5225_v33, %v4545_v43  ;;  %2358 = vmatpush.bf16.msra.mxu2 %v4484_v42  ;;  %v4449_v33 = vld [vmem:[#allocation6 + $0x428] sm:$0xf0]  ;;  %v5217_v43 = vld [vmem:[#allocation6 + $0x4a4] sm:$0xf] }
 0x3d5   :  { %v1797_v46 = vpack.c.bf16 %v1795_v34, %v1795_v34  ;;  %v1798_v59 = vpack.c.bf16 %v1796_v38, %v1796_v38  ;;  %v4471_v34 = vld [vmem:[#allocation6 + $0x450] sm:$0xf]  ;;  %v5208_v38 = vld [vmem:[#allocation6 + $0x454] sm:$0xf0]  ;;  %2371 = vmatpush.bf16.msra.mxu3 %v4548_v29 }
 0x3d6   :  { %v4439_v29 = vld [vmem:[#allocation6 + $0x410] sm:$0xf] }
 0x3d7   :  { %2000 = vmatmul.bf16.vlgmr.msrb.gmra.mxu0 %v1797_v46  ;;  %2013 = vmatmul.bf16.vlgmr.msrb.gmra.mxu1 %v1798_v59 }
 0x3d8   :  { %2026 = vmatmul.bf16.vlgmr.msrb.gmra.mxu2 %v1797_v46  ;;  %2039 = vmatmul.bf16.vlgmr.msrb.gmra.mxu3 %v1798_v59  ;;  %v4472_v59 = vor.u32 %v5208_v38, %v4471_v34  ;;  %v5200_v34 = vld [vmem:[#allocation6 + $0x414] sm:$0xf0]  ;;  %v4503_v38 = vld [vmem:[#allocation6 + $0x490] sm:$0xf] }
 0x3da   :  { %2333 = vmatpush.bf16.msra.mxu0 %v4472_v59 }
 0x454   :  { %v2001_v18 = vpop.f32.mrf.mxu0  ;;  %v2014_v54 = vpop.f32.mrf.mxu1 }
 0x455   :  { %v5930_v47 = vadd.f32 %v2014_v54, %v2001_v18  ;;  %v4535_v18 = vld [vmem:[#allocation6 + $0x4d0] sm:$0xf]  ;;  %v5224_v54 = vld [vmem:[#allocation6 + $0x4d4] sm:$0xf0] }
 0x457   :  { %v2044_v63 = vrot.slane %v5930_v47, 4  ;;  %v2056_v45 = vmul.f32 %v5930_v47, %v5930_v47 }
 0x459   :  { %v2045_v39 = vadd.f32 %v2044_v63, %v5930_v47  ;;  %v2058_v41 = vrot.slane %v2056_v45, 4  ;;  %v5207_v63 = vld [vmem:[#allocation6 + $0x454] sm:$0xf] }
 0x45b   :  { %v2046_v44 = vrot.slane %v2045_v39, 2  ;;  %v2059_v37 = vadd.f32 %v2058_v41, %v2056_v45  ;;  %v2027_v20 = vpop.f32.mrf.mxu2  ;;  %v2040_v40 = vpop.f32.mrf.mxu3  ;;  %v4536_v41 = vor.u32 %v5224_v54, %v4535_v18  ;;  %v4440_v18 = vor.u32 %v5200_v34, %v4439_v29  ;;  %v5216_v54 = vld [vmem:[#allocation6 + $0x494] sm:$0xf0] }
 0x45c   :  { %v5936_v17 = vadd.f32 %v2040_v40, %v2027_v20  ;;  %v2003_v50 = vpop.f32.mrf.mxu0  ;;  %v2016_v30 = vpop.f32.mrf.mxu1 }
 0x45d   :  { %v2047_v48 = vadd.f32 %v2046_v44, %v2045_v39  ;;  %v2060_v21 = vrot.slane %v2059_v37, 2  ;;  %v4473_v44 = vld [vmem:[#allocation6 + $0x458] sm:$0xf0]  ;;  %2346 = vmatpush.bf16.msra.mxu1 %v4536_v41  ;;  %v5215_v41 = vld [vmem:[#allocation6 + $0x494] sm:$0xf] }
 0x45e   :  { %v2050_v49 = vrot.slane %v5936_v17, 4  ;;  %v2057_v23 = vmul.f32 %v5936_v17, %v5936_v17  ;;  %v4476_v40 = vor.u32 %v5207_v63, %v4473_v44  ;;  %v4537_v50 = vld [vmem:[#allocation6 + $0x4d8] sm:$0xf0]  ;;  %v5199_v63 = vld [vmem:[#allocation6 + $0x414] sm:$0xf] }
 0x45f   :  { %v2048_v52 = vrot.slane %v2047_v48, 1  ;;  %v2061_v3 = vadd.f32 %v2060_v21, %v2059_v37  ;;  %v5223_v37 = vld [vmem:[#allocation6 + $0x4d4] sm:$0xf]  ;;  %v4505_v44 = vld [vmem:[#allocation6 + $0x498] sm:$0xf0] }
 0x460   :  { %v2051_v61 = vadd.f32 %v2050_v49, %v5936_v17  ;;  %v2064_v62 = vrot.slane %v2057_v23, 4  ;;  %v4540_v21 = vor.u32 %v5223_v37, %v4537_v50  ;;  %v4463_v49 = vld [vmem:[#allocation6 + $0x440] sm:$0xf]  ;;  %2359 = vmatpush.bf16.msra.mxu2 %v4476_v40  ;;  %v5198_v50 = vld [vmem:[#allocation6 + $0x404] sm:$0xf0] }
 0x461   :  { %v2049_v4 = vadd.f32 %v2048_v52, %v2047_v48  ;;  %v2062_v5 = vrot.slane %v2061_v3, 1  ;;  %v4527_v52 = vld [vmem:[#allocation6 + $0x4c0] sm:$0xf] }
 0x462   :  { %v2052_v9 = vrot.slane %v2051_v61, 2  ;;  %v2065_v10 = vadd.f32 %v2064_v62, %v2057_v23  ;;  %v5206_v23 = vld [vmem:[#allocation6 + $0x444] sm:$0xf0]  ;;  %2372 = vmatpush.bf16.msra.mxu3 %v4540_v21  ;;  %v4465_v62 = vld [vmem:[#allocation6 + $0x448] sm:$0xf0]  ;;  %v4508_v21 = vor.u32 %v5215_v41, %v4505_v44 }
 0x463   :  { %v2063_v14 = vadd.f32 %v2062_v5, %v2061_v3  ;;  %v5942_v15 = vmul.f32 0.125, %v2049_v4  ;;  %v2029_v16 = vpop.f32.mrf.mxu2  ;;  %v2042_v19 = vpop.f32.mrf.mxu3  ;;  %v4464_v51 = vor.u32 %v5206_v23, %v4463_v49  ;;  %v5222_v3 = vld [vmem:[#allocation6 + $0x4c4] sm:$0xf0]  ;;  %v4532_v5 = vor.u32 %v5221_v1, %v4529_v2  ;;  %v4431_v40 = vld [vmem:[#allocation6 + $0x400] sm:$0xf] }
 0x464   :  { %v2053_v26 = vadd.f32 %v2052_v9, %v2051_v61  ;;  %v2066_v28 = vrot.slane %v2065_v10, 2  ;;  %v4528_v58 = vor.u32 %v5222_v3, %v4527_v52  ;;  %v5205_v61 = vld [vmem:[#allocation6 + $0x444] sm:$0xf]  ;;  %v4456_v9 = vor.u32 %v5204_v7, %v4455_v6  ;;  %v5219_v19 = vld [vmem:[#allocation6 + $0x4b4] sm:$0xf] }
 0x465   :  { %v2072_v35 = vmul.f32 0.125, %v2063_v14  ;;  %v2074_v53 = vmul.f32 %v5942_v15, %v5942_v15  ;;  %2334 = vmatpush.bf16.msra.mxu0 %v4464_v51  ;;  %v4468_v0 = vor.u32 %v5205_v61, %v4465_v62  ;;  %v4460_v16 = vor.u32 %v5203_v11, %v4457_v12  ;;  %v5214_v49 = vld [vmem:[#allocation6 + $0x484] sm:$0xf0]  ;;  %v5197_v23 = vld [vmem:[#allocation6 + $0x404] sm:$0xf] }
 0x466   :  { %v2054_v36 = vrot.slane %v2053_v26, 1  ;;  %v2067_v55 = vadd.f32 %v2066_v28, %v2065_v10  ;;  %2347 = vmatpush.bf16.msra.mxu1 %v4528_v58  ;;  %v5220_v10 = vld [vmem:[#allocation6 + $0x4b4] sm:$0xf0]  ;;  %2373 = vmatpush.bf16.msra.mxu3 %v4532_v5  ;;  %v4524_v24 = vor.u32 %v5219_v19, %v4521_v22  ;;  %v4511_v28 = vld [vmem:[#allocation6 + $0x4a0] sm:$0xf]  ;;  %v4432_v51 = vor.u32 %v5198_v50, %v4431_v40 }
 0x467   :  { %v2076_v46 = vsub.f32 %v2072_v35, %v2074_v53  ;;  %2360 = vmatpush.bf16.msra.mxu2 %v4468_v0  ;;  %v4520_v14 = vor.u32 %v5220_v10, %v4519_v8  ;;  %v5201_v35 = vld [vmem:[#allocation6 + $0x424] sm:$0xf]  ;;  %v4512_v42 = vor.u32 %v5218_v27, %v4511_v28  ;;  %v4433_v52 = vld [vmem:[#allocation6 + $0x408] sm:$0xf0] }
 0x468   :  { %v2055_v45 = vadd.f32 %v2054_v36, %v2053_v26  ;;  %v2068_v39 = vrot.slane %v2067_v55, 1  ;;  %v5202_v26 = vld [vmem:[#allocation6 + $0x424] sm:$0xf0]  ;;  %v4513_v36 = vld [vmem:[#allocation6 + $0x4a8] sm:$0xf0]  ;;  %v4436_v0 = vor.u32 %v5197_v23, %v4433_v52 }
 0x469   :  { %v2078_v20 = vmax.f32 %v2076_v46, 0.0  ;;  %2335 = vmatpush.bf16.msra.mxu0 %v4456_v9  ;;  %v4448_v32 = vor.u32 %v5202_v26, %v4447_v25  ;;  %v4452_v46 = vor.u32 %v5201_v35, %v4449_v33  ;;  %v4516_v59 = vor.u32 %v5217_v43, %v4513_v36  ;;  %v5213_v3 = vld [vmem:[#allocation6 + $0x484] sm:$0xf]  ;;  %v2081_v10 = vld [vmem:[#allocation9 + $0x10] ss:$8 sm:$0x3] }
 0x46a   :  { %v2069_v30 = vadd.f32 %v2068_v39, %v2067_v55  ;;  %v5946_v48 = vmul.f32 0.125, %v2055_v45  ;;  %2348 = vmatpush.bf16.msra.mxu1 %v4520_v14  ;;  %2374 = vmatpush.bf16.msra.mxu3 %v4524_v24  ;;  %v4504_v45 = vor.u32 %v5216_v54, %v4503_v38  ;;  %v4441_v39 = vld [vmem:[#allocation6 + $0x418] sm:$0xf0]  ;;  %v2083_v25 = vld [vmem:[#allocation9 + $0x11] ss:$8 sm:$0x3] }
 0x46b   :  { %v5948_v56 = vadd.f32 1e-05, %v2078_v20  ;;  %2361 = vmatpush.bf16.msra.mxu2 %v4460_v16  ;;  %v4444_v20 = vor.u32 %v5199_v63, %v4441_v39 }
 0x46c   :  { %v2073_v60 = vmul.f32 0.125, %v2069_v30  ;;  %v2075_v57 = vmul.f32 %v5946_v48, %v5946_v48  ;;  %v4495_v30 = vld [vmem:[#allocation6 + $0x480] sm:$0xf] }
 0x46d   :  { %5386 = vrsqrt.f32 %v5948_v56  ;;  %2336 = vmatpush.bf16.msra.mxu0 %v4448_v32  ;;  %v4496_v58 = vor.u32 %v5214_v49, %v4495_v30  ;;  %vm2092_vm13 = vweird.f32 %v5948_v56  ;;  %v5260_v49 = vld [vmem:[#allocation6 + $0x5f4] sm:$0xf0] }
 0x46e   :  { %v2077_v4 = vsub.f32 %v2073_v60, %v2075_v57  ;;  %2349 = vmatpush.bf16.msra.mxu1 %v4512_v42  ;;  %2375 = vmatpush.bf16.msra.mxu3 %v4516_v59  ;;  %v4497_v60 = vld [vmem:[#allocation6 + $0x488] sm:$0xf0] }
 0x46f   :  { %2362 = vmatpush.bf16.msra.mxu2 %v4452_v46  ;;  %v4500_v1 = vor.u32 %v5213_v3, %v4497_v60  ;;  %v5243_v3 = vld [vmem:[#allocation6 + $0x574] sm:$0xf]  ;;  %v4617_v60 = vld [vmem:[#allocation6 + $0x578] sm:$0xf0] }
 0x470   :  { %v2079_v13 = vmax.f32 %v2077_v4, 0.0 }
 0x471   :  { %2337 = vmatpush.bf16.msra.mxu0 %v4440_v18 }
 0x472   :  { %v5953_v31 = vadd.f32 1e-05, %v2079_v13  ;;  %2350 = vmatpush.bf16.msra.mxu1 %v4504_v45  ;;  %2376 = vmatpush.bf16.msra.mxu3 %v4508_v21  ;;  %v4679_v21 = vld [vmem:[#allocation6 + $0x5f0] sm:$0xf] }
 0x473   :  { %v5955_v53 = vpop.eup %5386  ;;  %2363 = vmatpush.bf16.msra.mxu2 %v4444_v20  ;;  %v5244_v20 = vld [vmem:[#allocation6 + $0x574] sm:$0xf0]  ;;  %v4680_v52 = vor.u32 %v5260_v49, %v4679_v21 }
 0x474   :  { %v2087_v55 = vmul.f32 %v5955_v53, %v5948_v56  ;;  %5388 = vrsqrt.f32 %v5953_v31  ;;  %vm2093_vm9 = vweird.f32 %v5955_v53  ;;  %vm2102_vm10 = vweird.f32 %v5953_v31 }
 0x475   :  { %2338 = vmatpush.bf16.msra.mxu0 %v4432_v51  ;;  %vm2094_vm15 = vmor %vm2092_vm13, %vm2093_vm9 }
 0x476   :  { %v2088_v37 = vmul.f32 %v5955_v53, %v2087_v55  ;;  %2351 = vmatpush.bf16.msra.mxu1 %v4496_v58  ;;  %2377 = vmatpush.bf16.msra.mxu3 %v4500_v1 }
 0x477   :  { %2364 = vmatpush.bf16.msra.mxu2 %v4436_v0  ;;  %v4681_v0 = vld [vmem:[#allocation6 + $0x5f8] sm:$0xf0] }
 0x478   :  { %v2089_v61 = vmul.f32 0.5, %v2088_v37  ;;  %v4615_v37 = vld [vmem:[#allocation6 + $0x570] sm:$0xf] }
 0x479   :  { %v4616_v30 = vor.u32 %v5244_v20, %v4615_v37 }
 0x47a   :  { %v5389_v57 = vpop.eup %5388  ;;  %v2090_v4 = vsub.f32 1.5, %v2089_v61  ;;  %v4620_v61 = vor.u32 %v5243_v3, %v4617_v60  ;;  %2683 = vmatpush.bf16.msrb.mxu1 %v4680_v52 }
 0x47b   :  { %v2097_v62 = vmul.f32 %v5389_v57, %v5953_v31  ;;  %vm2103_vm7 = vweird.f32 %v5389_v57  ;;  %2670 = vmatpush.bf16.msrb.mxu0 %v4616_v30  ;;  %v5254_v30 = vld [vmem:[#allocation6 + $0x5c4] sm:$0xf0] }
 0x47c   :  { %v2091_v7 = vmul.f32 %v5955_v53, %v2090_v4  ;;  %vm2104_vm11 = vmor %vm2102_vm10, %vm2103_vm7  ;;  %2696 = vmatpush.bf16.msrb.mxu2 %v4620_v61 }
 0x47d   :  { %v2098_v2 = vmul.f32 %v5389_v57, %v2097_v62  ;;  %v5259_v62 = vld [vmem:[#allocation6 + $0x5f4] sm:$0xf] }
 0x47e   :  { %v2095_v12 = vsel %vm2094_vm15, %v5955_v53, %v2091_v7  ;;  %v4684_v4 = vor.u32 %v5259_v62, %v4681_v0  ;;  %v4583_v62 = vld [vmem:[#allocation6 + $0x530] sm:$0xf]  ;;  %v5236_v0 = vld [vmem:[#allocation6 + $0x534] sm:$0xf0] }
 0x47f   :  { %v2099_v5 = vmul.f32 0.5, %v2098_v2 }
 0x480   :  { %2709 = vmatpush.bf16.msrb.mxu3 %v4684_v4  ;;  %v4584_v4 = vor.u32 %v5236_v0, %v4583_v62 }
 0x481   :  { %v2100_v6 = vsub.f32 1.5, %v2099_v5  ;;  %v4607_v5 = vld [vmem:[#allocation6 + $0x560] sm:$0xf] }
 0x483   :  { %v2101_v8 = vmul.f32 %v5389_v57, %v2100_v6  ;;  %v5242_v6 = vld [vmem:[#allocation6 + $0x564] sm:$0xf0] }
 0x485   :  { %v2105_v9 = vsel %vm2104_vm11, %v5389_v57, %v2101_v8 }
 0x486   :  { %v2108_v11 = vrot.slane %v2105_v9, 7  ;;  %v4608_v9 = vor.u32 %v5242_v6, %v4607_v5  ;;  %v5252_v5 = vld [vmem:[#allocation6 + $0x5b4] sm:$0xf0]  ;;  %v5235_v6 = vld [vmem:[#allocation6 + $0x534] sm:$0xf] }
 0x488   :  { %v2109_v13 = vsel %vm753_vm5, %v2095_v12, %v2108_v11  ;;  %v5258_v11 = vld [vmem:[#allocation6 + $0x5e4] sm:$0xf0]  ;;  %2671 = vmatpush.bf16.msrb.mxu0 %v4608_v9 }
 0x489   :  { %v2111_v14 = vmul.f32 %v2109_v13, %v2081_v10  ;;  %v4671_v10 = vld [vmem:[#allocation6 + $0x5e0] sm:$0xf] }
 0x48b   :  { %v2114_v16 = vperm.slane %v2111_v14, 1  ;;  %v2113_v19 = vperm.slane %v2111_v14, 0 }
 0x48d   :  { %v2118_v22 = vmul.f32 %v2114_v16, %v5946_v48  ;;  %v2117_v26 = vmul.f32 %v2113_v19, %v5942_v15  ;;  %v2126_v31 = vmul.f32 %v2114_v16, %v5936_v17  ;;  %v2125_v32 = vmul.f32 %v2113_v19, %v5930_v47 }
 0x48e   :  { %v4672_v19 = vor.u32 %v5258_v11, %v4671_v10  ;;  %v5251_v10 = vld [vmem:[#allocation6 + $0x5b4] sm:$0xf]  ;;  %v4649_v11 = vld [vmem:[#allocation6 + $0x5b8] sm:$0xf0] }
 0x48f   :  { %v2121_v24 = vrot.slane %v2118_v22, 7  ;;  %v5241_v22 = vld [vmem:[#allocation6 + $0x564] sm:$0xf] }
 0x490   :  { %2684 = vmatpush.bf16.msrb.mxu1 %v4672_v19  ;;  %v5234_v19 = vld [vmem:[#allocation6 + $0x524] sm:$0xf0] }
 0x491   :  { %v2122_v28 = vsel %vm753_vm5, %v2117_v26, %v2121_v24  ;;  %v4609_v24 = vld [vmem:[#allocation6 + $0x568] sm:$0xf0] }
 0x492   :  { %v2124_v56 = vsub.f32 %v2083_v25, %v2122_v28  ;;  %v4612_v28 = vor.u32 %v5241_v22, %v4609_v24  ;;  %v4639_v22 = vld [vmem:[#allocation6 + $0x5a0] sm:$0xf] }
 0x494   :  { %v2128_v27 = vperm.slane %v2124_v56, 0  ;;  %v2129_v35 = vperm.slane %v2124_v56, 1  ;;  %v5257_v56 = vld [vmem:[#allocation6 + $0x5e4] sm:$0xf]  ;;  %2697 = vmatpush.bf16.msrb.mxu2 %v4612_v28  ;;  %v4577_v28 = vld [vmem:[#allocation6 + $0x528] sm:$0xf0] }
 0x496   :  { %v2132_v53 = vadd.f32 %v2128_v27, %v2125_v32  ;;  %v2133_v42 = vadd.f32 %v2129_v35, %v2126_v31  ;;  %v4673_v31 = vld [vmem:[#allocation6 + $0x5e8] sm:$0xf0] }
 0x497   :  { %v4676_v35 = vor.u32 %v5257_v56, %v4673_v31 }
 0x498   :  { %v2134_v33 = vmax.f32 %v2132_v53, 0.0  ;;  %v2135_v43 = vmax.f32 %v2133_v42, 0.0  ;;  %v4599_v53 = vld [vmem:[#allocation6 + $0x550] sm:$0xf]  ;;  %v5240_v42 = vld [vmem:[#allocation6 + $0x554] sm:$0xf0] }
 0x499   :  { %2710 = vmatpush.bf16.msrb.mxu3 %v4676_v35  ;;  %v4641_v35 = vld [vmem:[#allocation6 + $0x5a8] sm:$0xf0] }
 0x49a   :  { %v2136_v36 = vpack.c.bf16 %v2134_v33, %v2134_v33  ;;  %v2137_v55 = vpack.c.bf16 %v2135_v43, %v2135_v43 }
 0x49c   :  { %2339 = vmatmul.bf16.vlgmr.msra.gmra.mxu0 %v2136_v36  ;;  %2352 = vmatmul.bf16.vlgmr.msra.gmra.mxu1 %v2137_v55 }
 0x49d   :  { %2365 = vmatmul.bf16.vlgmr.msra.gmra.mxu2 %v2136_v36  ;;  %2378 = vmatmul.bf16.vlgmr.msra.gmra.mxu3 %v2137_v55  ;;  %v4600_v36 = vor.u32 %v5240_v42, %v4599_v53  ;;  %v4663_v55 = vld [vmem:[#allocation6 + $0x5d0] sm:$0xf] }
 0x49f   :  { %2672 = vmatpush.bf16.msrb.mxu0 %v4600_v36  ;;  %v4631_v36 = vld [vmem:[#allocation6 + $0x590] sm:$0xf] }
 0x519   :  { %v2340_v15 = vpop.f32.mrf.mxu0  ;;  %v2353_v48 = vpop.f32.mrf.mxu1 }
 0x51a   :  { %v5973_v29 = vadd.f32 %v2353_v48, %v2340_v15  ;;  %v5256_v15 = vld [vmem:[#allocation6 + $0x5d4] sm:$0xf0] }
 0x51c   :  { %v2383_v17 = vrot.slane %v5973_v29, 4  ;;  %v2395_v47 = vmul.f32 %v5973_v29, %v5973_v29 }
 0x51e   :  { %v2384_v34 = vadd.f32 %v2383_v17, %v5973_v29  ;;  %v2397_v38 = vrot.slane %v2395_v47, 4  ;;  %v4664_v17 = vor.u32 %v5256_v15, %v4663_v55  ;;  %v5248_v15 = vld [vmem:[#allocation6 + $0x594] sm:$0xf0] }
 0x520   :  { %v2385_v46 = vrot.slane %v2384_v34, 2  ;;  %v2398_v59 = vadd.f32 %v2397_v38, %v2395_v47  ;;  %v2366_v18 = vpop.f32.mrf.mxu2  ;;  %v2379_v54 = vpop.f32.mrf.mxu3  ;;  %v5239_v47 = vld [vmem:[#allocation6 + $0x554] sm:$0xf]  ;;  %2685 = vmatpush.bf16.msrb.mxu1 %v4664_v17  ;;  %v4569_v17 = vld [vmem:[#allocation6 + $0x518] sm:$0xf0] }
 0x521   :  { %v5979_v63 = vadd.f32 %v2379_v54, %v2366_v18  ;;  %v2342_v45 = vpop.f32.mrf.mxu0  ;;  %v2355_v39 = vpop.f32.mrf.mxu1  ;;  %v5255_v38 = vld [vmem:[#allocation6 + $0x5d4] sm:$0xf]  ;;  %v4665_v54 = vld [vmem:[#allocation6 + $0x5d8] sm:$0xf0] }
 0x522   :  { %v2386_v41 = vadd.f32 %v2385_v46, %v2384_v34  ;;  %v2399_v44 = vrot.slane %v2398_v59, 2  ;;  %v4601_v34 = vld [vmem:[#allocation6 + $0x558] sm:$0xf0]  ;;  %v4668_v39 = vor.u32 %v5255_v38, %v4665_v54  ;;  %v5247_v38 = vld [vmem:[#allocation6 + $0x594] sm:$0xf] }
 0x523   :  { %v2389_v40 = vrot.slane %v5979_v63, 4  ;;  %v2396_v50 = vmul.f32 %v5979_v63, %v5979_v63  ;;  %v4604_v18 = vor.u32 %v5239_v47, %v4601_v34  ;;  %v4632_v34 = vor.u32 %v5248_v15, %v4631_v36  ;;  %v5230_v54 = vld [vmem:[#allocation6 + $0x504] sm:$0xf0] }
 0x524   :  { %v2387_v23 = vrot.slane %v2386_v41, 1  ;;  %v2400_v51 = vadd.f32 %v2399_v44, %v2398_v59  ;;  %v5238_v44 = vld [vmem:[#allocation6 + $0x544] sm:$0xf0]  ;;  %2711 = vmatpush.bf16.msrb.mxu3 %v4668_v39 }
 0x525   :  { %v2390_v57 = vadd.f32 %v2389_v40, %v5979_v63  ;;  %v2403_v58 = vrot.slane %v2396_v50, 4  ;;  %2698 = vmatpush.bf16.msrb.mxu2 %v4604_v18  ;;  %v4559_v18 = vld [vmem:[#allocation6 + $0x500] sm:$0xf] }
 0x526   :  { %v2388_v1 = vadd.f32 %v2387_v23, %v2386_v41  ;;  %v2401_v2 = vrot.slane %v2400_v51, 1  ;;  %v4591_v41 = vld [vmem:[#allocation6 + $0x540] sm:$0xf]  ;;  %v5237_v23 = vld [vmem:[#allocation6 + $0x544] sm:$0xf] }
 0x527   :  { %v2391_v7 = vrot.slane %v2390_v57, 2  ;;  %v2404_v8 = vadd.f32 %v2403_v58, %v2396_v50  ;;  %v4592_v40 = vor.u32 %v5238_v44, %v4591_v41  ;;  %v4655_v50 = vld [vmem:[#allocation6 + $0x5c0] sm:$0xf]  ;;  %v4657_v58 = vld [vmem:[#allocation6 + $0x5c8] sm:$0xf0] }
 0x528   :  { %v2402_v12 = vadd.f32 %v2401_v2, %v2400_v51  ;;  %v5985_v13 = vmul.f32 0.125, %v2388_v1  ;;  %v2368_v14 = vpop.f32.mrf.mxu2  ;;  %v2381_v16 = vpop.f32.mrf.mxu3  ;;  %v4656_v49 = vor.u32 %v5254_v30, %v4655_v50  ;;  %v4593_v51 = vld [vmem:[#allocation6 + $0x548] sm:$0xf0]  ;;  %v4647_v1 = vld [vmem:[#allocation6 + $0x5b0] sm:$0xf]  ;;  %v4560_v50 = vor.u32 %v5230_v54, %v4559_v18 }
 0x529   :  { %v2392_v25 = vadd.f32 %v2391_v7, %v2390_v57  ;;  %v2405_v26 = vrot.slane %v2404_v8, 2  ;;  %2673 = vmatpush.bf16.msrb.mxu0 %v4592_v40  ;;  %v4596_v60 = vor.u32 %v5237_v23, %v4593_v51  ;;  %v5253_v57 = vld [vmem:[#allocation6 + $0x5c4] sm:$0xf]  ;;  %v4585_v7 = vld [vmem:[#allocation6 + $0x538] sm:$0xf0]  ;;  %v4652_v16 = vor.u32 %v5251_v10, %v4649_v11 }
 0x52a   :  { %v2411_v32 = vmul.f32 0.125, %v2402_v12  ;;  %v2413_v27 = vmul.f32 %v5985_v13, %v5985_v13  ;;  %2686 = vmatpush.bf16.msrb.mxu1 %v4656_v49  ;;  %v4660_v61 = vor.u32 %v5253_v57, %v4657_v58  ;;  %v4588_v9 = vor.u32 %v5235_v6, %v4585_v7  ;;  %v4575_v12 = vld [vmem:[#allocation6 + $0x520] sm:$0xf]  ;;  %v5246_v44 = vld [vmem:[#allocation6 + $0x584] sm:$0xf0] }
 0x52b   :  { %v2393_v33 = vrot.slane %v2392_v25, 1  ;;  %v2406_v43 = vadd.f32 %v2405_v26, %v2404_v8  ;;  %2699 = vmatpush.bf16.msrb.mxu2 %v4596_v60  ;;  %v4648_v8 = vor.u32 %v5252_v5, %v4647_v1  ;;  %v4576_v24 = vor.u32 %v5234_v19, %v4575_v12  ;;  %v5233_v26 = vld [vmem:[#allocation6 + $0x524] sm:$0xf]  ;;  %v4561_v40 = vld [vmem:[#allocation6 + $0x508] sm:$0xf0] }
 0x52c   :  { %v2415_v48 = vsub.f32 %v2411_v32, %v2413_v27  ;;  %2712 = vmatpush.bf16.msrb.mxu3 %v4660_v61  ;;  %v4580_v32 = vor.u32 %v5233_v26, %v4577_v28  ;;  %v5249_v27 = vld [vmem:[#allocation6 + $0x5a4] sm:$0xf]  ;;  %v4625_v49 = vld [vmem:[#allocation6 + $0x588] sm:$0xf0] }
 0x52d   :  { %v2394_v46 = vadd.f32 %v2393_v33, %v2392_v25  ;;  %v2407_v59 = vrot.slane %v2406_v43, 1  ;;  %2674 = vmatpush.bf16.msrb.mxu0 %v4584_v4  ;;  %v5250_v25 = vld [vmem:[#allocation6 + $0x5a4] sm:$0xf0]  ;;  %v4644_v42 = vor.u32 %v5249_v27, %v4641_v35  ;;  %v4567_v33 = vld [vmem:[#allocation6 + $0x510] sm:$0xf] }
 0x52e   :  { %v2417_v45 = vmax.f32 %v2415_v48, 0.0  ;;  %2687 = vmatpush.bf16.msrb.mxu1 %v4648_v8  ;;  %v4640_v31 = vor.u32 %v5250_v25, %v4639_v22  ;;  %v5231_v48 = vld [vmem:[#allocation6 + $0x514] sm:$0xf]  ;;  %v5245_v30 = vld [vmem:[#allocation6 + $0x584] sm:$0xf] }
 0x52f   :  { %v2408_v37 = vadd.f32 %v2407_v59, %v2406_v43  ;;  %v5989_v20 = vmul.f32 0.125, %v2394_v46  ;;  %2700 = vmatpush.bf16.msrb.mxu2 %v4588_v9  ;;  %v5232_v43 = vld [vmem:[#allocation6 + $0x514] sm:$0xf0]  ;;  %v4633_v46 = vld [vmem:[#allocation6 + $0x598] sm:$0xf0]  ;;  %v4572_v59 = vor.u32 %v5231_v48, %v4569_v17  ;;  %v4628_v57 = vor.u32 %v5245_v30, %v4625_v49 }
 0x530   :  { %v5991_v21 = vadd.f32 1e-05, %v2417_v45  ;;  %2713 = vmatpush.bf16.msrb.mxu3 %v4652_v16  ;;  %v4568_v47 = vor.u32 %v5232_v43, %v4567_v33  ;;  %v4623_v45 = vld [vmem:[#allocation6 + $0x580] sm:$0xf]  ;;  %v4636_v41 = vor.u32 %v5247_v38, %v4633_v46  ;;  %v4743_v38 = vld [vmem:[#allocation6 + $0x670] sm:$0xf] }
 0x531   :  { %v2412_v52 = vmul.f32 0.125, %v2408_v37  ;;  %v2414_v3 = vmul.f32 %v5989_v20, %v5989_v20  ;;  %2675 = vmatpush.bf16.msrb.mxu0 %v4576_v24  ;;  %v5229_v37 = vld [vmem:[#allocation6 + $0x504] sm:$0xf]  ;;  %v4624_v23 = vor.u32 %v5246_v44, %v4623_v45  ;;  %v2420_v5 = vld [vmem:[#allocation9 + $0x12] ss:$8 sm:$0x3] }
 0x532   :  { %5390 = vrsqrt.f32 %v5991_v21  ;;  %2688 = vmatpush.bf16.msrb.mxu1 %v4640_v31  ;;  %vm2431_vm4 = vweird.f32 %v5991_v21  ;;  %v2422_v16 = vld [vmem:[#allocation9 + $0x13] ss:$8 sm:$0x3]  ;;  %v5291_v30 = vld [vmem:[#allocation6 + $0x6f4] sm:$0xf] }
 0x533   :  { %v2416_v2 = vsub.f32 %v2412_v52, %v2414_v3  ;;  %2701 = vmatpush.bf16.msrb.mxu2 %v4580_v32  ;;  %v4564_v52 = vor.u32 %v5229_v37, %v4561_v40  ;;  %v5276_v46 = vld [vmem:[#allocation6 + $0x674] sm:$0xf0] }
 0x534   :  { %2714 = vmatpush.bf16.msrb.mxu3 %v4644_v42  ;;  %v4744_v45 = vor.u32 %v5276_v46, %v4743_v38  ;;  %v5270_v38 = vld [vmem:[#allocation6 + $0x644] sm:$0xf0] }
 0x535   :  { %v2418_v14 = vmax.f32 %v2416_v2, 0.0  ;;  %2676 = vmatpush.bf16.msrb.mxu0 %v4568_v47 }
 0x536   :  { %2689 = vmatpush.bf16.msrb.mxu1 %v4632_v34 }
 0x537   :  { %v2424_v56 = vadd.f32 1e-05, %v2418_v14  ;;  %2702 = vmatpush.bf16.msrb.mxu2 %v4572_v59  ;;  %v4807_v59 = vld [vmem:[#allocation6 + $0x6f0] sm:$0xf] }
 0x538   :  { %v5996_v53 = vpop.eup %5390  ;;  %2715 = vmatpush.bf16.msrb.mxu3 %v4636_v41  ;;  %v5275_v41 = vld [vmem:[#allocation6 + $0x674] sm:$0xf] }
 0x539   :  { %v2426_v55 = vmul.f32 %v5996_v53, %v5991_v21  ;;  %5392 = vrsqrt.f32 %v2424_v56  ;;  %2677 = vmatpush.bf16.msrb.mxu0 %v4560_v50  ;;  %vm2432_vm0 = vweird.f32 %v5996_v53  ;;  %vm2441_vm3 = vweird.f32 %v2424_v56  ;;  %v4745_v50 = vld [vmem:[#allocation6 + $0x678] sm:$0xf0] }
 0x53a   :  { %2690 = vmatpush.bf16.msrb.mxu1 %v4624_v23  ;;  %vm2433_vm6 = vmor %vm2431_vm4, %vm2432_vm0 }
 0x53b   :  { %v2427_v39 = vmul.f32 %v5996_v53, %v2426_v55  ;;  %2703 = vmatpush.bf16.msrb.mxu2 %v4564_v52  ;;  %v4809_v52 = vld [vmem:[#allocation6 + $0x6f8] sm:$0xf0] }
 0x53c   :  { %2716 = vmatpush.bf16.msrb.mxu3 %v4628_v57  ;;  %v4812_v57 = vor.u32 %v5291_v30, %v4809_v52  ;;  %v5285_v30 = vld [vmem:[#allocation6 + $0x6c4] sm:$0xf] }
 0x53d   :  { %v2428_v3 = vmul.f32 0.5, %v2427_v39  ;;  %v5292_v39 = vld [vmem:[#allocation6 + $0x6f4] sm:$0xf0]  ;;  %3009 = vmatpush.bf16.msra.mxu0 %v4744_v45 }
 0x53e   :  { %v4808_v40 = vor.u32 %v5292_v39, %v4807_v59 }
 0x53f   :  { %v5393_v51 = vpop.eup %5392  ;;  %v2429_v61 = vsub.f32 1.5, %v2428_v3 }
 0x540   :  { %v2436_v60 = vmul.f32 %v5393_v51, %v2424_v56  ;;  %vm2442_vm14 = vweird.f32 %v5393_v51  ;;  %3022 = vmatpush.bf16.msra.mxu1 %v4808_v40  ;;  %3048 = vmatpush.bf16.msra.mxu3 %v4812_v57 }
 0x541   :  { %v2430_v1 = vmul.f32 %v5996_v53, %v2429_v61  ;;  %vm2443_vm12 = vmor %vm2441_vm3, %vm2442_vm14  ;;  %v5274_v61 = vld [vmem:[#allocation6 + $0x664] sm:$0xf0] }
 0x542   :  { %v2437_v58 = vmul.f32 %v5393_v51, %v2436_v60 }
 0x543   :  { %v2434_v7 = vsel %vm2433_vm6, %v5996_v53, %v2430_v1 }
 0x544   :  { %v2438_v62 = vmul.f32 0.5, %v2437_v58  ;;  %v4735_v58 = vld [vmem:[#allocation6 + $0x660] sm:$0xf] }
 0x545   :  { %v4736_v1 = vor.u32 %v5274_v61, %v4735_v58  ;;  %v4775_v58 = vld [vmem:[#allocation6 + $0x6b0] sm:$0xf]  ;;  %v5284_v61 = vld [vmem:[#allocation6 + $0x6b4] sm:$0xf0] }
 0x546   :  { %v2439_v0 = vsub.f32 1.5, %v2438_v62 }
 0x547   :  { %3010 = vmatpush.bf16.msra.mxu0 %v4736_v1  ;;  %v4776_v1 = vor.u32 %v5284_v61, %v4775_v58 }
 0x548   :  { %v2440_v2 = vmul.f32 %v5393_v51, %v2439_v0 }
 0x54a   :  { %v2444_v4 = vsel %vm2443_vm12, %v5393_v51, %v2440_v2  ;;  %v4748_v51 = vor.u32 %v5275_v41, %v4745_v50  ;;  %v4799_v2 = vld [vmem:[#allocation6 + $0x6e0] sm:$0xf] }
 0x54b   :  { %v2447_v6 = vrot.slane %v2444_v4, 7  ;;  %v5290_v4 = vld [vmem:[#allocation6 + $0x6e4] sm:$0xf0] }
 0x54c   :  { %3035 = vmatpush.bf16.msra.mxu2 %v4748_v51 }
 0x54d   :  { %v2448_v8 = vsel %vm753_vm5, %v2434_v7, %v2447_v6  ;;  %v4800_v7 = vor.u32 %v5290_v4, %v4799_v2  ;;  %v4713_v2 = vld [vmem:[#allocation6 + $0x638] sm:$0xf0]  ;;  %v5283_v4 = vld [vmem:[#allocation6 + $0x6b4] sm:$0xf] }
 0x54e   :  { %v2450_v9 = vmul.f32 %v2448_v8, %v2420_v5  ;;  %v5273_v8 = vld [vmem:[#allocation6 + $0x664] sm:$0xf] }
 0x54f   :  { %3023 = vmatpush.bf16.msra.mxu1 %v4800_v7 }
 0x550   :  { %v2453_v10 = vperm.slane %v2450_v9, 1  ;;  %v2452_v11 = vperm.slane %v2450_v9, 0  ;;  %v4737_v9 = vld [vmem:[#allocation6 + $0x668] sm:$0xf0] }
 0x552   :  { %v2457_v12 = vmul.f32 %v2453_v10, %v5989_v20  ;;  %v2456_v19 = vmul.f32 %v2452_v11, %v5985_v13  ;;  %v2465_v24 = vmul.f32 %v2453_v10, %v5979_v63  ;;  %v2464_v25 = vmul.f32 %v2452_v11, %v5973_v29 }
 0x554   :  { %v2460_v14 = vrot.slane %v2457_v12, 7 }
 0x556   :  { %v2461_v22 = vsel %vm753_vm5, %v2456_v19, %v2460_v14  ;;  %v5289_v19 = vld [vmem:[#allocation6 + $0x6e4] sm:$0xf] }
 0x557   :  { %v2463_v21 = vsub.f32 %v2422_v16, %v2461_v22  ;;  %v4740_v16 = vor.u32 %v5273_v8, %v4737_v9  ;;  %v4801_v22 = vld [vmem:[#allocation6 + $0x6e8] sm:$0xf0]  ;;  %v4703_v8 = vld [vmem:[#allocation6 + $0x620] sm:$0xf]  ;;  %v5266_v9 = vld [vmem:[#allocation6 + $0x624] sm:$0xf0] }
 0x559   :  { %v2467_v26 = vperm.slane %v2463_v21, 0  ;;  %v2468_v28 = vperm.slane %v2463_v21, 1  ;;  %3036 = vmatpush.bf16.msra.mxu2 %v4740_v16  ;;  %v5282_v16 = vld [vmem:[#allocation6 + $0x6a4] sm:$0xf0] }
 0x55b   :  { %v2471_v56 = vadd.f32 %v2467_v26, %v2464_v25  ;;  %v2472_v31 = vadd.f32 %v2468_v28, %v2465_v24  ;;  %v4804_v25 = vor.u32 %v5289_v19, %v4801_v22  ;;  %v4727_v26 = vld [vmem:[#allocation6 + $0x650] sm:$0xf]  ;;  %v5272_v28 = vld [vmem:[#allocation6 + $0x654] sm:$0xf0]  ;;  %v5265_v19 = vld [vmem:[#allocation6 + $0x624] sm:$0xf] }
 0x55d   :  { %v2473_v32 = vmax.f32 %v2471_v56, 0.0  ;;  %v2474_v27 = vmax.f32 %v2472_v31, 0.0  ;;  %3049 = vmatpush.bf16.msra.mxu3 %v4804_v25  ;;  %v4769_v25 = vld [vmem:[#allocation6 + $0x6a8] sm:$0xf0] }
 0x55f   :  { %v2475_v35 = vpack.c.bf16 %v2473_v32, %v2473_v32  ;;  %v2476_v53 = vpack.c.bf16 %v2474_v27, %v2474_v27  ;;  %v4728_v32 = vor.u32 %v5272_v28, %v4727_v26  ;;  %v4791_v27 = vld [vmem:[#allocation6 + $0x6d0] sm:$0xf] }
 0x561   :  { %2678 = vmatmul.bf16.vlgmr.msrb.gmra.mxu0 %v2475_v35  ;;  %2691 = vmatmul.bf16.vlgmr.msrb.gmra.mxu1 %v2476_v53 }
 0x562   :  { %2704 = vmatmul.bf16.vlgmr.msrb.gmra.mxu2 %v2475_v35  ;;  %2717 = vmatmul.bf16.vlgmr.msrb.gmra.mxu3 %v2476_v53  ;;  %v5288_v35 = vld [vmem:[#allocation6 + $0x6d4] sm:$0xf0] }
 0x563   :  { %3011 = vmatpush.bf16.msra.mxu0 %v4728_v32  ;;  %v5264_v32 = vld [vmem:[#allocation6 + $0x614] sm:$0xf0] }
 0x5de   :  { %v2679_v13 = vpop.f32.mrf.mxu0  ;;  %v2692_v20 = vpop.f32.mrf.mxu1 }
 0x5df   :  { %v6011_v42 = vadd.f32 %v2692_v20, %v2679_v13  ;;  %v4792_v20 = vor.u32 %v5288_v35, %v4791_v27 }
 0x5e1   :  { %v2722_v63 = vrot.slane %v6011_v42, 4  ;;  %v2734_v29 = vmul.f32 %v6011_v42, %v6011_v42  ;;  %3024 = vmatpush.bf16.msra.mxu1 %v4792_v20  ;;  %v5263_v20 = vld [vmem:[#allocation6 + $0x614] sm:$0xf] }
 0x5e3   :  { %v2723_v33 = vadd.f32 %v2722_v63, %v6011_v42  ;;  %v2736_v43 = vrot.slane %v2734_v29, 4  ;;  %v5271_v63 = vld [vmem:[#allocation6 + $0x654] sm:$0xf] }
 0x5e5   :  { %v2724_v36 = vrot.slane %v2723_v33, 2  ;;  %v2737_v55 = vadd.f32 %v2736_v43, %v2734_v29  ;;  %v2705_v15 = vpop.f32.mrf.mxu2  ;;  %v2718_v48 = vpop.f32.mrf.mxu3  ;;  %v4729_v29 = vld [vmem:[#allocation6 + $0x658] sm:$0xf0] }
 0x5e6   :  { %v6017_v17 = vadd.f32 %v2718_v48, %v2705_v15  ;;  %v2681_v47 = vpop.f32.mrf.mxu0  ;;  %v2694_v34 = vpop.f32.mrf.mxu1  ;;  %v4732_v43 = vor.u32 %v5271_v63, %v4729_v29  ;;  %v4697_v29 = vld [vmem:[#allocation6 + $0x618] sm:$0xf0] }
 0x5e7   :  { %v2725_v18 = vadd.f32 %v2724_v36, %v2723_v33  ;;  %v2738_v54 = vrot.slane %v2737_v55, 2  ;;  %v5287_v36 = vld [vmem:[#allocation6 + $0x6d4] sm:$0xf]  ;;  %v4719_v34 = vld [vmem:[#allocation6 + $0x640] sm:$0xf] }
 0x5e8   :  { %v2728_v44 = vrot.slane %v6017_v17, 4  ;;  %v2735_v37 = vmul.f32 %v6017_v17, %v6017_v17  ;;  %3037 = vmatpush.bf16.msra.mxu2 %v4732_v43  ;;  %v4720_v59 = vor.u32 %v5270_v38, %v4719_v34  ;;  %v4761_v43 = vld [vmem:[#allocation6 + $0x698] sm:$0xf0]  ;;  %v4751_v34 = vld [vmem:[#allocation6 + $0x680] sm:$0xf] }
 0x5e9   :  { %v2726_v49 = vrot.slane %v2725_v18, 1  ;;  %v2739_v23 = vadd.f32 %v2738_v54, %v2737_v55  ;;  %v4793_v55 = vld [vmem:[#allocation6 + $0x6d8] sm:$0xf0]  ;;  %v5286_v54 = vld [vmem:[#allocation6 + $0x6c4] sm:$0xf0] }
 0x5ea   :  { %v2729_v3 = vadd.f32 %v2728_v44, %v6017_v17  ;;  %v2742_v60 = vrot.slane %v2735_v37, 4  ;;  %v4796_v47 = vor.u32 %v5287_v36, %v4793_v55  ;;  %v5269_v44 = vld [vmem:[#allocation6 + $0x644] sm:$0xf]  ;;  %3012 = vmatpush.bf16.msra.mxu0 %v4720_v59  ;;  %v4700_v55 = vor.u32 %v5263_v20, %v4697_v29  ;;  %v5278_v38 = vld [vmem:[#allocation6 + $0x684] sm:$0xf0] }
 0x5eb   :  { %v2727_v62 = vadd.f32 %v2726_v49, %v2725_v18  ;;  %v2740_v0 = vrot.slane %v2739_v23, 1  ;;  %v4783_v18 = vld [vmem:[#allocation6 + $0x6c0] sm:$0xf]  ;;  %v4785_v49 = vld [vmem:[#allocation6 + $0x6c8] sm:$0xf0] }
 0x5ec   :  { %v2730_v5 = vrot.slane %v2729_v3, 2  ;;  %v2743_v6 = vadd.f32 %v2742_v60, %v2735_v37  ;;  %3050 = vmatpush.bf16.msra.mxu3 %v4796_v47  ;;  %v4784_v41 = vor.u32 %v5286_v54, %v4783_v18  ;;  %v4721_v37 = vld [vmem:[#allocation6 + $0x648] sm:$0xf0]  ;;  %v4788_v52 = vor.u32 %v5285_v30, %v4785_v49  ;;  %v5268_v60 = vld [vmem:[#allocation6 + $0x634] sm:$0xf0] }
 0x5ed   :  { %v2741_v10 = vadd.f32 %v2740_v0, %v2739_v23  ;;  %v6023_v11 = vmul.f32 0.125, %v2727_v62  ;;  %v2707_v12 = vpop.f32.mrf.mxu2  ;;  %v2720_v14 = vpop.f32.mrf.mxu3  ;;  %v4724_v50 = vor.u32 %v5269_v44, %v4721_v37  ;;  %v5267_v62 = vld [vmem:[#allocation6 + $0x634] sm:$0xf]  ;;  %v4689_v54 = vld [vmem:[#allocation6 + $0x608] sm:$0xf0]  ;;  %v4752_v44 = vor.u32 %v5278_v38, %v4751_v34 }
 0x5ee   :  { %v2731_v21 = vadd.f32 %v2730_v5, %v2729_v3  ;;  %v2744_v24 = vrot.slane %v2743_v6, 2  ;;  %3025 = vmatpush.bf16.msra.mxu1 %v4784_v41  ;;  %v4711_v3 = vld [vmem:[#allocation6 + $0x630] sm:$0xf]  ;;  %v4777_v5 = vld [vmem:[#allocation6 + $0x6b8] sm:$0xf0]  ;;  %v4704_v14 = vor.u32 %v5266_v9, %v4703_v8 }
 0x5ef   :  { %v2750_v56 = vmul.f32 0.125, %v2741_v10  ;;  %v2752_v31 = vmul.f32 %v6023_v11, %v6023_v11  ;;  %3038 = vmatpush.bf16.msra.mxu2 %v4724_v50  ;;  %v4712_v57 = vor.u32 %v5268_v60, %v4711_v3  ;;  %v4780_v7 = vor.u32 %v5283_v4, %v4777_v5  ;;  %v4767_v10 = vld [vmem:[#allocation6 + $0x6a0] sm:$0xf]  ;;  %v4753_v41 = vld [vmem:[#allocation6 + $0x688] sm:$0xf0] }
 0x5f0   :  { %v2732_v53 = vrot.slane %v2731_v21, 1  ;;  %v2745_v13 = vadd.f32 %v2744_v24, %v2743_v6  ;;  %3051 = vmatpush.bf16.msra.mxu3 %v4788_v52  ;;  %v4716_v6 = vor.u32 %v5267_v62, %v4713_v2  ;;  %v4768_v22 = vor.u32 %v5282_v16, %v4767_v10  ;;  %v5281_v24 = vld [vmem:[#allocation6 + $0x6a4] sm:$0xf]  ;;  %v2759_v62 = vld [vmem:[#allocation9 + $0x14] ss:$8 sm:$0x3] }
 0x5f1   :  { %v2754_v33 = vsub.f32 %v2750_v56, %v2752_v31  ;;  %3013 = vmatpush.bf16.msra.mxu0 %v4712_v57  ;;  %v4772_v56 = vor.u32 %v5281_v24, %v4769_v25  ;;  %v4695_v31 = vld [vmem:[#allocation6 + $0x610] sm:$0xf]  ;;  %v2761_v9 = vld [vmem:[#allocation9 + $0x15] ss:$8 sm:$0x3] }
 0x5f2   :  { %v2733_v15 = vadd.f32 %v2732_v53, %v2731_v21  ;;  %v2746_v48 = vrot.slane %v2745_v13, 1  ;;  %3026 = vmatpush.bf16.msra.mxu1 %v4776_v1  ;;  %v4705_v21 = vld [vmem:[#allocation6 + $0x628] sm:$0xf0]  ;;  %v4696_v35 = vor.u32 %v5264_v32, %v4695_v31  ;;  %v4759_v53 = vld [vmem:[#allocation6 + $0x690] sm:$0xf] }
 0x5f3   :  { %v2756_v46 = vmax.f32 %v2754_v33, 0.0  ;;  %3039 = vmatpush.bf16.msra.mxu2 %v4716_v6  ;;  %v4708_v28 = vor.u32 %v5265_v19, %v4705_v21  ;;  %v5279_v33 = vld [vmem:[#allocation6 + $0x694] sm:$0xf]  ;;  %v5308_v29 = vld [vmem:[#allocation6 + $0x774] sm:$0xf0] }
 0x5f4   :  { %v2747_v45 = vadd.f32 %v2746_v48, %v2745_v13  ;;  %v6027_v39 = vmul.f32 0.125, %v2733_v15  ;;  %3052 = vmatpush.bf16.msra.mxu3 %v4780_v7  ;;  %v5280_v13 = vld [vmem:[#allocation6 + $0x694] sm:$0xf0]  ;;  %v4687_v15 = vld [vmem:[#allocation6 + $0x600] sm:$0xf]  ;;  %v4764_v47 = vor.u32 %v5279_v33, %v4761_v43 }
 0x5f5   :  { %v6029_v40 = vadd.f32 1e-05, %v2756_v46  ;;  %3014 = vmatpush.bf16.msra.mxu0 %v4704_v14  ;;  %v4760_v36 = vor.u32 %v5280_v13, %v4759_v53  ;;  %v5262_v48 = vld [vmem:[#allocation6 + $0x604] sm:$0xf0]  ;;  %v5261_v46 = vld [vmem:[#allocation6 + $0x604] sm:$0xf] }
 0x5f6   :  { %v2751_v23 = vmul.f32 0.125, %v2747_v45  ;;  %v2753_v51 = vmul.f32 %v6027_v39, %v6027_v39  ;;  %3027 = vmatpush.bf16.msra.mxu1 %v4768_v22  ;;  %v4688_v18 = vor.u32 %v5262_v48, %v4687_v15  ;;  %v5277_v45 = vld [vmem:[#allocation6 + $0x684] sm:$0xf]  ;;  %v4692_v37 = vor.u32 %v5261_v46, %v4689_v54  ;;  %v4935_v15 = vld [vmem:[#allocation6 + $0x7f0] sm:$0xf] }
 0x5f7   :  { %5394 = vrsqrt.f32 %v6029_v40  ;;  %3040 = vmatpush.bf16.msra.mxu2 %v4708_v28  ;;  %v4756_v30 = vor.u32 %v5277_v45, %v4753_v41  ;;  %vm2770_vm9 = vweird.f32 %v6029_v40  ;;  %v5324_v48 = vld [vmem:[#allocation6 + $0x7f4] sm:$0xf0] }
 0x5f8   :  { %v2755_v0 = vsub.f32 %v2751_v23, %v2753_v51  ;;  %3053 = vmatpush.bf16.msra.mxu3 %v4772_v56  ;;  %v4936_v46 = vor.u32 %v5324_v48, %v4935_v15  ;;  %v5318_v15 = vld [vmem:[#allocation6 + $0x7c4] sm:$0xf0]  ;;  %v5301_v48 = vld [vmem:[#allocation6 + $0x744] sm:$0xf] }
 0x5f9   :  { %3015 = vmatpush.bf16.msra.mxu0 %v4696_v35 }
 0x5fa   :  { %v2757_v12 = vmax.f32 %v2755_v0, 0.0  ;;  %3028 = vmatpush.bf16.msra.mxu1 %v4760_v36 }
 0x5fb   :  { %3041 = vmatpush.bf16.msra.mxu2 %v4700_v55 }
 0x5fc   :  { %v2763_v26 = vadd.f32 1e-05, %v2757_v12  ;;  %3054 = vmatpush.bf16.msra.mxu3 %v4764_v47  ;;  %v5307_v47 = vld [vmem:[#allocation6 + $0x774] sm:$0xf] }
 0x5fd   :  { %v5395_v27 = vpop.eup %5394  ;;  %3016 = vmatpush.bf16.msra.mxu0 %v4688_v18  ;;  %v5323_v18 = vld [vmem:[#allocation6 + $0x7f4] sm:$0xf] }
 0x5fe   :  { %v2765_v63 = vmul.f32 %v5395_v27, %v6029_v40  ;;  %5396 = vrsqrt.f32 %v2763_v26  ;;  %3029 = vmatpush.bf16.msra.mxu1 %v4752_v44  ;;  %vm2771_vm8 = vweird.f32 %v5395_v27  ;;  %vm2780_vm2 = vweird.f32 %v2763_v26  ;;  %v4937_v44 = vld [vmem:[#allocation6 + $0x7f8] sm:$0xf0] }
 0x5ff   :  { %3042 = vmatpush.bf16.msra.mxu2 %v4692_v37  ;;  %vm2772_vm10 = vmor %vm2770_vm9, %vm2771_vm8 }
 0x600   :  { %v2766_v59 = vmul.f32 %v5395_v27, %v2765_v63  ;;  %3055 = vmatpush.bf16.msra.mxu3 %v4756_v30  ;;  %v4871_v63 = vld [vmem:[#allocation6 + $0x770] sm:$0xf]  ;;  %v4940_v30 = vor.u32 %v5323_v18, %v4937_v44 }
 0x601   :  { %v4872_v55 = vor.u32 %v5308_v29, %v4871_v63  ;;  %v5302_v63 = vld [vmem:[#allocation6 + $0x744] sm:$0xf0]  ;;  %v4911_v29 = vld [vmem:[#allocation6 + $0x7c0] sm:$0xf] }
 0x602   :  { %v2767_v49 = vmul.f32 0.5, %v2766_v59  ;;  %v4873_v59 = vld [vmem:[#allocation6 + $0x778] sm:$0xf0]  ;;  %3361 = vmatpush.bf16.msrb.mxu1 %v4936_v46  ;;  %v5317_v46 = vld [vmem:[#allocation6 + $0x7c4] sm:$0xf] }
 0x603   :  { %3348 = vmatpush.bf16.msrb.mxu0 %v4872_v55  ;;  %v4876_v41 = vor.u32 %v5307_v47, %v4873_v59 }
 0x604   :  { %v5397_v50 = vpop.eup %5396  ;;  %v2768_v52 = vsub.f32 1.5, %v2767_v49  ;;  %v4863_v49 = vld [vmem:[#allocation6 + $0x760] sm:$0xf]  ;;  %3387 = vmatpush.bf16.msrb.mxu3 %v4940_v30 }
 0x605   :  { %v2775_v23 = vmul.f32 %v5397_v50, %v2763_v26  ;;  %vm2781_vm1 = vweird.f32 %v5397_v50  ;;  %3374 = vmatpush.bf16.msrb.mxu2 %v4876_v41 }
 0x606   :  { %v2769_v57 = vmul.f32 %v5395_v27, %v2768_v52  ;;  %vm2782_vm7 = vmor %vm2780_vm2, %vm2781_vm1 }
 0x607   :  { %v2776_v51 = vmul.f32 %v5397_v50, %v2775_v23  ;;  %v5306_v23 = vld [vmem:[#allocation6 + $0x764] sm:$0xf0] }
 0x608   :  { %v2773_v1 = vsel %vm2772_vm10, %v5395_v27, %v2769_v57  ;;  %v5322_v57 = vld [vmem:[#allocation6 + $0x7e4] sm:$0xf0] }
 0x609   :  { %v2777_v3 = vmul.f32 0.5, %v2776_v51 }
 0x60b   :  { %v2778_v60 = vsub.f32 1.5, %v2777_v3  ;;  %v4864_v3 = vor.u32 %v5306_v23, %v4863_v49 }
 0x60d   :  { %v2779_v58 = vmul.f32 %v5397_v50, %v2778_v60  ;;  %v4927_v60 = vld [vmem:[#allocation6 + $0x7e0] sm:$0xf]  ;;  %3349 = vmatpush.bf16.msrb.mxu0 %v4864_v3 }
 0x60f   :  { %v2783_v61 = vsel %vm2782_vm7, %v5397_v50, %v2779_v58 }
 0x610   :  { %v2786_v0 = vrot.slane %v2783_v61, 7 }
 0x612   :  { %v2787_v2 = vsel %vm753_vm5, %v2773_v1, %v2786_v0  ;;  %v5305_v0 = vld [vmem:[#allocation6 + $0x764] sm:$0xf]  ;;  %v4865_v1 = vld [vmem:[#allocation6 + $0x768] sm:$0xf0] }
 0x613   :  { %v2789_v4 = vmul.f32 %v2787_v2, %v2759_v62  ;;  %v4928_v62 = vor.u32 %v5322_v57, %v4927_v60  ;;  %v5299_v60 = vld [vmem:[#allocation6 + $0x734] sm:$0xf]  ;;  %v4841_v57 = vld [vmem:[#allocation6 + $0x738] sm:$0xf0] }
 0x615   :  { %v2792_v5 = vperm.slane %v2789_v4, 1  ;;  %v2791_v6 = vperm.slane %v2789_v4, 0  ;;  %3362 = vmatpush.bf16.msrb.mxu1 %v4928_v62  ;;  %v4844_v62 = vor.u32 %v5299_v60, %v4841_v57 }
 0x617   :  { %v2796_v7 = vmul.f32 %v2792_v5, %v6027_v39  ;;  %v2795_v10 = vmul.f32 %v2791_v6, %v6023_v11  ;;  %v2804_v40 = vmul.f32 %v2792_v5, %v6017_v17  ;;  %v2803_v16 = vmul.f32 %v2791_v6, %v6011_v42  ;;  %v5321_v6 = vld [vmem:[#allocation6 + $0x7e4] sm:$0xf] }
 0x618   :  { %v4868_v5 = vor.u32 %v5305_v0, %v4865_v1  ;;  %v4905_v0 = vld [vmem:[#allocation6 + $0x7b8] sm:$0xf0] }
 0x619   :  { %v2799_v8 = vrot.slane %v2796_v7, 7  ;;  %v4929_v7 = vld [vmem:[#allocation6 + $0x7e8] sm:$0xf0] }
 0x61a   :  { %3375 = vmatpush.bf16.msrb.mxu2 %v4868_v5  ;;  %v4895_v5 = vld [vmem:[#allocation6 + $0x7a0] sm:$0xf] }
 0x61b   :  { %v2800_v12 = vsel %vm753_vm5, %v2795_v10, %v2799_v8 }
 0x61c   :  { %v2802_v14 = vsub.f32 %v2761_v9, %v2800_v12 }
 0x61e   :  { %v2806_v19 = vperm.slane %v2802_v14, 0  ;;  %v2807_v22 = vperm.slane %v2802_v14, 1  ;;  %v4932_v14 = vor.u32 %v5321_v6, %v4929_v7 }
 0x620   :  { %v2810_v21 = vadd.f32 %v2806_v19, %v2803_v16  ;;  %v2811_v24 = vadd.f32 %v2807_v22, %v2804_v40  ;;  %v4855_v40 = vld [vmem:[#allocation6 + $0x750] sm:$0xf]  ;;  %v5304_v16 = vld [vmem:[#allocation6 + $0x754] sm:$0xf0]  ;;  %3388 = vmatpush.bf16.msrb.mxu3 %v4932_v14  ;;  %v4833_v14 = vld [vmem:[#allocation6 + $0x728] sm:$0xf0] }
 0x622   :  { %v2812_v25 = vmax.f32 %v2810_v21, 0.0  ;;  %v2813_v26 = vmax.f32 %v2811_v24, 0.0  ;;  %v4856_v21 = vor.u32 %v5304_v16, %v4855_v40  ;;  %v4919_v24 = vld [vmem:[#allocation6 + $0x7d0] sm:$0xf]  ;;  %v5313_v40 = vld [vmem:[#allocation6 + $0x7a4] sm:$0xf] }
 0x623   :  { %v4897_v16 = vld [vmem:[#allocation6 + $0x7a8] sm:$0xf0] }
 0x624   :  { %v2814_v28 = vpack.c.bf16 %v2812_v25, %v2812_v25  ;;  %v2815_v56 = vpack.c.bf16 %v2813_v26, %v2813_v26  ;;  %v5320_v25 = vld [vmem:[#allocation6 + $0x7d4] sm:$0xf0]  ;;  %3350 = vmatpush.bf16.msrb.mxu0 %v4856_v21  ;;  %v4900_v21 = vor.u32 %v5313_v40, %v4897_v16 }
 0x626   :  { %3017 = vmatmul.bf16.vlgmr.msra.gmra.mxu0 %v2814_v28  ;;  %3030 = vmatmul.bf16.vlgmr.msra.gmra.mxu1 %v2815_v56 }
 0x627   :  { %3043 = vmatmul.bf16.vlgmr.msra.gmra.mxu2 %v2814_v28  ;;  %3056 = vmatmul.bf16.vlgmr.msra.gmra.mxu3 %v2815_v56  ;;  %v4920_v56 = vor.u32 %v5320_v25, %v4919_v24  ;;  %v4823_v24 = vld [vmem:[#allocation6 + $0x710] sm:$0xf]  ;;  %v5296_v25 = vld [vmem:[#allocation6 + $0x714] sm:$0xf0] }
 0x629   :  { %3363 = vmatpush.bf16.msrb.mxu1 %v4920_v56  ;;  %v4887_v56 = vld [vmem:[#allocation6 + $0x790] sm:$0xf] }
 0x6a3   :  { %v3018_v11 = vpop.f32.mrf.mxu0  ;;  %v3031_v39 = vpop.f32.mrf.mxu1 }
 0x6a4   :  { %v6042_v31 = vadd.f32 %v3031_v39, %v3018_v11  ;;  %v5303_v11 = vld [vmem:[#allocation6 + $0x754] sm:$0xf]  ;;  %v4857_v39 = vld [vmem:[#allocation6 + $0x758] sm:$0xf0] }
 0x6a6   :  { %v3061_v17 = vrot.slane %v6042_v31, 4  ;;  %v3073_v42 = vmul.f32 %v6042_v31, %v6042_v31 }
 0x6a8   :  { %v3062_v32 = vadd.f32 %v3061_v17, %v6042_v31  ;;  %v3075_v27 = vrot.slane %v3073_v42, 4 }
 0x6aa   :  { %v3063_v35 = vrot.slane %v3062_v32, 2  ;;  %v3076_v53 = vadd.f32 %v3075_v27, %v3073_v42  ;;  %v3044_v13 = vpop.f32.mrf.mxu2  ;;  %v3057_v20 = vpop.f32.mrf.mxu3  ;;  %v5319_v27 = vld [vmem:[#allocation6 + $0x7d4] sm:$0xf] }
 0x6ab   :  { %v6048_v33 = vadd.f32 %v3057_v20, %v3044_v13  ;;  %v3020_v43 = vpop.f32.mrf.mxu0  ;;  %v3033_v36 = vpop.f32.mrf.mxu1  ;;  %v4847_v20 = vld [vmem:[#allocation6 + $0x740] sm:$0xf] }
 0x6ac   :  { %v3064_v34 = vadd.f32 %v3063_v35, %v3062_v32  ;;  %v3077_v38 = vrot.slane %v3076_v53, 2  ;;  %v4860_v32 = vor.u32 %v5303_v11, %v4857_v39  ;;  %v4921_v35 = vld [vmem:[#allocation6 + $0x7d8] sm:$0xf0]  ;;  %v4848_v55 = vor.u32 %v5302_v63, %v4847_v20  ;;  %v5312_v11 = vld [vmem:[#allocation6 + $0x794] sm:$0xf0] }
 0x6ad   :  { %v3067_v54 = vrot.slane %v6048_v33, 4  ;;  %v3074_v45 = vmul.f32 %v6048_v33, %v6048_v33  ;;  %v4924_v13 = vor.u32 %v5319_v27, %v4921_v35  ;;  %v5295_v39 = vld [vmem:[#allocation6 + $0x714] sm:$0xf]  ;;  %v4889_v27 = vld [vmem:[#allocation6 + $0x798] sm:$0xf0]  ;;  %v4888_v35 = vor.u32 %v5312_v11, %v4887_v56 }
 0x6ae   :  { %v3065_v37 = vrot.slane %v3064_v34, 1  ;;  %v3078_v50 = vadd.f32 %v3077_v38, %v3076_v53  ;;  %3376 = vmatpush.bf16.msrb.mxu2 %v4860_v32  ;;  %v4849_v38 = vld [vmem:[#allocation6 + $0x748] sm:$0xf0]  ;;  %3351 = vmatpush.bf16.msrb.mxu0 %v4848_v55  ;;  %v5311_v32 = vld [vmem:[#allocation6 + $0x794] sm:$0xf] }
 0x6af   :  { %v3068_v51 = vadd.f32 %v3067_v54, %v6048_v33  ;;  %v3081_v52 = vrot.slane %v3074_v45, 4  ;;  %3389 = vmatpush.bf16.msrb.mxu3 %v4924_v13  ;;  %v4852_v54 = vor.u32 %v5301_v48, %v4849_v38  ;;  %v4892_v13 = vor.u32 %v5311_v32, %v4889_v27  ;;  %v4815_v20 = vld [vmem:[#allocation6 + $0x700] sm:$0xf]  ;;  %v5294_v63 = vld [vmem:[#allocation6 + $0x704] sm:$0xf0] }
 0x6b0   :  { %v3066_v58 = vadd.f32 %v3065_v37, %v3064_v34  ;;  %v3079_v61 = vrot.slane %v3078_v50, 1  ;;  %v4912_v34 = vor.u32 %v5318_v15, %v4911_v29  ;;  %v4839_v37 = vld [vmem:[#allocation6 + $0x730] sm:$0xf]  ;;  %v4816_v29 = vor.u32 %v5294_v63, %v4815_v20  ;;  %v5293_v55 = vld [vmem:[#allocation6 + $0x704] sm:$0xf] }
 0x6b1   :  { %v3069_v2 = vrot.slane %v3068_v51, 2  ;;  %v3082_v4 = vadd.f32 %v3081_v52, %v3074_v45  ;;  %v4913_v45 = vld [vmem:[#allocation6 + $0x7c8] sm:$0xf0]  ;;  %v5316_v52 = vld [vmem:[#allocation6 + $0x7b4] sm:$0xf0] }
 0x6b2   :  { %v3080_v8 = vadd.f32 %v3079_v61, %v3078_v50  ;;  %v6054_v9 = vmul.f32 0.125, %v3066_v58  ;;  %v3046_v10 = vpop.f32.mrf.mxu2  ;;  %v3059_v12 = vpop.f32.mrf.mxu3  ;;  %3364 = vmatpush.bf16.msrb.mxu1 %v4912_v34  ;;  %v4916_v44 = vor.u32 %v5317_v46, %v4913_v45  ;;  %v5300_v50 = vld [vmem:[#allocation6 + $0x734] sm:$0xf0]  ;;  %3377 = vmatpush.bf16.msrb.mxu2 %v4852_v54  ;;  %v5315_v58 = vld [vmem:[#allocation6 + $0x7b4] sm:$0xf] }
 0x6b3   :  { %v3070_v19 = vadd.f32 %v3069_v2, %v3068_v51  ;;  %v3083_v22 = vrot.slane %v3082_v4, 2  ;;  %v4840_v23 = vor.u32 %v5300_v50, %v4839_v37  ;;  %v4903_v51 = vld [vmem:[#allocation6 + $0x7b0] sm:$0xf]  ;;  %v4908_v1 = vor.u32 %v5315_v58, %v4905_v0  ;;  %v4831_v2 = vld [vmem:[#allocation6 + $0x720] sm:$0xf] }
 0x6b4   :  { %v3089_v26 = vmul.f32 0.125, %v3080_v8  ;;  %v3091_v28 = vmul.f32 %v6054_v9, %v6054_v9  ;;  %3390 = vmatpush.bf16.msrb.mxu3 %v4916_v44  ;;  %v4904_v3 = vor.u32 %v5316_v52, %v4903_v51  ;;  %v5314_v8 = vld [vmem:[#allocation6 + $0x7a4] sm:$0xf0]  ;;  %v5297_v10 = vld [vmem:[#allocation6 + $0x724] sm:$0xf] }
 0x6b5   :  { %v3071_v17 = vrot.slane %v3070_v19, 1  ;;  %v3084_v42 = vadd.f32 %v3083_v22, %v3082_v4  ;;  %3352 = vmatpush.bf16.msrb.mxu0 %v4840_v23  ;;  %v5298_v4 = vld [vmem:[#allocation6 + $0x724] sm:$0xf0]  ;;  %v4896_v12 = vor.u32 %v5314_v8, %v4895_v5  ;;  %v4836_v22 = vor.u32 %v5297_v10, %v4833_v14  ;;  %v5309_v34 = vld [vmem:[#allocation6 + $0x784] sm:$0xf] }
 0x6b6   :  { %v3093_v53 = vsub.f32 %v3089_v26, %v3091_v28  ;;  %3365 = vmatpush.bf16.msrb.mxu1 %v4904_v3  ;;  %3378 = vmatpush.bf16.msrb.mxu2 %v4844_v62  ;;  %v4832_v7 = vor.u32 %v5298_v4, %v4831_v2  ;;  %v4824_v28 = vor.u32 %v5296_v25, %v4823_v24  ;;  %v4881_v38 = vld [vmem:[#allocation6 + $0x788] sm:$0xf0]  ;;  %v3098_v3 = vld [vmem:[#allocation9 + $0x16] ss:$8 sm:$0x3] }
 0x6b7   :  { %v3072_v43 = vadd.f32 %v3071_v17, %v3070_v19  ;;  %v3085_v36 = vrot.slane %v3084_v42, 1  ;;  %v3100_v4 = vld [vmem:[#allocation9 + $0x17] ss:$8 sm:$0x3] }
 0x6b8   :  { %v3095_v47 = vmax.f32 %v3093_v53, 0.0  ;;  %3391 = vmatpush.bf16.msrb.mxu3 %v4908_v1 }
 0x6b9   :  { %v3086_v59 = vadd.f32 %v3085_v36, %v3084_v42  ;;  %v6058_v18 = vmul.f32 0.125, %v3072_v43  ;;  %3353 = vmatpush.bf16.msrb.mxu0 %v4832_v7  ;;  %v4825_v42 = vld [vmem:[#allocation6 + $0x718] sm:$0xf0]  ;;  %v4879_v43 = vld [vmem:[#allocation6 + $0x780] sm:$0xf] }
 0x6ba   :  { %v6060_v41 = vadd.f32 1e-05, %v3095_v47  ;;  %3366 = vmatpush.bf16.msrb.mxu1 %v4896_v12  ;;  %3379 = vmatpush.bf16.msrb.mxu2 %v4836_v22  ;;  %v4828_v53 = vor.u32 %v5295_v39, %v4825_v42  ;;  %v5310_v36 = vld [vmem:[#allocation6 + $0x784] sm:$0xf0]  ;;  %v4817_v47 = vld [vmem:[#allocation6 + $0x708] sm:$0xf0] }
 0x6bb   :  { %v3090_v30 = vmul.f32 0.125, %v3086_v59  ;;  %v3092_v49 = vmul.f32 %v6058_v18, %v6058_v18  ;;  %v4880_v48 = vor.u32 %v5310_v36, %v4879_v43  ;;  %v4820_v46 = vor.u32 %v5293_v55, %v4817_v47  ;;  %v5340_v42 = vld [vmem:[#allocation7 + $0x78] sm:$0xff]  ;;  %v5331_v36 = vld [vmem:[#allocation7 + $0x30] sm:$0xff] }
 0x6bc   :  { %5398 = vrsqrt.f32 %v6060_v41  ;;  %3392 = vmatpush.bf16.msrb.mxu3 %v4900_v21  ;;  %v4884_v59 = vor.u32 %v5309_v34, %v4881_v38  ;;  %vm3109_vm0 = vweird.f32 %v6060_v41  ;;  %v5339_v55 = vld [vmem:[#allocation7 + $0x70] sm:$0xff] }
 0x6bd   :  { %v3094_v61 = vsub.f32 %v3090_v30, %v3092_v49  ;;  %3354 = vmatpush.bf16.msrb.mxu0 %v4824_v28 }
 0x6be   :  { %3367 = vmatpush.bf16.msrb.mxu1 %v4888_v35  ;;  %3380 = vmatpush.bf16.msrb.mxu2 %v4828_v53 }
 0x6bf   :  { %v3096_v6 = vmax.f32 %v3094_v61, 0.0 }
 0x6c0   :  { %3393 = vmatpush.bf16.msrb.mxu3 %v4892_v13 }
 0x6c1   :  { %v3102_v19 = vadd.f32 1e-05, %v3096_v6  ;;  %3355 = vmatpush.bf16.msrb.mxu0 %v4816_v29 }
 0x6c2   :  { %v5399_v26 = vpop.eup %5398  ;;  %3368 = vmatpush.bf16.msrb.mxu1 %v4880_v48  ;;  %3381 = vmatpush.bf16.msrb.mxu2 %v4820_v46 }
 0x6c3   :  { %v3104_v17 = vmul.f32 %v5399_v26, %v6060_v41  ;;  %5400 = vrsqrt.f32 %v3102_v19  ;;  %vm3110_vm13 = vweird.f32 %v5399_v26  ;;  %vm3119_vm15 = vweird.f32 %v3102_v19 }
 0x6c4   :  { %3394 = vmatpush.bf16.msrb.mxu3 %v4884_v59  ;;  %vm3111_vm3 = vmor %vm3109_vm0, %vm3110_vm13 }
 0x6c5   :  { %v3105_v15 = vmul.f32 %v5399_v26, %v3104_v17  ;;  %v5332_v17 = vld [vmem:[#allocation7 + $0x38] sm:$0xff] }
 0x6c6   :  { %3627 = vmatpush.bf16.msra.mxu0 %v5332_v17  ;;  %3640 = vmatpush.bf16.msra.mxu1 %v5340_v42 }
 0x6c7   :  { %v3106_v45 = vmul.f32 0.5, %v3105_v15 }
 0x6c9   :  { %v5401_v54 = vpop.eup %5400  ;;  %v3107_v50 = vsub.f32 1.5, %v3106_v45 }
 0x6ca   :  { %v3114_v44 = vmul.f32 %v5401_v54, %v3102_v19  ;;  %vm3120_vm11 = vweird.f32 %v5401_v54  ;;  %3628 = vmatpush.bf16.msra.mxu0 %v5331_v36  ;;  %3641 = vmatpush.bf16.msra.mxu1 %v5339_v55 }
 0x6cb   :  { %v3108_v23 = vmul.f32 %v5399_v26, %v3107_v50  ;;  %vm3121_vm14 = vmor %vm3119_vm15, %vm3120_vm11  ;;  %v5338_v50 = vld [vmem:[#allocation7 + $0x68] sm:$0xff] }
 0x6cc   :  { %v3115_v37 = vmul.f32 %v5401_v54, %v3114_v44 }
 0x6cd   :  { %v3112_v57 = vsel %vm3111_vm3, %v5399_v26, %v3108_v23 }
 0x6ce   :  { %v3116_v30 = vmul.f32 0.5, %v3115_v37  ;;  %v5330_v37 = vld [vmem:[#allocation7 + $0x28] sm:$0xff]  ;;  %3642 = vmatpush.bf16.msra.mxu1 %v5338_v50 }
 0x6cf   :  { %3629 = vmatpush.bf16.msra.mxu0 %v5330_v37 }
 0x6d0   :  { %v3117_v49 = vsub.f32 1.5, %v3116_v30 }
 0x6d2   :  { %v3118_v51 = vmul.f32 %v5401_v54, %v3117_v49 }
 0x6d4   :  { %v3122_v52 = vsel %vm3121_vm14, %v5401_v54, %v3118_v51 }
 0x6d5   :  { %v3125_v60 = vrot.slane %v3122_v52, 7 }
 0x6d7   :  { %v3126_v58 = vsel %vm753_vm5, %v3112_v57, %v3125_v60  ;;  %v5329_v57 = vld [vmem:[#allocation7 + $0x20] sm:$0xff] }
 0x6d8   :  { %v3128_v61 = vmul.f32 %v3126_v58, %v3098_v3  ;;  %v5337_v58 = vld [vmem:[#allocation7 + $0x60] sm:$0xff]  ;;  %3630 = vmatpush.bf16.msra.mxu0 %v5329_v57 }
 0x6d9   :  { %3643 = vmatpush.bf16.msra.mxu1 %v5337_v58 }
 0x6da   :  { %v3131_v62 = vperm.slane %v3128_v61, 1  ;;  %v3130_v0 = vperm.slane %v3128_v61, 0 }
 0x6dc   :  { %v3135_v1 = vmul.f32 %v3131_v62, %v6058_v18  ;;  %v3134_v5 = vmul.f32 %v3130_v0, %v6054_v9  ;;  %v3143_v41 = vmul.f32 %v3131_v62, %v6048_v33  ;;  %v3142_v8 = vmul.f32 %v3130_v0, %v6042_v31 }
 0x6de   :  { %v3138_v2 = vrot.slane %v3135_v1, 7 }
 0x6e0   :  { %v3139_v6 = vsel %vm753_vm5, %v3134_v5, %v3138_v2  ;;  %v5328_v5 = vld [vmem:[#allocation7 + $0x18] sm:$0xff] }
 0x6e1   :  { %v3141_v7 = vsub.f32 %v3100_v4, %v3139_v6  ;;  %v5336_v6 = vld [vmem:[#allocation7 + $0x58] sm:$0xff]  ;;  %3631 = vmatpush.bf16.msra.mxu0 %v5328_v5 }
 0x6e2   :  { %3644 = vmatpush.bf16.msra.mxu1 %v5336_v6 }
 0x6e3   :  { %v3145_v10 = vperm.slane %v3141_v7, 0  ;;  %v3146_v12 = vperm.slane %v3141_v7, 1 }
 0x6e5   :  { %v3149_v14 = vadd.f32 %v3145_v10, %v3142_v8  ;;  %v3150_v40 = vadd.f32 %v3146_v12, %v3143_v41  ;;  %v5327_v10 = vld [vmem:[#allocation7 + $0x10] sm:$0xff] }
 0x6e6   :  { %v5335_v12 = vld [vmem:[#allocation7 + $0x50] sm:$0xff]  ;;  %3632 = vmatpush.bf16.msra.mxu0 %v5327_v10 }
 0x6e7   :  { %v3151_v16 = vmax.f32 %v3149_v14, 0.0  ;;  %v3152_v19 = vmax.f32 %v3150_v40, 0.0  ;;  %3645 = vmatpush.bf16.msra.mxu1 %v5335_v12  ;;  %v5326_v40 = vld [vmem:[#allocation7 + $0x8] sm:$0xff] }
 0x6e9   :  { %v3153_v22 = vpack.c.bf16 %v3151_v16, %v3151_v16  ;;  %v3154_v21 = vpack.c.bf16 %v3152_v19, %v3152_v19  ;;  %v5334_v16 = vld [vmem:[#allocation7 + $0x48] sm:$0xff] }
 0x6ea   :  { %3633 = vmatpush.bf16.msra.mxu0 %v5326_v40 }
 0x6eb   :  { %3356 = vmatmul.bf16.vlgmr.msrb.gmra.mxu0 %v3153_v22  ;;  %3369 = vmatmul.bf16.vlgmr.msrb.gmra.mxu1 %v3154_v21 }
 0x6ec   :  { %3382 = vmatmul.bf16.vlgmr.msrb.gmra.mxu2 %v3153_v22  ;;  %3395 = vmatmul.bf16.vlgmr.msrb.gmra.mxu3 %v3154_v21 }
 0x6ed   :  { %3646 = vmatpush.bf16.msra.mxu1 %v5334_v16 }
 0x768   :  { %v3357_v9 = vpop.f32.mrf.mxu0  ;;  %v3370_v18 = vpop.f32.mrf.mxu1 }
 0x769   :  { %v6073_v24 = vadd.f32 %v3370_v18, %v3357_v9  ;;  %v5325_v9 = vld [vmem:[#allocation7] sm:$0xff] }
 0x76a   :  { %v5333_v18 = vld [vmem:[#allocation7 + $0x40] sm:$0xff]  ;;  %3634 = vmatpush.bf16.msra.mxu0 %v5325_v9 }
 0x76b   :  { %v3400_v33 = vrot.slane %v6073_v24, 4  ;;  %v3412_v31 = vmul.f32 %v6073_v24, %v6073_v24  ;;  %3647 = vmatpush.bf16.msra.mxu1 %v5333_v18 }
 0x76d   :  { %v3401_v25 = vadd.f32 %v3400_v33, %v6073_v24  ;;  %v3414_v26 = vrot.slane %v3412_v31, 4 }
 0x76f   :  { %v3402_v28 = vrot.slane %v3401_v25, 2  ;;  %v3415_v56 = vadd.f32 %v3414_v26, %v3412_v31  ;;  %v3383_v11 = vpop.f32.mrf.mxu2  ;;  %v3396_v39 = vpop.f32.mrf.mxu3 }
 0x770   :  { %v6079_v32 = vadd.f32 %v3396_v39, %v3383_v11  ;;  %v3359_v27 = vpop.f32.mrf.mxu0  ;;  %v3372_v35 = vpop.f32.mrf.mxu1 }
 0x771   :  { %v3403_v53 = vadd.f32 %v3402_v28, %v3401_v25  ;;  %v3416_v13 = vrot.slane %v3415_v56, 2  ;;  %v3437_v35 = vld [vmem:[#allocation9 + $0x20] ss:$8 sm:$0x3] }
 0x772   :  { %v3406_v20 = vrot.slane %v6079_v32, 4  ;;  %v3413_v63 = vmul.f32 %v6079_v32, %v6079_v32 }
 0x773   :  { %v3404_v29 = vrot.slane %v3403_v53, 1  ;;  %v3417_v43 = vadd.f32 %v3416_v13, %v3415_v56 }
 0x774   :  { %v3407_v15 = vadd.f32 %v3406_v20, %v6079_v32  ;;  %v3420_v48 = vrot.slane %v3413_v63, 4 }
 0x775   :  { %v3405_v47 = vadd.f32 %v3404_v29, %v3403_v53  ;;  %v3418_v34 = vrot.slane %v3417_v43, 1 }
 0x776   :  { %v3408_v38 = vrot.slane %v3407_v15, 2  ;;  %v3421_v46 = vadd.f32 %v3420_v48, %v3413_v63 }
 0x777   :  { %v3419_v59 = vadd.f32 %v3418_v34, %v3417_v43  ;;  %v6085_v54 = vmul.f32 0.125, %v3405_v47  ;;  %v3385_v45 = vpop.f32.mrf.mxu2  ;;  %v3398_v44 = vpop.f32.mrf.mxu3 }
 0x778   :  { %v3409_v30 = vadd.f32 %v3408_v38, %v3407_v15  ;;  %v3422_v49 = vrot.slane %v3421_v46, 2  ;;  %v3439_v15 = vld [vmem:[#allocation9 + $0x21] ss:$8 sm:$0x3] }
 0x779   :  { %v3428_v23 = vmul.f32 0.125, %v3419_v59  ;;  %v3430_v51 = vmul.f32 %v6085_v54, %v6085_v54 }
 0x77a   :  { %v3410_v52 = vrot.slane %v3409_v30, 1  ;;  %v3423_v3 = vadd.f32 %v3422_v49, %v3421_v46 }
 0x77b   :  { %v3432_v60 = vsub.f32 %v3428_v23, %v3430_v51  ;;  %v3527_v51 = vld [vmem:[#allocation9 + $0x22] ss:$8 sm:$0x3] }
 0x77c   :  { %v3411_v61 = vadd.f32 %v3410_v52, %v3409_v30  ;;  %v3424_v62 = vrot.slane %v3423_v3, 1  ;;  %v3529_v52 = vperm.slane %v3527_v51, 0 }
 0x77d   :  { %v3434_v0 = vmax.f32 %v3432_v60, 0.0 }
 0x77e   :  { %v3425_v1 = vadd.f32 %v3424_v62, %v3423_v3  ;;  %v3427_v2 = vmul.f32 0.125, %v3411_v61 }
 0x77f   :  { %v3440_v4 = vadd.f32 1e-05, %v3434_v0 }
 0x780   :  { %v3429_v7 = vmul.f32 0.125, %v3425_v1  ;;  %v3431_v41 = vmul.f32 %v3427_v2, %v3427_v2 }
 0x781   :  { %5402 = vrsqrt.f32 %v3440_v4  ;;  %vm3448_vm8 = vweird.f32 %v3440_v4 }
 0x782   :  { %v3433_v8 = vsub.f32 %v3429_v7, %v3431_v41 }
 0x784   :  { %v3435_v14 = vmax.f32 %v3433_v8, 0.0 }
 0x786   :  { %v3441_v19 = vadd.f32 1e-05, %v3435_v14 }
 0x787   :  { %v5403_v22 = vpop.eup %5402 }
 0x788   :  { %v3443_v21 = vmul.f32 %v5403_v22, %v3440_v4  ;;  %5404 = vrsqrt.f32 %v3441_v19  ;;  %vm3449_vm4 = vweird.f32 %v5403_v22  ;;  %vm3458_vm6 = vweird.f32 %v3441_v19 }
 0x789   :  { %vm3450_vm2 = vmor %vm3448_vm8, %vm3449_vm4 }
 0x78a   :  { %v3444_v33 = vmul.f32 %v5403_v22, %v3443_v21 }
 0x78c   :  { %v3445_v25 = vmul.f32 0.5, %v3444_v33 }
 0x78e   :  { %v5405_v31 = vpop.eup %5404  ;;  %v3446_v56 = vsub.f32 1.5, %v3445_v25 }
 0x78f   :  { %v3453_v26 = vmul.f32 %v5405_v31, %v3441_v19  ;;  %vm3459_vm12 = vweird.f32 %v5405_v31 }
 0x790   :  { %v3447_v17 = vmul.f32 %v5403_v22, %v3446_v56  ;;  %vm3460_vm1 = vmor %vm3458_vm6, %vm3459_vm12 }
 0x791   :  { %v3454_v28 = vmul.f32 %v5405_v31, %v3453_v26 }
 0x792   :  { %v3451_v13 = vsel %vm3450_vm2, %v5403_v22, %v3447_v17 }
 0x793   :  { %v3455_v11 = vmul.f32 0.5, %v3454_v28 }
 0x795   :  { %v3456_v39 = vsub.f32 1.5, %v3455_v11 }
 0x797   :  { %v3457_v42 = vmul.f32 %v5405_v31, %v3456_v39 }
 0x799   :  { %v3461_v27 = vsel %vm3460_vm1, %v5405_v31, %v3457_v42 }
 0x79a   :  { %v3464_v53 = vrot.slane %v3461_v27, 7 }
 0x79c   :  { %v3465_v20 = vsel %vm753_vm5, %v3451_v13, %v3464_v53 }
 0x79d   :  { %v3467_v63 = vmul.f32 %v3465_v20, %v3437_v35 }
 0x79f   :  { %v3470_v29 = vperm.slane %v3467_v63, 1  ;;  %v3469_v43 = vperm.slane %v3467_v63, 0 }
 0x7a1   :  { %v3474_v36 = vmul.f32 %v3470_v29, %v3427_v2  ;;  %v3473_v48 = vmul.f32 %v3469_v43, %v6085_v54  ;;  %v3482_v38 = vmul.f32 %v3470_v29, %v6079_v32  ;;  %v3481_v46 = vmul.f32 %v3469_v43, %v6073_v24 }
 0x7a3   :  { %v3477_v55 = vrot.slane %v3474_v36, 7 }
 0x7a5   :  { %v3478_v47 = vsel %vm753_vm5, %v3473_v48, %v3477_v55 }
 0x7a6   :  { %v3480_v34 = vsub.f32 %v3439_v15, %v3478_v47 }
 0x7a8   :  { %v3484_v59 = vperm.slane %v3480_v34, 0  ;;  %v3485_v45 = vperm.slane %v3480_v34, 1 }
 0x7aa   :  { %v3488_v44 = vadd.f32 %v3484_v59, %v3481_v46  ;;  %v3489_v37 = vadd.f32 %v3485_v45, %v3482_v38 }
 0x7ac   :  { %v3490_v50 = vmax.f32 %v3488_v44, 0.0  ;;  %v3491_v30 = vmax.f32 %v3489_v37, 0.0 }
 0x7ae   :  { %v3492_v49 = vpack.c.bf16 %v3490_v50, %v3490_v50  ;;  %v3493_v23 = vpack.c.bf16 %v3491_v30, %v3491_v30 }
 0x7b0   :  { %3635 = vmatmul.bf16.vlgmr.msra.gmra.mxu0 %v3492_v49  ;;  %3648 = vmatmul.bf16.vlgmr.msra.gmra.mxu1 %v3493_v23 }
 0x82d   :  { %v3636_v54 = vpop.f32.mrf.mxu0  ;;  %v3649_v3 = vpop.f32.mrf.mxu1 }
 0x82e   :  { %v3637_v60 = vadd.f32 %v3636_v54, %v3529_v52 }
 0x830   :  { %v3650_v57 = vadd.f32 %v3649_v3, %v3637_v60 }
 0x832   :  { %3653 = vst [vmem:[%s6102_s5] sm:$0xff] %v3650_v57 }
 0x835   :  { %v3638_v24 = vpop.f32.mrf.mxu0  ;;  %v3651_v32 = vpop.f32.mrf.mxu1 }
 0x836   :  { %3658 = vsyncpa [#allocation3], 1 }
 0x837   :  { %3659 = vsyncpa [#allocation5], 1 }
 0x838   :  { %3660 = vsyncpa [#allocation8], 1 }

</bundles_post_ra>
